<compile_context>
chip_gen: v7x
topology: tpu7x:2x2x1
jax: 0.10.0
libtpu: 0.0.40
codegen_flags: <defaults>
</compile_context>

<pallas_src>
import jax
import jax.numpy as jnp
from jax.experimental import pallas as pl
from jax.experimental.pallas import tpu as pltpu

EMBEDDING_WIDTH = 128
LAYER_SIZE = 256
MAX_WORDS = 10000

LIN_TN = 2560                                                   # vocab tile
VOCAB_PAD = ((MAX_WORDS + LIN_TN - 1) // LIN_TN) * LIN_TN        # 10240
TIME_BLOCK = 32                                                  # timesteps / grid step
SUBLANES = 8                                                     # f32 sublane count


def _round_up(x, m):
    return ((x + m - 1) // m) * m


# ----------------------------------------------------------------------------
# LSTM kernel: 2 stacked LSTM layers, time-blocked grid, recurrence inside.
# PyTorch gate order: i, f, g, o.
# ----------------------------------------------------------------------------
def _lstm2_kernel(x_ref, wih0_ref, b0_ref, whh0_ref, w1_ref, b1_ref,
                  out_ref, gin_ref, h0, c0, h1, c1):
    tb = pl.program_id(0)
    H = LAYER_SIZE
    B = h0.shape[0]                      # padded batch (multiple of 8)
    Tt = x_ref.shape[0] // B             # timesteps in this block

    @pl.when(tb == 0)
    def _():
        h0[...] = jnp.zeros_like(h0)
        c0[...] = jnp.zeros_like(c0)
        h1[...] = jnp.zeros_like(h1)
        c1[...] = jnp.zeros_like(c1)

    # Layer-0 input projection for the whole time block (no time dependency):
    # one (Tt*B, E) @ (E, 4H) matmul instead of Tt tiny per-step matmuls.
    gin_ref[...] = (jnp.dot(x_ref[...], wih0_ref[...],
                            preferred_element_type=jnp.float32)
                    + b0_ref[...])

    def gates(g):
        i = jax.nn.sigmoid(g[:, 0 * H:1 * H])
        f = jax.nn.sigmoid(g[:, 1 * H:2 * H])
        gg = jnp.tanh(g[:, 2 * H:3 * H])
        o = jax.nn.sigmoid(g[:, 3 * H:4 * H])
        return i, f, gg, o

    def step(t, carry):
        h0v, c0v, h1v, c1v = carry
        row = pl.multiple_of(t * B, SUBLANES)

        # Layer 0: only the recurrent dot remains inside the loop.
        g0 = gin_ref[pl.ds(row, B), :] + jnp.dot(
            h0v.astype(jnp.bfloat16), whh0_ref[...],
            preferred_element_type=jnp.float32)
        i0, f0, gg0, o0 = gates(g0)
        c0n = f0 * c0v + i0 * gg0
        h0n = o0 * jnp.tanh(c0n)

        # Layer 1: single fused dot over concatenated [input, hidden] (K = 512).
        xin1 = jnp.concatenate(
            [h0n.astype(jnp.bfloat16), h1v.astype(jnp.bfloat16)], axis=1)
        g1 = (jnp.dot(xin1, w1_ref[...], preferred_element_type=jnp.float32)
              + b1_ref[...])
        i1, f1, gg1, o1 = gates(g1)
        c1n = f1 * c1v + i1 * gg1
        h1n = o1 * jnp.tanh(c1n)

        out_ref[pl.ds(row, B), :] = h1n
        return (h0n, c0n, h1n, c1n)

    h0f, c0f, h1f, c1f = jax.lax.fori_loop(
        0, Tt, step, (h0[...], c0[...], h1[...], c1[...]))
    h0[...] = h0f
    c0[...] = c0f
    h1[...] = h1f
    c1[...] = c1f


def lstm2_pallas(x2d, wih0, b0, whh0, w1, b1, *, batch, time_block):
    """x2d: (T*B, E) bf16, time-major rows (t major, b minor) -> (T*B, H) f32."""
    TB, E = x2d.shape
    B = batch
    T = TB // B
    Tt = time_block
    assert T % Tt == 0 and B % SUBLANES == 0
    H = LAYER_SIZE
    return pl.pallas_call(
        _lstm2_kernel,
        out_shape=jax.ShapeDtypeStruct((TB, H), jnp.float32),
        grid_spec=pltpu.PrefetchScalarGridSpec(
            num_scalar_prefetch=0,
            grid=(T // Tt,),
            in_specs=[
                pl.BlockSpec((Tt * B, E), lambda tb: (tb, 0)),    # x time block (bf16)
                pl.BlockSpec((E, 4 * H), lambda tb: (0, 0)),      # W_ih layer0 (bf16)
                pl.BlockSpec((1, 4 * H), lambda tb: (0, 0)),      # bias layer0 (f32)
                pl.BlockSpec((H, 4 * H), lambda tb: (0, 0)),      # W_hh layer0 (bf16)
                pl.BlockSpec((2 * H, 4 * H), lambda tb: (0, 0)),  # [W_ih1;W_hh1] (bf16)
                pl.BlockSpec((1, 4 * H), lambda tb: (0, 0)),      # bias layer1 (f32)
            ],
            out_specs=pl.BlockSpec((Tt * B, H), lambda tb: (tb, 0)),
            scratch_shapes=[
                pltpu.VMEM((Tt * B, 4 * H), jnp.float32),  # hoisted layer-0 gates
                pltpu.VMEM((B, H), jnp.float32),  # h0
                pltpu.VMEM((B, H), jnp.float32),  # c0
                pltpu.VMEM((B, H), jnp.float32),  # h1
                pltpu.VMEM((B, H), jnp.float32),  # c1
            ],
        ),
        compiler_params=pltpu.CompilerParams(
            dimension_semantics=("arbitrary",),   # sequential recurrence over time
        ),
    )(x2d, wih0, b0, whh0, w1, b1)


# ----------------------------------------------------------------------------
# Output projection kernel: (M, H) @ (H, Vp) + b, tiled over the vocab axis.
# Weight/bias are pre-padded to Vp; the output array has exact width n_out, so
# the last tile's out-of-bounds columns are masked on store (no slice copy).
# ----------------------------------------------------------------------------
def _linear_kernel(x_ref, w_ref, b_ref, o_ref):
    o_ref[...] = (jnp.dot(x_ref[...], w_ref[...],
                          preferred_element_type=jnp.float32)
                  + b_ref[...]).astype(o_ref.dtype)


def linear_pallas(x, w_pad, b_pad, n_out, *, tn=LIN_TN):
    """x: (M, H) bf16, w_pad: (H, Vp) bf16, b_pad: (1, Vp) f32 -> (M, n_out) f32."""
    M, H = x.shape
    Vp = w_pad.shape[1]
    assert Vp % tn == 0
    return pl.pallas_call(
        _linear_kernel,
        out_shape=jax.ShapeDtypeStruct((M, n_out), jnp.float32),
        grid_spec=pltpu.PrefetchScalarGridSpec(
            num_scalar_prefetch=0,
            grid=(Vp // tn,),
            in_specs=[
                pl.BlockSpec((M, H), lambda j: (0, 0)),
                pl.BlockSpec((H, tn), lambda j: (0, j)),
                pl.BlockSpec((1, tn), lambda j: (0, j)),
            ],
            out_specs=pl.BlockSpec((M, tn), lambda j: (0, j)),
        ),
        compiler_params=pltpu.CompilerParams(
            dimension_semantics=("parallel",),    # v7x: shards vocab axis across TCs
        ),
    )(x, w_pad, b_pad)


# ----------------------------------------------------------------------------
# Parameter init (deterministic, shapes match the PyTorch module).
# f32 master weights for the reference; kernel-ready bf16 / padded copies are
# built ONCE here (not per forward call).
# ----------------------------------------------------------------------------
def init_params(key):
    H, E, V = LAYER_SIZE, EMBEDDING_WIDTH, MAX_WORDS
    ks = jax.random.split(key, 12)
    k_lstm = 1.0 / jnp.sqrt(H)
    k_out = 1.0 / jnp.sqrt(H)
    p = {
        # nn.Embedding(MAX_WORDS, EMBEDDING_WIDTH), uniform(-0.05, 0.05)
        "embedding": jax.random.uniform(ks[0], (V, E), jnp.float32, -0.05, 0.05),
        # LSTM layer 0 (weights stored transposed: (in, 4H)), gate order i,f,g,o
        "wih0": jax.random.uniform(ks[1], (E, 4 * H), jnp.float32, -k_lstm, k_lstm),
        "whh0": jax.random.uniform(ks[2], (H, 4 * H), jnp.float32, -k_lstm, k_lstm),
        "b0": (jax.random.uniform(ks[3], (1, 4 * H), jnp.float32, -k_lstm, k_lstm)
               + jax.random.uniform(ks[4], (1, 4 * H), jnp.float32, -k_lstm, k_lstm)),
        # LSTM layer 1
        "wih1": jax.random.uniform(ks[5], (H, 4 * H), jnp.float32, -k_lstm, k_lstm),
        "whh1": jax.random.uniform(ks[6], (H, 4 * H), jnp.float32, -k_lstm, k_lstm),
        "b1": (jax.random.uniform(ks[7], (1, 4 * H), jnp.float32, -k_lstm, k_lstm)
               + jax.random.uniform(ks[8], (1, 4 * H), jnp.float32, -k_lstm, k_lstm)),
        # nn.Linear(LAYER_SIZE, MAX_WORDS), stored transposed: (H, V)
        "wout": jax.random.uniform(ks[9], (H, V), jnp.float32, -k_out, k_out),
        "bout": jax.random.uniform(ks[10], (V,), jnp.float32, -k_out, k_out),
    }
    # Kernel-ready derived params.
    p["wih0_bf16"] = p["wih0"].astype(jnp.bfloat16)
    p["whh0_bf16"] = p["whh0"].astype(jnp.bfloat16)
    p["w1_bf16"] = jnp.concatenate([p["wih1"], p["whh1"]],
                                   axis=0).astype(jnp.bfloat16)        # (2H, 4H)
    p["wout_pad"] = jnp.zeros((H, VOCAB_PAD), jnp.bfloat16).at[:, :V].set(
        p["wout"].astype(jnp.bfloat16))
    p["bout_pad"] = jnp.zeros((1, VOCAB_PAD), jnp.float32).at[0, :V].set(p["bout"])
    return p


# ----------------------------------------------------------------------------
# Forward pass (wrapper): embedding gather in JAX, LSTM + Linear in Pallas.
# ----------------------------------------------------------------------------
def decoder_forward(tokens, params):
    """tokens: (B, T) int32 -> logits (B, T, MAX_WORDS) f32."""
    B, T = tokens.shape
    H, E, V = LAYER_SIZE, EMBEDDING_WIDTH, MAX_WORDS

    Bp = _round_up(max(B, SUBLANES), SUBLANES)      # pad batch to sublane count
    Tt = T if T <= TIME_BLOCK else TIME_BLOCK
    Tp = _round_up(T, Tt)                           # pad time to a block multiple

    # Embedding lookup (gather) stays in JAX glue; MXU operands in bf16.
    x = jnp.take(params["embedding"], tokens, axis=0)        # (B, T, E) f32
    x = jnp.transpose(x, (1, 0, 2))                          # (T, B, E)
    x = jnp.pad(x, ((0, Tp - T), (0, Bp - B), (0, 0)))
    x2d = x.reshape(Tp * Bp, E).astype(jnp.bfloat16)         # time-major rows

    # 2-layer LSTM in Pallas (bf16 weights, f32 state / gates).
    h2d = lstm2_pallas(x2d, params["wih0_bf16"], params["b0"],
                       params["whh0_bf16"], params["w1_bf16"], params["b1"],
                       batch=Bp, time_block=Tt)              # (Tp*Bp, H) f32
    h = h2d.reshape(Tp, Bp, H)[:T, :B]                       # drop time/batch padding
    h = jnp.transpose(h, (1, 0, 2)).reshape(B * T, H).astype(jnp.bfloat16)

    # Output projection in Pallas (pre-padded bf16 weight, exact-width output).
    logits = linear_pallas(h, params["wout_pad"], params["bout_pad"], V)  # (B*T, V)

    # TODO(synk): expose final (h_n, c_n) as extra outputs for use_state=True.
    return logits.reshape(B, T, V)


# ----------------------------------------------------------------------------
# Pure-JAX f32 reference for correctness check
# ----------------------------------------------------------------------------
def decoder_forward_ref(tokens, params):
    B, T = tokens.shape
    H = LAYER_SIZE
    x = jnp.take(params["embedding"], tokens, axis=0)        # (B, T, E)

    def cell(x_in, h, c, wih, whh, b):
        gates = x_in @ wih + h @ whh + b
        i = jax.nn.sigmoid(gates[:, 0 * H:1 * H])
        f = jax.nn.sigmoid(gates[:, 1 * H:2 * H])
        g = jnp.tanh(gates[:, 2 * H:3 * H])
        o = jax.nn.sigmoid(gates[:, 3 * H:4 * H])
        c = f * c + i * g
        h = o * jnp.tanh(c)
        return h, c

    def step(carry, xt):
        h0, c0, h1, c1 = carry
        h0, c0 = cell(xt, h0, c0, params["wih0"], params["whh0"], params["b0"])
        h1, c1 = cell(h0, h1, c1, params["wih1"], params["whh1"], params["b1"])
        return (h0, c0, h1, c1), h1

    init = tuple(jnp.zeros((B, H), jnp.float32) for _ in range(4))
    _, ys = jax.lax.scan(step, init, jnp.transpose(x, (1, 0, 2)))
    h = jnp.transpose(ys, (1, 0, 2))                         # (B, T, H)
    return h @ params["wout"] + params["bout"]               # (B, T, V)


if __name__ == "__main__":
    key = jax.random.PRNGKey(0)
    params = init_params(key)

    B, T = 2, 8
    tokens = jax.random.randint(jax.random.PRNGKey(1), (B, T), 0, MAX_WORDS,
                                dtype=jnp.int32)

    logits = jax.jit(decoder_forward)(tokens, params)
    logits = jax.block_until_ready(logits)

    ref = decoder_forward_ref(tokens, params)
    assert logits.shape == (B, T, MAX_WORDS)
    max_err = float(jnp.max(jnp.abs(logits - ref)))
    # bf16 MXU operands vs. f32 reference -> loosened tolerance.
    assert max_err < 2e-2, max_err

    print("KERNEL_OK")
</pallas_src>

<mosaic_0001>
module attributes {stable_mosaic.version = 11 : i64} {
  func.func @_lstm2_kernel(%arg0: i32, %arg1: memref<64x128xbf16, #tpu.memory_space<vmem>>, %arg2: memref<128x1024xbf16, #tpu.memory_space<vmem>>, %arg3: memref<1x1024xf32, #tpu.memory_space<vmem>>, %arg4: memref<256x1024xbf16, #tpu.memory_space<vmem>>, %arg5: memref<512x1024xbf16, #tpu.memory_space<vmem>>, %arg6: memref<1x1024xf32, #tpu.memory_space<vmem>>, %arg7: memref<64x256xf32, #tpu.memory_space<vmem>>, %arg8: memref<64x1024xf32, #tpu.memory_space<vmem>>, %arg9: memref<8x256xf32, #tpu.memory_space<vmem>>, %arg10: memref<8x256xf32, #tpu.memory_space<vmem>>, %arg11: memref<8x256xf32, #tpu.memory_space<vmem>>, %arg12: memref<8x256xf32, #tpu.memory_space<vmem>>) attributes {dimension_semantics = [#tpu.dimension_semantics<arbitrary>], iteration_bounds = array<i64: 1>, scalar_prefetch = 0 : i64, scratch_operands = 5 : i64, tpu.core_type = #tpu.core_type<tc>, window_params = [{transform_indices = @transform_0, window_bounds = array<i64: 64, 128>}, {pipeline_mode = #tpu.pipeline_mode<synchronous>, transform_indices = @transform_1, window_bounds = array<i64: 128, 1024>}, {pipeline_mode = #tpu.pipeline_mode<synchronous>, transform_indices = @transform_2, window_bounds = array<i64: 1, 1024>}, {pipeline_mode = #tpu.pipeline_mode<synchronous>, transform_indices = @transform_3, window_bounds = array<i64: 256, 1024>}, {pipeline_mode = #tpu.pipeline_mode<synchronous>, transform_indices = @transform_4, window_bounds = array<i64: 512, 1024>}, {pipeline_mode = #tpu.pipeline_mode<synchronous>, transform_indices = @transform_5, window_bounds = array<i64: 1, 1024>}, {transform_indices = @transform_6, window_bounds = array<i64: 64, 256>}]} {
    %c0_i32 = arith.constant 0 : i32
    %0 = arith.cmpi eq, %arg0, %c0_i32 : i32
    %1 = arith.extui %0 : i1 to i32
    %c0_i32_0 = arith.constant 0 : i32
    %2 = arith.cmpi ne, %1, %c0_i32_0 : i32
    scf.if %2 {
      %cst_26 = arith.constant 0.000000e+00 : f32
      %20 = vector.broadcast %cst_26 : f32 to vector<8x256xf32>
      %c0_27 = arith.constant 0 : index
      %c0_28 = arith.constant 0 : index
      %21 = vector.load %arg9[%c0_27, %c0_28] : memref<8x256xf32, #tpu.memory_space<vmem>>, vector<8x256xf32>
      tpu.vector_store %arg9[%c0_27, %c0_28], %20 {strides = array<i32>} : memref<8x256xf32, #tpu.memory_space<vmem>>, vector<8x256xf32>,
      %cst_29 = arith.constant 0.000000e+00 : f32
      %22 = vector.broadcast %cst_29 : f32 to vector<8x256xf32>
      %c0_30 = arith.constant 0 : index
      %c0_31 = arith.constant 0 : index
      %23 = vector.load %arg10[%c0_30, %c0_31] : memref<8x256xf32, #tpu.memory_space<vmem>>, vector<8x256xf32>
      tpu.vector_store %arg10[%c0_30, %c0_31], %22 {strides = array<i32>} : memref<8x256xf32, #tpu.memory_space<vmem>>, vector<8x256xf32>,
      %cst_32 = arith.constant 0.000000e+00 : f32
      %24 = vector.broadcast %cst_32 : f32 to vector<8x256xf32>
      %c0_33 = arith.constant 0 : index
      %c0_34 = arith.constant 0 : index
      %25 = vector.load %arg11[%c0_33, %c0_34] : memref<8x256xf32, #tpu.memory_space<vmem>>, vector<8x256xf32>
      tpu.vector_store %arg11[%c0_33, %c0_34], %24 {strides = array<i32>} : memref<8x256xf32, #tpu.memory_space<vmem>>, vector<8x256xf32>,
      %cst_35 = arith.constant 0.000000e+00 : f32
      %26 = vector.broadcast %cst_35 : f32 to vector<8x256xf32>
      %c0_36 = arith.constant 0 : index
      %c0_37 = arith.constant 0 : index
      %27 = vector.load %arg12[%c0_36, %c0_37] : memref<8x256xf32, #tpu.memory_space<vmem>>, vector<8x256xf32>
      tpu.vector_store %arg12[%c0_36, %c0_37], %26 {strides = array<i32>} : memref<8x256xf32, #tpu.memory_space<vmem>>, vector<8x256xf32>,
    } else {
    }
    %c0 = arith.constant 0 : index
    %c0_1 = arith.constant 0 : index
    %3 = vector.load %arg1[%c0, %c0_1] : memref<64x128xbf16, #tpu.memory_space<vmem>>, vector<64x128xbf16>
    %c0_2 = arith.constant 0 : index
    %c0_3 = arith.constant 0 : index
    %4 = vector.load %arg2[%c0_2, %c0_3] : memref<128x1024xbf16, #tpu.memory_space<vmem>>, vector<128x1024xbf16>
    %cst = arith.constant dense<0.000000e+00> : vector<64x1024xf32>
    %5 = tpu.matmul %3, %4, %cst {dimension_numbers = #tpu.dot_dimension_numbers<[1], [0], [0], [1], [0, 0, 1, 1], [], []>} : vector<64x128xbf16>, vector<128x1024xbf16>, vector<64x1024xf32> -> vector<64x1024xf32>
    %c0_4 = arith.constant 0 : index
    %c0_5 = arith.constant 0 : index
    %6 = vector.load %arg3[%c0_4, %c0_5] : memref<1x1024xf32, #tpu.memory_space<vmem>>, vector<1x1024xf32>
    %7 = vector.broadcast %6 : vector<1x1024xf32> to vector<64x1024xf32>
    %8 = arith.addf %5, %7 : vector<64x1024xf32>
    %c0_6 = arith.constant 0 : index
    %c0_7 = arith.constant 0 : index
    %9 = vector.load %arg8[%c0_6, %c0_7] : memref<64x1024xf32, #tpu.memory_space<vmem>>, vector<64x1024xf32>
    tpu.vector_store %arg8[%c0_6, %c0_7], %8 {strides = array<i32>} : memref<64x1024xf32, #tpu.memory_space<vmem>>, vector<64x1024xf32>,
    %c0_8 = arith.constant 0 : index
    %c0_9 = arith.constant 0 : index
    %10 = vector.load %arg9[%c0_8, %c0_9] : memref<8x256xf32, #tpu.memory_space<vmem>>, vector<8x256xf32>
    %c0_10 = arith.constant 0 : index
    %c0_11 = arith.constant 0 : index
    %11 = vector.load %arg10[%c0_10, %c0_11] : memref<8x256xf32, #tpu.memory_space<vmem>>, vector<8x256xf32>
    %c0_12 = arith.constant 0 : index
    %c0_13 = arith.constant 0 : index
    %12 = vector.load %arg11[%c0_12, %c0_13] : memref<8x256xf32, #tpu.memory_space<vmem>>, vector<8x256xf32>
    %c0_14 = arith.constant 0 : index
    %c0_15 = arith.constant 0 : index
    %13 = vector.load %arg12[%c0_14, %c0_15] : memref<8x256xf32, #tpu.memory_space<vmem>>, vector<8x256xf32>
    %c0_i32_16 = arith.constant 0 : i32
    %c8_i32 = arith.constant 8 : i32
    %14 = arith.addi %c0_i32_16, %c8_i32 : i32
    %c1_i32 = arith.constant 1 : i32
    %15:4 = scf.for %arg13 = %c0_i32_16 to %14 step %c1_i32 iter_args(%arg14 = %10, %arg15 = %11, %arg16 = %12, %arg17 = %13) -> (vector<8x256xf32>, vector<8x256xf32>, vector<8x256xf32>, vector<8x256xf32>)  : i32 {
      %c8_i32_26 = arith.constant 8 : i32
      %20 = arith.muli %arg13, %c8_i32_26 : i32
      %21 = tpu.assume_multiple %20, 8 : i32
      %22 = arith.index_cast %21 : i32 to index
      %c0_27 = arith.constant 0 : index
      %23 = vector.load %arg8[%22, %c0_27] : memref<64x1024xf32, #tpu.memory_space<vmem>>, vector<8x1024xf32>
      %24 = arith.truncf %arg14 : vector<8x256xf32> to vector<8x256xbf16>
      %c0_28 = arith.constant 0 : index
      %c0_29 = arith.constant 0 : index
      %25 = vector.load %arg4[%c0_28, %c0_29] : memref<256x1024xbf16, #tpu.memory_space<vmem>>, vector<256x1024xbf16>
      %cst_30 = arith.constant dense<0.000000e+00> : vector<8x1024xf32>
      %26 = tpu.matmul %24, %25, %cst_30 {dimension_numbers = #tpu.dot_dimension_numbers<[1], [0], [0], [1], [0, 0, 1, 1], [], []>} : vector<8x256xbf16>, vector<256x1024xbf16>, vector<8x1024xf32> -> vector<8x1024xf32>
      %27 = arith.addf %23, %26 : vector<8x1024xf32>
      %28 = vector.extract_strided_slice %27 {offsets = [0, 0], sizes = [8, 256], strides = [1, 1]} : vector<8x1024xf32> to vector<8x256xf32>
      %29 = arith.negf %28 : vector<8x256xf32>
      %30 = math.exp %29 : vector<8x256xf32>
      %cst_31 = arith.constant 1.000000e+00 : f32
      %31 = vector.broadcast %cst_31 : f32 to vector<8x256xf32>
      %32 = arith.addf %31, %30 : vector<8x256xf32>
      %33 = arith.divf %31, %32 : vector<8x256xf32>
      %34 = vector.extract_strided_slice %27 {offsets = [0, 256], sizes = [8, 256], strides = [1, 1]} : vector<8x1024xf32> to vector<8x256xf32>
      %35 = arith.negf %34 : vector<8x256xf32>
      %36 = math.exp %35 : vector<8x256xf32>
      %cst_32 = arith.constant 1.000000e+00 : f32
      %37 = vector.broadcast %cst_32 : f32 to vector<8x256xf32>
      %38 = arith.addf %37, %36 : vector<8x256xf32>
      %39 = arith.divf %37, %38 : vector<8x256xf32>
      %40 = vector.extract_strided_slice %27 {offsets = [0, 512], sizes = [8, 256], strides = [1, 1]} : vector<8x1024xf32> to vector<8x256xf32>
      %41 = math.tanh %40 : vector<8x256xf32>
      %42 = vector.extract_strided_slice %27 {offsets = [0, 768], sizes = [8, 256], strides = [1, 1]} : vector<8x1024xf32> to vector<8x256xf32>
      %43 = arith.negf %42 : vector<8x256xf32>
      %44 = math.exp %43 : vector<8x256xf32>
      %cst_33 = arith.constant 1.000000e+00 : f32
      %45 = vector.broadcast %cst_33 : f32 to vector<8x256xf32>
      %46 = arith.addf %45, %44 : vector<8x256xf32>
      %47 = arith.divf %45, %46 : vector<8x256xf32>
      %48 = arith.mulf %39, %arg15 : vector<8x256xf32>
      %49 = arith.mulf %33, %41 : vector<8x256xf32>
      %50 = arith.addf %48, %49 : vector<8x256xf32>
      %51 = math.tanh %50 : vector<8x256xf32>
      %52 = arith.mulf %47, %51 : vector<8x256xf32>
      %53 = arith.truncf %52 : vector<8x256xf32> to vector<8x256xbf16>
      %54 = arith.truncf %arg16 : vector<8x256xf32> to vector<8x256xbf16>
      %55 = tpu.concatenate %53, %54 in 1 : vector<8x256xbf16>, vector<8x256xbf16> -> vector<8x512xbf16>
      %c0_34 = arith.constant 0 : index
      %c0_35 = arith.constant 0 : index
      %56 = vector.load %arg5[%c0_34, %c0_35] : memref<512x1024xbf16, #tpu.memory_space<vmem>>, vector<512x1024xbf16>
      %cst_36 = arith.constant dense<0.000000e+00> : vector<8x1024xf32>
      %57 = tpu.matmul %55, %56, %cst_36 {dimension_numbers = #tpu.dot_dimension_numbers<[1], [0], [0], [1], [0, 0, 1, 1], [], []>} : vector<8x512xbf16>, vector<512x1024xbf16>, vector<8x1024xf32> -> vector<8x1024xf32>
      %c0_37 = arith.constant 0 : index
      %c0_38 = arith.constant 0 : index
      %58 = vector.load %arg6[%c0_37, %c0_38] : memref<1x1024xf32, #tpu.memory_space<vmem>>, vector<1x1024xf32>
      %59 = vector.broadcast %58 : vector<1x1024xf32> to vector<8x1024xf32>
      %60 = arith.addf %57, %59 : vector<8x1024xf32>
      %61 = vector.extract_strided_slice %60 {offsets = [0, 0], sizes = [8, 256], strides = [1, 1]} : vector<8x1024xf32> to vector<8x256xf32>
      %62 = arith.negf %61 : vector<8x256xf32>
      %63 = math.exp %62 : vector<8x256xf32>
      %cst_39 = arith.constant 1.000000e+00 : f32
      %64 = vector.broadcast %cst_39 : f32 to vector<8x256xf32>
      %65 = arith.addf %64, %63 : vector<8x256xf32>
      %66 = arith.divf %64, %65 : vector<8x256xf32>
      %67 = vector.extract_strided_slice %60 {offsets = [0, 256], sizes = [8, 256], strides = [1, 1]} : vector<8x1024xf32> to vector<8x256xf32>
      %68 = arith.negf %67 : vector<8x256xf32>
      %69 = math.exp %68 : vector<8x256xf32>
      %cst_40 = arith.constant 1.000000e+00 : f32
      %70 = vector.broadcast %cst_40 : f32 to vector<8x256xf32>
      %71 = arith.addf %70, %69 : vector<8x256xf32>
      %72 = arith.divf %70, %71 : vector<8x256xf32>
      %73 = vector.extract_strided_slice %60 {offsets = [0, 512], sizes = [8, 256], strides = [1, 1]} : vector<8x1024xf32> to vector<8x256xf32>
      %74 = math.tanh %73 : vector<8x256xf32>
      %75 = vector.extract_strided_slice %60 {offsets = [0, 768], sizes = [8, 256], strides = [1, 1]} : vector<8x1024xf32> to vector<8x256xf32>
      %76 = arith.negf %75 : vector<8x256xf32>
      %77 = math.exp %76 : vector<8x256xf32>
      %cst_41 = arith.constant 1.000000e+00 : f32
      %78 = vector.broadcast %cst_41 : f32 to vector<8x256xf32>
      %79 = arith.addf %78, %77 : vector<8x256xf32>
      %80 = arith.divf %78, %79 : vector<8x256xf32>
      %81 = arith.mulf %72, %arg17 : vector<8x256xf32>
      %82 = arith.mulf %66, %74 : vector<8x256xf32>
      %83 = arith.addf %81, %82 : vector<8x256xf32>
      %84 = math.tanh %83 : vector<8x256xf32>
      %85 = arith.mulf %80, %84 : vector<8x256xf32>
      %86 = arith.index_cast %21 : i32 to index
      %c0_42 = arith.constant 0 : index
      %87 = vector.load %arg7[%86, %c0_42] : memref<64x256xf32, #tpu.memory_space<vmem>>, vector<8x256xf32>
      tpu.vector_store %arg7[%86, %c0_42], %85 {strides = array<i32>} : memref<64x256xf32, #tpu.memory_space<vmem>>, vector<8x256xf32>,
      scf.yield %52, %50, %85, %83 : vector<8x256xf32>, vector<8x256xf32>, vector<8x256xf32>, vector<8x256xf32>
    }
    %c8_i32_17 = arith.constant 8 : i32
    %c0_18 = arith.constant 0 : index
    %c0_19 = arith.constant 0 : index
    %16 = vector.load %arg9[%c0_18, %c0_19] : memref<8x256xf32, #tpu.memory_space<vmem>>, vector<8x256xf32>
    tpu.vector_store %arg9[%c0_18, %c0_19], %15#0 {strides = array<i32>} : memref<8x256xf32, #tpu.memory_space<vmem>>, vector<8x256xf32>,
    %c0_20 = arith.constant 0 : index
    %c0_21 = arith.constant 0 : index
    %17 = vector.load %arg10[%c0_20, %c0_21] : memref<8x256xf32, #tpu.memory_space<vmem>>, vector<8x256xf32>
    tpu.vector_store %arg10[%c0_20, %c0_21], %15#1 {strides = array<i32>} : memref<8x256xf32, #tpu.memory_space<vmem>>, vector<8x256xf32>,
    %c0_22 = arith.constant 0 : index
    %c0_23 = arith.constant 0 : index
    %18 = vector.load %arg11[%c0_22, %c0_23] : memref<8x256xf32, #tpu.memory_space<vmem>>, vector<8x256xf32>
    tpu.vector_store %arg11[%c0_22, %c0_23], %15#2 {strides = array<i32>} : memref<8x256xf32, #tpu.memory_space<vmem>>, vector<8x256xf32>,
    %c0_24 = arith.constant 0 : index
    %c0_25 = arith.constant 0 : index
    %19 = vector.load %arg12[%c0_24, %c0_25] : memref<8x256xf32, #tpu.memory_space<vmem>>, vector<8x256xf32>
    tpu.vector_store %arg12[%c0_24, %c0_25], %15#3 {strides = array<i32>} : memref<8x256xf32, #tpu.memory_space<vmem>>, vector<8x256xf32>,
    return
  }
  func.func @transform_0(%arg0: i32) -> (i32, i32) {
    %c0_i32 = arith.constant 0 : i32
    %c0_i32_0 = arith.constant 0 : i32
    return %arg0, %c0_i32 : i32, i32
  }
  func.func @transform_1(%arg0: i32) -> (i32, i32) {
    %c0_i32 = arith.constant 0 : i32
    %c0_i32_0 = arith.constant 0 : i32
    %c0_i32_1 = arith.constant 0 : i32
    return %c0_i32, %c0_i32_0 : i32, i32
  }
  func.func @transform_2(%arg0: i32) -> (i32, i32) {
    %c0_i32 = arith.constant 0 : i32
    %c0_i32_0 = arith.constant 0 : i32
    %c0_i32_1 = arith.constant 0 : i32
    return %c0_i32, %c0_i32_0 : i32, i32
  }
  func.func @transform_3(%arg0: i32) -> (i32, i32) {
    %c0_i32 = arith.constant 0 : i32
    %c0_i32_0 = arith.constant 0 : i32
    %c0_i32_1 = arith.constant 0 : i32
    return %c0_i32, %c0_i32_0 : i32, i32
  }
  func.func @transform_4(%arg0: i32) -> (i32, i32) {
    %c0_i32 = arith.constant 0 : i32
    %c0_i32_0 = arith.constant 0 : i32
    %c0_i32_1 = arith.constant 0 : i32
    return %c0_i32, %c0_i32_0 : i32, i32
  }
  func.func @transform_5(%arg0: i32) -> (i32, i32) {
    %c0_i32 = arith.constant 0 : i32
    %c0_i32_0 = arith.constant 0 : i32
    %c0_i32_1 = arith.constant 0 : i32
    return %c0_i32, %c0_i32_0 : i32, i32
  }
  func.func @transform_6(%arg0: i32) -> (i32, i32) {
    %c0_i32 = arith.constant 0 : i32
    %c0_i32_0 = arith.constant 0 : i32
    return %arg0, %c0_i32 : i32, i32
  }
}

module attributes {stable_mosaic.version = 11 : i64} {
  func.func @_linear_kernel(%arg0: i32, %arg1: memref<16x256xbf16, #tpu.memory_space<vmem>>, %arg2: memref<256x2560xbf16, #tpu.memory_space<vmem>>, %arg3: memref<1x2560xf32, #tpu.memory_space<vmem>>, %arg4: memref<16x2560xf32, #tpu.memory_space<vmem>>) attributes {dimension_semantics = [#tpu.dimension_semantics<parallel>], iteration_bounds = array<i64: 4>, scalar_prefetch = 0 : i64, scratch_operands = 0 : i64, tpu.core_type = #tpu.core_type<tc>, window_params = [{pipeline_mode = #tpu.pipeline_mode<synchronous>, transform_indices = @transform_0, window_bounds = array<i64: 16, 256>}, {transform_indices = @transform_1, window_bounds = array<i64: 256, 2560>}, {transform_indices = @transform_2, window_bounds = array<i64: 1, 2560>}, {transform_indices = @transform_3, window_bounds = array<i64: 16, 2560>}]} {
    %c0 = arith.constant 0 : index
    %c0_0 = arith.constant 0 : index
    %0 = vector.load %arg1[%c0, %c0_0] : memref<16x256xbf16, #tpu.memory_space<vmem>>, vector<16x256xbf16>
    %c0_1 = arith.constant 0 : index
    %c0_2 = arith.constant 0 : index
    %1 = vector.load %arg2[%c0_1, %c0_2] : memref<256x2560xbf16, #tpu.memory_space<vmem>>, vector<256x2560xbf16>
    %cst = arith.constant dense<0.000000e+00> : vector<16x2560xf32>
    %2 = tpu.matmul %0, %1, %cst {dimension_numbers = #tpu.dot_dimension_numbers<[1], [0], [0], [1], [0, 0, 1, 1], [], []>} : vector<16x256xbf16>, vector<256x2560xbf16>, vector<16x2560xf32> -> vector<16x2560xf32>
    %c0_3 = arith.constant 0 : index
    %c0_4 = arith.constant 0 : index
    %3 = vector.load %arg3[%c0_3, %c0_4] : memref<1x2560xf32, #tpu.memory_space<vmem>>, vector<1x2560xf32>
    %4 = vector.broadcast %3 : vector<1x2560xf32> to vector<16x2560xf32>
    %5 = arith.addf %2, %4 : vector<16x2560xf32>
    %c0_5 = arith.constant 0 : index
    %c0_6 = arith.constant 0 : index
    %6 = vector.load %arg4[%c0_5, %c0_6] : memref<16x2560xf32, #tpu.memory_space<vmem>>, vector<16x2560xf32>
    tpu.vector_store %arg4[%c0_5, %c0_6], %5 {strides = array<i32>} : memref<16x2560xf32, #tpu.memory_space<vmem>>, vector<16x2560xf32>,
    return
  }
  func.func @transform_0(%arg0: i32) -> (i32, i32) {
    %c0_i32 = arith.constant 0 : i32
    %c0_i32_0 = arith.constant 0 : i32
    %c0_i32_1 = arith.constant 0 : i32
    return %c0_i32, %c0_i32_0 : i32, i32
  }
  func.func @transform_1(%arg0: i32) -> (i32, i32) {
    %c0_i32 = arith.constant 0 : i32
    %c0_i32_0 = arith.constant 0 : i32
    return %c0_i32, %arg0 : i32, i32
  }
  func.func @transform_2(%arg0: i32) -> (i32, i32) {
    %c0_i32 = arith.constant 0 : i32
    %c0_i32_0 = arith.constant 0 : i32
    return %c0_i32, %arg0 : i32, i32
  }
  func.func @transform_3(%arg0: i32) -> (i32, i32) {
    %c0_i32 = arith.constant 0 : i32
    %c0_i32_0 = arith.constant 0 : i32
    return %c0_i32, %arg0 : i32, i32
  }
}

</mosaic_0001>

<bundles_post_ra>
// kernel: decoder_forward.3
= control target key start
LH: loop header
LB: loop body
LE: loop exit
PB: predicated region body
PF: predicated region fallthrough
CT: control target
= control target key end

     0   :  { %8 = vsyncpa [#allocation3], 0  ;;  %s4572_s0 = inlined_call_operand.vmem [shape: bf16[16,256], index: 0, kind: input, shape index: {}]   ;;  %s4573_s1 = inlined_call_operand.hbm [shape: bf16[256,10240], index: 1, kind: input, shape index: {}]   ;;  %s4574_s2 = inlined_call_operand.hbm [shape: f32[1,10240], index: 2, kind: input, shape index: {}]   ;;  %s4575_s3 = inlined_call_operand.hbm [shape: f32[16,10000], index: 3, kind: output, shape index: {}]  }
   0x1   :  { %10 = vsyncpa [#allocation3 + $0x1], 0 }
   0x2   :  { %11 = vsyncpa [#allocation6], 0 }
   0x3   :  { %13 = vsyncpa [#allocation6 + $0x1], 0 }
   0x4   :  { %14 = vsyncpa [#allocation4], 0 }
   0x5   :  { %16 = vsyncpa [#allocation4 + $0x1], 0  ;;  %s3905_s12 = smov 0   ;;  %s3907_s13 = smov 0  }
   0x6   :  { %s3909_s14 = smov 0   ;;  %s3911_s15 = smov 0  }
   0x7 LB: > { %s3926_s16 = sadd.s32 4294967295, %s3875_s15   ;;  %s2859_s17 = sadd.s32 4294967294, %s3875_s15   ;;  %s3875_s15 = sphi %s3911_s15, %s4590_s15   ;;  %s3871_s14 = sphi %s3909_s14, %s4589_s14   ;;  %s3867_s13 = sphi %s3907_s13, %s4588_s13   ;;  %s3863_s12 = sphi %s3905_s12, %s4587_s12  }
   0x8   : > { %s3930_s18 = sadd.s32 1, %s3875_s15   ;;  %s50_s19 = sadd.s32 1, %s3871_s14 }
   0x9   : > { %s47_s20 = ssub.s32 %s3875_s15, %s3930_s18  ;;  %p57_p0 = scmp.ne.s32.totalorder %s3871_s14, %s3867_s13 }
   0xa   : > { %p48_p1 = scmp.eq.s32.totalorder %s47_s20, 0  ;;  %p58_p2 = scmp.eq.s32.totalorder %s3875_s15, 0 }
   0xb   : > { %p63_p3 = scmp.ne.s32.totalorder %s3867_s13, %s3863_s12  ;;  %p64_p4 = scmp.eq.s32.totalorder %s3926_s16, 0 }
   0xc   : > { %s3942_s21 = scalar_select %p48_p1, %s3871_s14, %s50_s19  }
   0xd   : > { %p59_p5 = por %p58_p2, %p57_p0  ;;  %p3944_p6 = por %p64_p4, %p63_p3 }
   0xe   : > { %p113_p7 = scmp.eq.s32.totalorder %s3926_s16, 3  ;;  %p119_p8 = scmp.eq.s32.totalorder %s2859_s17, 3 }
   0xf   : > { %s4577_s22 = scalar_select %p3944_p6, 1, 0 }
  0x10   : > { %p3221_p9 = scmp.lt.s32.totalorder %s3875_s15, 4  ;;  %p3950_p10 = por %p113_p7, %p57_p0 }
  0x11   : > { %p3954_p11 = por %p119_p8, %p63_p3  ;;  %s3959_s25 = sand.u32 1, %s3871_s14  }
  0x12   : > { %s4578_s23 = scalar_select %p3950_p10, 1, 0 }
  0x13   : > { %s4579_s24 = scalar_select %p3954_p11, 1, 0 }
  0x14   : > { %s3195_s26 = smul.u32 1280, %s3875_s15  ;;  %p3968_p12 = pnand %p3221_p9, %p59_p5 }
  0x15   : > { %s3200_s27 = smul.u32 2560, %s3959_s25  ;;  %s143_s7 = scalar_lea.sflag [#allocation3], %s3959_s25 }
  0x16   : > { %s3966_s30 = scalar_lea.hbm %s4573_s1, %s3195_s26  ;;  %p3747_p1 = pneg %p3968_p12 }
  0x17   : > { %s146_s5 = scalar_lea.vmem [#allocation2], %s3200_s27  ;;  %s3745_s8 = scalar_lea.hbm %s3966_s30, 40960 }
  0x18   : > { %s153_s6 = sshll.u32 %s146_s5, 4  ;;  %p3746_p0 = scmp.ne.s32.totalorder %s3966_s30, %s3745_s8  ;;  %s3972_s6 = int_to_ptr.vmem [resolvable:$true] %s153_s6 }
  0x19   : > { %s3750_s11 = scalar_lea.hbm %s4573_s1, 163840  ;;  %p3751_p4 = scmp.lt.u32.totalorder %s3966_s30, %s4573_s1 }
  0x1a   : > { %p3748_p2 = pnand %p3747_p1, %p3746_p0  ;;  %p3752_p5 = scmp.lt.u32.totalorder %s3750_s11, %s3745_s8 }
  0x1b   : > { %p3754_p8 = scmp.lt.u32.totalorder %s3745_s8, %s3966_s30 }
  0x1c   : > { %p3749_p3 = pneg %p3748_p2  ;;  %p3753_p7 = por %p3752_p5, %p3751_p4 }
  0x1e   : > { %p3755_p9 = por %p3754_p8, %p3753_p7 }
  0x20   : > { %p3756_p13 = pnand %p3755_p9, %p3749_p3 }
  0x22   : > { %3759 = shalt.err (!%p3756_p13)
}
  0x23   : > { %s3760_s20 = scalar_lea.vmem %s3972_s6, 40960  ;;  %s3877_s26 = smov [#allocation2]  }
  0x24   : > { %p3761_p0 = scmp.ne.s32.totalorder %s3972_s6, %s3760_s20  ;;  %s3765_s27 = sshll.u32 %s3877_s26, 4  ;;  %s3766_s27 = int_to_ptr.vmem [resolvable:$false] %s3765_s27 }
  0x25   : > { %s3767_s28 = scalar_lea.vmem %s3766_s27, 81920  ;;  %p3768_p10 = scmp.lt.s32.totalorder %s3972_s6, %s3766_s27 }
  0x26   : > { %p3763_p2 = pnand %p3761_p0, %p3747_p1  ;;  %p3769_p4 = scmp.lt.s32.totalorder %s3767_s28, %s3760_s20 }
  0x28   : > { %p3764_p11 = pneg %p3763_p2  ;;  %p3770_p5 = por %p3769_p4, %p3768_p10 }
  0x2a   : > { %p3771_p7 = pnand %p3770_p5, %p3764_p11 }
  0x2c   : > { %3774 = shalt.err (!%p3771_p7)
}
  0x2d   : > { %s3878_s29 = smov 5120   ;;  %s3879_s5 = smov 1280  }
  0x2e   : > { %s3880_s8 = smov 80   ;;  %p180_p13 = scmp.lt.s32.totalorder %s3875_s15, 5 }
  0x2f   : > { %3213 = dma.hbm_to_vmem [thread:$0]  (!%p3968_p12), %s3966_s30, 40960, %s3972_s6, %s143_s7, %s3878_s29, %s3879_s5, %s3880_s8  }
  0x30   : > { %s3201_s9 = smul.u32 20, %s3959_s25  ;;  %p4581_p10 = scmp.ge.s32.totalorder %s3875_s15, 1 }
  0x31   : > { %s3196_s11 = smul.u32 320, %s3875_s15  ;;  %s164_s30 = scalar_lea.sflag [#allocation6], %s3959_s25 }
  0x32   : > { %p4007_p11 = pnand %p4581_p10, %p180_p13  ;;  %s167_s26 = scalar_lea.vmem [#allocation5], %s3201_s9 }
  0x33   : > { %s4015_s20 = scalar_lea.hbm %s4574_s2, %s3196_s11  ;;  %s175_s27 = sshll.u32 %s167_s26, 4  ;;  %s176_s27 = int_to_ptr.vmem [resolvable:$true] %s175_s27 }
  0x34   : > { %s4582_s10 = scalar_select %p4007_p11, 1, 0 }
  0x35   : > { %s3775_s6 = scalar_lea.hbm %s4015_s20, 320  ;;  %s3780_s29 = scalar_lea.hbm %s4574_s2, 1280 }
  0x36   : > { %p3776_p3 = scmp.ne.s32.totalorder %s4015_s20, %s3775_s6  ;;  %p3781_p0 = scmp.lt.u32.totalorder %s4015_s20, %s4574_s2 }
  0x37   : > { %p3782_p2 = scmp.lt.u32.totalorder %s3780_s29, %s3775_s6  ;;  %p3784_p5 = scmp.lt.u32.totalorder %s3775_s6, %s4015_s20 }
  0x38   : > { %p3778_p8 = pnand %p3776_p3, %p3747_p1 }
  0x39   : > { %p3783_p4 = por %p3782_p2, %p3781_p0 }
  0x3a   : > { %p3779_p9 = pneg %p3778_p8 }
  0x3b   : > { %p3785_p7 = por %p3784_p5, %p3783_p4 }
  0x3d   : > { %p3786_p13 = pnand %p3785_p7, %p3779_p9 }
  0x3f   : > { %3789 = shalt.err (!%p3786_p13)
}
  0x40   : > { %s3790_s25 = scalar_lea.vmem %s176_s27, 320  ;;  %s3881_s9 = smov [#allocation5]  }
  0x41   : > { %p3791_p10 = scmp.ne.s32.totalorder %s176_s27, %s3790_s25  ;;  %s3795_s11 = sshll.u32 %s3881_s9, 4  ;;  %s3796_s11 = int_to_ptr.vmem [resolvable:$false] %s3795_s11 }
  0x42   : > { %s3797_s17 = scalar_lea.vmem %s3796_s11, 640  ;;  %p3798_p6 = scmp.lt.s32.totalorder %s176_s27, %s3796_s11 }
  0x43   : > { %p3793_p3 = pnand %p3791_p10, %p3747_p1  ;;  %p3799_p11 = scmp.lt.s32.totalorder %s3797_s17, %s3790_s25 }
  0x45   : > { %p3794_p8 = pneg %p3793_p3  ;;  %p3800_p0 = por %p3799_p11, %p3798_p6 }
  0x47   : > { %p3801_p2 = pnand %p3800_p0, %p3794_p8 }
  0x49   : > { %3804 = shalt.err (!%p3801_p2)
}
  0x4a   : > { %3216 = dma.hbm_to_vmem [thread:$0]  (!%p3968_p12), %s4015_s20, 320, %s176_s27, %s164_s30  }
  0x4b   : > { %p4583_p9 = scmp.ne.s32.totalorder %s4582_s10, 0 }
  0x4c   : > { %s4040_s19 = sand.u32 (!%p4583_p9), 1, %s3867_s13   ;;  %p4584_p6 = scmp.ne.s32.totalorder (!%p4583_p9), %s4577_s22, 0 }
  0x4d   : > { %184 = sbr.rel (%p4583_p9) target bundleno = 657 (0x291), region = 32  ;;  %s187_s6 = scalar_lea.sflag (!%p4583_p9), [#allocation3], %s4040_s19 }
  0x4e   : > { %s3202_s26 = smul.u32 (!%p4583_p9), 2560, %s4040_s19 }
  0x50   : > { %s4044_s7 = scalar_lea.vmem (!%p4583_p9), [#allocation2], %s3202_s26 }
  0x54   : > { %3850 = dma.done.wait (%p4584_p6), %s187_s6, 40960  }
  0x55   : > { %3852 = vsyncadd (%p4584_p6), %s187_s6, 4294926336  ;;  %s3203_s4 = smul.u32 20, %s4040_s19  ;;  %s196_s10 = scalar_lea.sflag [#allocation6], %s4040_s19 }
  0x57   : > { %s4052_s20 = scalar_lea.vmem [#allocation5], %s3203_s4 }
  0x58   : > { %3854 = dma.done.wait (%p4584_p6), %s196_s10, 320  }
  0x59   : > { %3856 = vsyncadd (%p4584_p6), %s196_s10, 4294966976  ;;  %v3260_v0 = vld [vmem:[%s4044_s7 + $0x4] ss:$80 sps:$4 sm:$0xff]   ;;  %v3262_v1 = vld [vmem:[%s4044_s7 + $0xc] ss:$80 sps:$4 sm:$0xff]   ;;  %s3204_s9 = smul.u32 320, %s4040_s19 }
  0x5a   : > { %2272 = vmatprep.subr.bf16.mxu0 %v3260_v0  ;;  %v3264_v2 = vld [vmem:[%s4044_s7] ss:$80 sps:$4 sm:$0xff]   ;;  %v3265_v3 = vld [vmem:[%s4044_s7 + $0x8] ss:$80 sps:$4 sm:$0xff]   ;;  %2315 = vmatprep.subr.bf16.mxu1 %v3262_v1  ;;  %v3266_v4 = vld [vmem:[%s4044_s7 + $0xa4] ss:$80 sps:$4 sm:$0xff]  }
  0x5b   : > { %2273 = vmatpush1.bf16.msra.mxu0 %v3264_v2  ;;  %2316 = vmatpush1.bf16.msra.mxu1 %v3265_v3  ;;  %v3268_v5 = vld [vmem:[%s4044_s7 + $0xac] ss:$80 sps:$4 sm:$0xff]   ;;  %v3270_v6 = vld [vmem:[%s4044_s7 + $0xa0] ss:$80 sps:$4 sm:$0xff]   ;;  %v3271_v7 = vld [vmem:[%s4044_s7 + $0xa8] ss:$80 sps:$4 sm:$0xff]  }
  0x5c   : > { %2274 = vmatprep.subr.bf16.mxu0 %v3266_v4  ;;  %2317 = vmatprep.subr.bf16.mxu1 %v3268_v5  ;;  %v3272_v8 = vld [vmem:[%s4044_s7 + $0x144] ss:$80 sps:$4 sm:$0xff]   ;;  %v3274_v9 = vld [vmem:[%s4044_s7 + $0x14c] ss:$80 sps:$4 sm:$0xff]   ;;  %v3276_v10 = vld [vmem:[%s4044_s7 + $0x140] ss:$80 sps:$4 sm:$0xff]  }
  0x5d   : > { %v3277_v11 = vld [vmem:[%s4044_s7 + $0x148] ss:$80 sps:$4 sm:$0xff]   ;;  %v3278_v12 = vld [vmem:[%s4044_s7 + $0x1e4] ss:$80 sps:$4 sm:$0xff]   ;;  %v3280_v13 = vld [vmem:[%s4044_s7 + $0x1ec] ss:$80 sps:$4 sm:$0xff]  }
  0x5e   : > { %v3282_v14 = vld [vmem:[%s4044_s7 + $0x1e0] ss:$80 sps:$4 sm:$0xff]   ;;  %v3283_v15 = vld [vmem:[%s4044_s7 + $0x1e8] ss:$80 sps:$4 sm:$0xff]   ;;  %v3284_v16 = vld [vmem:[%s4044_s7 + $0x284] ss:$80 sps:$4 sm:$0xff]  }
  0x5f   : > { %2275 = vmatpush1.bf16.msra.mxu0 %v3270_v6  ;;  %2318 = vmatpush1.bf16.msra.mxu1 %v3271_v7  ;;  %v3286_v17 = vld [vmem:[%s4044_s7 + $0x28c] ss:$80 sps:$4 sm:$0xff]   ;;  %v3288_v18 = vld [vmem:[%s4044_s7 + $0x280] ss:$80 sps:$4 sm:$0xff]   ;;  %v3289_v19 = vld [vmem:[%s4044_s7 + $0x288] ss:$80 sps:$4 sm:$0xff]  }
  0x60   : > { %2276 = vmatprep.subr.bf16.mxu0 %v3272_v8  ;;  %2319 = vmatprep.subr.bf16.mxu1 %v3274_v9  ;;  %v3290_v20 = vld [vmem:[%s4044_s7 + $0x324] ss:$80 sps:$4 sm:$0xff]   ;;  %v3292_v21 = vld [vmem:[%s4044_s7 + $0x32c] ss:$80 sps:$4 sm:$0xff]   ;;  %v3294_v22 = vld [vmem:[%s4044_s7 + $0x320] ss:$80 sps:$4 sm:$0xff]  }
  0x61   : > { %v3295_v23 = vld [vmem:[%s4044_s7 + $0x328] ss:$80 sps:$4 sm:$0xff]   ;;  %v3296_v24 = vld [vmem:[%s4044_s7 + $0x3c4] ss:$80 sps:$4 sm:$0xff]   ;;  %v3298_v25 = vld [vmem:[%s4044_s7 + $0x3cc] ss:$80 sps:$4 sm:$0xff]  }
  0x62   : > { %v3300_v26 = vld [vmem:[%s4044_s7 + $0x3c0] ss:$80 sps:$4 sm:$0xff]   ;;  %v3301_v27 = vld [vmem:[%s4044_s7 + $0x3c8] ss:$80 sps:$4 sm:$0xff]   ;;  %v3302_v28 = vld [vmem:[%s4044_s7 + $0x464] ss:$80 sps:$4 sm:$0xff]  }
  0x63   : > { %2277 = vmatpush1.bf16.msra.mxu0 %v3276_v10  ;;  %2320 = vmatpush1.bf16.msra.mxu1 %v3277_v11  ;;  %v3304_v29 = vld [vmem:[%s4044_s7 + $0x46c] ss:$80 sps:$4 sm:$0xff]   ;;  %v3306_v30 = vld [vmem:[%s4044_s7 + $0x460] ss:$80 sps:$4 sm:$0xff]   ;;  %v3307_v31 = vld [vmem:[%s4044_s7 + $0x468] ss:$80 sps:$4 sm:$0xff]  }
  0x64   : > { %2278 = vmatprep.subr.bf16.mxu0 %v3278_v12  ;;  %2321 = vmatprep.subr.bf16.mxu1 %v3280_v13  ;;  %v3308_v32 = vld [vmem:[%s4044_s7 + $0x504] ss:$80 sps:$4 sm:$0xff]   ;;  %v3310_v33 = vld [vmem:[%s4044_s7 + $0x50c] ss:$80 sps:$4 sm:$0xff]   ;;  %v3312_v34 = vld [vmem:[%s4044_s7 + $0x500] ss:$80 sps:$4 sm:$0xff]  }
  0x65   : > { %v3313_v35 = vld [vmem:[%s4044_s7 + $0x508] ss:$80 sps:$4 sm:$0xff]   ;;  %v3314_v36 = vld [vmem:[%s4044_s7 + $0x5a4] ss:$80 sps:$4 sm:$0xff]   ;;  %v3316_v37 = vld [vmem:[%s4044_s7 + $0x5ac] ss:$80 sps:$4 sm:$0xff]  }
  0x66   : > { %v3318_v38 = vld [vmem:[%s4044_s7 + $0x5a0] ss:$80 sps:$4 sm:$0xff]   ;;  %v3319_v39 = vld [vmem:[%s4044_s7 + $0x5a8] ss:$80 sps:$4 sm:$0xff]   ;;  %v3320_v40 = vld [vmem:[%s4044_s7 + $0x644] ss:$80 sps:$4 sm:$0xff]  }
  0x67   : > { %2279 = vmatpush1.bf16.msra.mxu0 %v3282_v14  ;;  %2322 = vmatpush1.bf16.msra.mxu1 %v3283_v15  ;;  %v3322_v41 = vld [vmem:[%s4044_s7 + $0x64c] ss:$80 sps:$4 sm:$0xff]   ;;  %v3324_v42 = vld [vmem:[%s4044_s7 + $0x640] ss:$80 sps:$4 sm:$0xff]   ;;  %v3325_v43 = vld [vmem:[%s4044_s7 + $0x648] ss:$80 sps:$4 sm:$0xff]  }
  0x68   : > { %2280 = vmatprep.subr.bf16.mxu0 %v3284_v16  ;;  %2323 = vmatprep.subr.bf16.mxu1 %v3286_v17  ;;  %v3326_v44 = vld [vmem:[%s4044_s7 + $0x6e4] ss:$80 sps:$4 sm:$0xff]   ;;  %v3328_v45 = vld [vmem:[%s4044_s7 + $0x6ec] ss:$80 sps:$4 sm:$0xff]   ;;  %v3330_v46 = vld [vmem:[%s4044_s7 + $0x6e0] ss:$80 sps:$4 sm:$0xff]  }
  0x69   : > { %v3331_v47 = vld [vmem:[%s4044_s7 + $0x6e8] ss:$80 sps:$4 sm:$0xff]   ;;  %v4109_v48 = vld [vmem:[%s4572_s0 + $0x4] ss:$8 sps:$4 sm:$0xff]   ;;  %v3336_v51 = vld [vmem:[%s4044_s7 + $0x780] ss:$80 sps:$4 sm:$0xff]  }
  0x6a   : > { %v3332_v49 = vld [vmem:[%s4044_s7 + $0x784] ss:$80 sps:$4 sm:$0xff]   ;;  %v3334_v50 = vld [vmem:[%s4044_s7 + $0x78c] ss:$80 sps:$4 sm:$0xff]   ;;  %2304 = vmatprep.mubr.bf16.mxu0 %v4109_v48  ;;  %2347 = vmatprep.mubr.bf16.mxu1 %v4109_v48  ;;  %v3337_v52 = vld [vmem:[%s4044_s7 + $0x788] ss:$80 sps:$4 sm:$0xff]  }
  0x6b   : > { %2281 = vmatpush1.bf16.msra.mxu0 %v3288_v18  ;;  %2324 = vmatpush1.bf16.msra.mxu1 %v3289_v19  ;;  %v3338_v53 = vld [vmem:[%s4044_s7 + $0x824] ss:$80 sps:$4 sm:$0xff]   ;;  %v3340_v54 = vld [vmem:[%s4044_s7 + $0x82c] ss:$80 sps:$4 sm:$0xff]   ;;  %v3342_v55 = vld [vmem:[%s4044_s7 + $0x820] ss:$80 sps:$4 sm:$0xff]  }
  0x6c   : > { %2282 = vmatprep.subr.bf16.mxu0 %v3290_v20  ;;  %2325 = vmatprep.subr.bf16.mxu1 %v3292_v21  ;;  %v3343_v56 = vld [vmem:[%s4044_s7 + $0x828] ss:$80 sps:$4 sm:$0xff]   ;;  %v3344_v57 = vld [vmem:[%s4044_s7 + $0x8c4] ss:$80 sps:$4 sm:$0xff]   ;;  %v3346_v58 = vld [vmem:[%s4044_s7 + $0x8cc] ss:$80 sps:$4 sm:$0xff]  }
  0x6d   : > { %v3348_v59 = vld [vmem:[%s4044_s7 + $0x8c0] ss:$80 sps:$4 sm:$0xff]   ;;  %v3349_v60 = vld [vmem:[%s4044_s7 + $0x8c8] ss:$80 sps:$4 sm:$0xff]   ;;  %v3350_v61 = vld [vmem:[%s4044_s7 + $0x964] ss:$80 sps:$4 sm:$0xff]  }
  0x6e   : > { %v3352_v62 = vld [vmem:[%s4044_s7 + $0x96c] ss:$80 sps:$4 sm:$0xff]   ;;  %v3354_v63 = vld [vmem:[%s4044_s7 + $0x960] ss:$80 sps:$4 sm:$0xff]   ;;  %v3355_v0 = vld [vmem:[%s4044_s7 + $0x968] ss:$80 sps:$4 sm:$0xff]  }
  0x6f   : > { %2283 = vmatpush1.bf16.msra.mxu0 %v3294_v22  ;;  %2326 = vmatpush1.bf16.msra.mxu1 %v3295_v23  ;;  %v3361_v1 = vld [vmem:[%s4044_s7 + $0x14] ss:$80 sps:$4 sm:$0xff]   ;;  %v3364_v2 = vld [vmem:[%s4044_s7 + $0x1c] ss:$80 sps:$4 sm:$0xff]   ;;  %v4134_v3 = vld [vmem:[%s4572_s0] ss:$8 sps:$4 sm:$0xff]  }
  0x70   : > { %2284 = vmatprep.subr.bf16.mxu0 %v3296_v24  ;;  %2327 = vmatprep.subr.bf16.mxu1 %v3298_v25  ;;  %v3359_v4 = vld [vmem:[%s4044_s7 + $0x10] ss:$80 sps:$4 sm:$0xff]   ;;  %v3362_v5 = vld [vmem:[%s4044_s7 + $0x18] ss:$80 sps:$4 sm:$0xff]   ;;  %v3367_v6 = vld [vmem:[%s4044_s7 + $0xb4] ss:$80 sps:$4 sm:$0xff]  }
  0x71   : > { %v3370_v7 = vld [vmem:[%s4044_s7 + $0xbc] ss:$80 sps:$4 sm:$0xff]   ;;  %v3365_v8 = vld [vmem:[%s4044_s7 + $0xb0] ss:$80 sps:$4 sm:$0xff]   ;;  %v3368_v9 = vld [vmem:[%s4044_s7 + $0xb8] ss:$80 sps:$4 sm:$0xff]  }
  0x72   : > { %v3373_v10 = vld [vmem:[%s4044_s7 + $0x154] ss:$80 sps:$4 sm:$0xff]   ;;  %v3376_v11 = vld [vmem:[%s4044_s7 + $0x15c] ss:$80 sps:$4 sm:$0xff]   ;;  %v3371_v12 = vld [vmem:[%s4044_s7 + $0x150] ss:$80 sps:$4 sm:$0xff]  }
  0x73   : > { %2285 = vmatpush1.bf16.msra.mxu0 %v3300_v26  ;;  %2328 = vmatpush1.bf16.msra.mxu1 %v3301_v27  ;;  %v3374_v13 = vld [vmem:[%s4044_s7 + $0x158] ss:$80 sps:$4 sm:$0xff]   ;;  %v3379_v14 = vld [vmem:[%s4044_s7 + $0x1f4] ss:$80 sps:$4 sm:$0xff]   ;;  %v3382_v15 = vld [vmem:[%s4044_s7 + $0x1fc] ss:$80 sps:$4 sm:$0xff]  }
  0x74   : > { %2286 = vmatprep.subr.bf16.mxu0 %v3302_v28  ;;  %2329 = vmatprep.subr.bf16.mxu1 %v3304_v29  ;;  %v3377_v16 = vld [vmem:[%s4044_s7 + $0x1f0] ss:$80 sps:$4 sm:$0xff]   ;;  %v3380_v17 = vld [vmem:[%s4044_s7 + $0x1f8] ss:$80 sps:$4 sm:$0xff]   ;;  %v3385_v18 = vld [vmem:[%s4044_s7 + $0x294] ss:$80 sps:$4 sm:$0xff]  }
  0x75   : > { %v3388_v19 = vld [vmem:[%s4044_s7 + $0x29c] ss:$80 sps:$4 sm:$0xff]   ;;  %v3383_v20 = vld [vmem:[%s4044_s7 + $0x290] ss:$80 sps:$4 sm:$0xff]   ;;  %v3386_v21 = vld [vmem:[%s4044_s7 + $0x298] ss:$80 sps:$4 sm:$0xff]  }
  0x76   : > { %v3391_v22 = vld [vmem:[%s4044_s7 + $0x334] ss:$80 sps:$4 sm:$0xff]   ;;  %v3394_v23 = vld [vmem:[%s4044_s7 + $0x33c] ss:$80 sps:$4 sm:$0xff]   ;;  %v3389_v24 = vld [vmem:[%s4044_s7 + $0x330] ss:$80 sps:$4 sm:$0xff]  }
  0x77   : > { %2287 = vmatpush1.bf16.msra.mxu0 %v3306_v30  ;;  %2330 = vmatpush1.bf16.msra.mxu1 %v3307_v31  ;;  %v3392_v25 = vld [vmem:[%s4044_s7 + $0x338] ss:$80 sps:$4 sm:$0xff]   ;;  %v3397_v26 = vld [vmem:[%s4044_s7 + $0x3d4] ss:$80 sps:$4 sm:$0xff]   ;;  %v3400_v27 = vld [vmem:[%s4044_s7 + $0x3dc] ss:$80 sps:$4 sm:$0xff]  }
  0x78   : > { %2288 = vmatprep.subr.bf16.mxu0 %v3308_v32  ;;  %2331 = vmatprep.subr.bf16.mxu1 %v3310_v33  ;;  %v3395_v28 = vld [vmem:[%s4044_s7 + $0x3d0] ss:$80 sps:$4 sm:$0xff]   ;;  %v3398_v29 = vld [vmem:[%s4044_s7 + $0x3d8] ss:$80 sps:$4 sm:$0xff]   ;;  %v3403_v30 = vld [vmem:[%s4044_s7 + $0x474] ss:$80 sps:$4 sm:$0xff]  }
  0x79   : > { %v3406_v31 = vld [vmem:[%s4044_s7 + $0x47c] ss:$80 sps:$4 sm:$0xff]   ;;  %v3401_v32 = vld [vmem:[%s4044_s7 + $0x470] ss:$80 sps:$4 sm:$0xff]   ;;  %v3404_v33 = vld [vmem:[%s4044_s7 + $0x478] ss:$80 sps:$4 sm:$0xff]  }
  0x7a   : > { %s4406_s11 = scalar_lea.vmem [#allocation7], %s3204_s9  ;;  %s2743_s17 = scalar_lea.sflag [#allocation4], %s4040_s19 }
  0x7b   : > { %2289 = vmatpush1.bf16.msra.mxu0 %v3312_v34  ;;  %2332 = vmatpush1.bf16.msra.mxu1 %v3313_v35  ;;  %v3409_v34 = vld [vmem:[%s4044_s7 + $0x514] ss:$80 sps:$4 sm:$0xff]   ;;  %v3412_v35 = vld [vmem:[%s4044_s7 + $0x51c] ss:$80 sps:$4 sm:$0xff]   ;;  %p4585_p12 = scmp.ne.s32.totalorder %s4578_s23, 0 }
  0x7c   : > { %2290 = vmatprep.subr.bf16.mxu0 %v3314_v36  ;;  %2333 = vmatprep.subr.bf16.mxu1 %v3316_v37  ;;  %v3407_v36 = vld [vmem:[%s4044_s7 + $0x510] ss:$80 sps:$4 sm:$0xff]   ;;  %v3410_v37 = vld [vmem:[%s4044_s7 + $0x518] ss:$80 sps:$4 sm:$0xff]   ;;  %s2750_s26 = smul.u32 (%p4585_p12), 20, %s3926_s16 }
  0x7e   : > { %s2751_s6 = ssub.s32 (%p4585_p12), 79, %s2750_s26 }
  0x7f   : > { %2291 = vmatpush1.bf16.msra.mxu0 %v3318_v38  ;;  %2334 = vmatpush1.bf16.msra.mxu1 %v3319_v39  ;;  %v3415_v38 = vld [vmem:[%s4044_s7 + $0x5b4] ss:$80 sps:$4 sm:$0xff]   ;;  %v3418_v39 = vld [vmem:[%s4044_s7 + $0x5bc] ss:$80 sps:$4 sm:$0xff]   ;;  %p2752_p1 = scmp.lt.s32.totalorder (%p4585_p12), %s2751_s6, 20 }
  0x80   : > { %2292 = vmatprep.subr.bf16.mxu0 %v3320_v40  ;;  %2335 = vmatprep.subr.bf16.mxu1 %v3322_v41  ;;  %v3413_v40 = vld [vmem:[%s4044_s7 + $0x5b0] ss:$80 sps:$4 sm:$0xff]   ;;  %v3416_v41 = vld [vmem:[%s4044_s7 + $0x5b8] ss:$80 sps:$4 sm:$0xff]  }
  0x83   : > { %2293 = vmatpush1.bf16.msra.mxu0 %v3324_v42  ;;  %2336 = vmatpush1.bf16.msra.mxu1 %v3325_v43  ;;  %v3421_v42 = vld [vmem:[%s4044_s7 + $0x654] ss:$80 sps:$4 sm:$0xff]   ;;  %v3424_v43 = vld [vmem:[%s4044_s7 + $0x65c] ss:$80 sps:$4 sm:$0xff]  }
  0x84   : > { %2294 = vmatprep.subr.bf16.mxu0 %v3326_v44  ;;  %2337 = vmatprep.subr.bf16.mxu1 %v3328_v45  ;;  %v3419_v44 = vld [vmem:[%s4044_s7 + $0x650] ss:$80 sps:$4 sm:$0xff]   ;;  %v3422_v45 = vld [vmem:[%s4044_s7 + $0x658] ss:$80 sps:$4 sm:$0xff]  }
  0x87   : > { %2295 = vmatpush1.bf16.msra.mxu0 %v3330_v46  ;;  %2338 = vmatpush1.bf16.msra.mxu1 %v3331_v47  ;;  %v3427_v46 = vld [vmem:[%s4044_s7 + $0x6f4] ss:$80 sps:$4 sm:$0xff]   ;;  %v3430_v47 = vld [vmem:[%s4044_s7 + $0x6fc] ss:$80 sps:$4 sm:$0xff]  }
  0x88   : > { %2296 = vmatprep.subr.bf16.mxu0 %v3332_v49  ;;  %2339 = vmatprep.subr.bf16.mxu1 %v3334_v50  ;;  %v3425_v49 = vld [vmem:[%s4044_s7 + $0x6f0] ss:$80 sps:$4 sm:$0xff]   ;;  %v3428_v50 = vld [vmem:[%s4044_s7 + $0x6f8] ss:$80 sps:$4 sm:$0xff]  }
  0x8b   : > { %2297 = vmatpush1.bf16.msra.mxu0 %v3336_v51  ;;  %2340 = vmatpush1.bf16.msra.mxu1 %v3337_v52  ;;  %v3433_v51 = vld [vmem:[%s4044_s7 + $0x794] ss:$80 sps:$4 sm:$0xff]   ;;  %v3436_v52 = vld [vmem:[%s4044_s7 + $0x79c] ss:$80 sps:$4 sm:$0xff]  }
  0x8c   : > { %2298 = vmatprep.subr.bf16.mxu0 %v3338_v53  ;;  %2341 = vmatprep.subr.bf16.mxu1 %v3340_v54  ;;  %v3431_v53 = vld [vmem:[%s4044_s7 + $0x790] ss:$80 sps:$4 sm:$0xff]   ;;  %v3434_v54 = vld [vmem:[%s4044_s7 + $0x798] ss:$80 sps:$4 sm:$0xff]  }
  0x8f   : > { %2299 = vmatpush1.bf16.msra.mxu0 %v3342_v55  ;;  %2342 = vmatpush1.bf16.msra.mxu1 %v3343_v56  ;;  %v3439_v55 = vld [vmem:[%s4044_s7 + $0x834] ss:$80 sps:$4 sm:$0xff]   ;;  %v3442_v56 = vld [vmem:[%s4044_s7 + $0x83c] ss:$80 sps:$4 sm:$0xff]  }
  0x90   : > { %2300 = vmatprep.subr.bf16.mxu0 %v3344_v57  ;;  %2343 = vmatprep.subr.bf16.mxu1 %v3346_v58  ;;  %v3437_v57 = vld [vmem:[%s4044_s7 + $0x830] ss:$80 sps:$4 sm:$0xff]   ;;  %v3440_v58 = vld [vmem:[%s4044_s7 + $0x838] ss:$80 sps:$4 sm:$0xff]  }
  0x93   : > { %2301 = vmatpush1.bf16.msra.mxu0 %v3348_v59  ;;  %2344 = vmatpush1.bf16.msra.mxu1 %v3349_v60  ;;  %v3445_v59 = vld [vmem:[%s4044_s7 + $0x8d4] ss:$80 sps:$4 sm:$0xff]   ;;  %v3448_v60 = vld [vmem:[%s4044_s7 + $0x8dc] ss:$80 sps:$4 sm:$0xff]  }
  0x94   : > { %2302 = vmatprep.subr.bf16.mxu0 %v3350_v61  ;;  %2345 = vmatprep.subr.bf16.mxu1 %v3352_v62  ;;  %v3443_v61 = vld [vmem:[%s4044_s7 + $0x8d0] ss:$80 sps:$4 sm:$0xff]   ;;  %v3446_v62 = vld [vmem:[%s4044_s7 + $0x8d8] ss:$80 sps:$4 sm:$0xff]  }
  0x97   : > { %2303 = vmatpush1.bf16.msra.mxu0 %v3354_v63  ;;  %2346 = vmatpush1.bf16.msra.mxu1 %v3355_v0  ;;  %v3451_v63 = vld [vmem:[%s4044_s7 + $0x974] ss:$80 sps:$4 sm:$0xff]   ;;  %v3454_v0 = vld [vmem:[%s4044_s7 + $0x97c] ss:$80 sps:$4 sm:$0xff]  }
  0x98   : > { %2358 = vmatprep.subr.bf16.mxu0 %v3361_v1  ;;  %2401 = vmatprep.subr.bf16.mxu1 %v3364_v2  ;;  %v3449_v1 = vld [vmem:[%s4044_s7 + $0x970] ss:$80 sps:$4 sm:$0xff]   ;;  %v3452_v2 = vld [vmem:[%s4044_s7 + $0x978] ss:$80 sps:$4 sm:$0xff]  }
  0x9a   : > { %2305 = vmatmul.mubr.bf16.vlgmr.msra.gmra.mrb[0].mxu0 %v4134_v3  ;;  %2348 = vmatmul.mubr.bf16.vlgmr.msra.gmra.mrb[0].mxu1 %v4134_v3 }
  0x9b   : > { %2359 = vmatpush1.bf16.msra.mxu0 %v3359_v4  ;;  %2402 = vmatpush1.bf16.msra.mxu1 %v3362_v5  ;;  %v3457_v4 = vld [vmem:[%s4044_s7 + $0x24] ss:$80 sps:$4 sm:$0xff]   ;;  %v3460_v5 = vld [vmem:[%s4044_s7 + $0x2c] ss:$80 sps:$4 sm:$0xff]  }
  0x9c   : > { %2360 = vmatprep.subr.bf16.mxu0 %v3367_v6  ;;  %2403 = vmatprep.subr.bf16.mxu1 %v3370_v7  ;;  %v3455_v6 = vld [vmem:[%s4044_s7 + $0x20] ss:$80 sps:$4 sm:$0xff]   ;;  %v3458_v7 = vld [vmem:[%s4044_s7 + $0x28] ss:$80 sps:$4 sm:$0xff]  }
  0x9d   : > { %2390 = vmatprep.mubr.bf16.mxu0 %v4109_v48  ;;  %2433 = vmatprep.mubr.bf16.mxu1 %v4109_v48 }
  0x9f   : > { %2361 = vmatpush1.bf16.msra.mxu0 %v3365_v8  ;;  %2404 = vmatpush1.bf16.msra.mxu1 %v3368_v9  ;;  %v3463_v8 = vld [vmem:[%s4044_s7 + $0xc4] ss:$80 sps:$4 sm:$0xff]   ;;  %v3466_v9 = vld [vmem:[%s4044_s7 + $0xcc] ss:$80 sps:$4 sm:$0xff]  }
  0xa0   : > { %2362 = vmatprep.subr.bf16.mxu0 %v3373_v10  ;;  %2405 = vmatprep.subr.bf16.mxu1 %v3376_v11  ;;  %v3461_v10 = vld [vmem:[%s4044_s7 + $0xc0] ss:$80 sps:$4 sm:$0xff]   ;;  %v3464_v11 = vld [vmem:[%s4044_s7 + $0xc8] ss:$80 sps:$4 sm:$0xff]  }
  0xa3   : > { %2363 = vmatpush1.bf16.msra.mxu0 %v3371_v12  ;;  %2406 = vmatpush1.bf16.msra.mxu1 %v3374_v13  ;;  %v3469_v12 = vld [vmem:[%s4044_s7 + $0x164] ss:$80 sps:$4 sm:$0xff]   ;;  %v3472_v13 = vld [vmem:[%s4044_s7 + $0x16c] ss:$80 sps:$4 sm:$0xff]  }
  0xa4   : > { %2364 = vmatprep.subr.bf16.mxu0 %v3379_v14  ;;  %2407 = vmatprep.subr.bf16.mxu1 %v3382_v15  ;;  %v3467_v14 = vld [vmem:[%s4044_s7 + $0x160] ss:$80 sps:$4 sm:$0xff]   ;;  %v3470_v15 = vld [vmem:[%s4044_s7 + $0x168] ss:$80 sps:$4 sm:$0xff]  }
  0xa7   : > { %2365 = vmatpush1.bf16.msra.mxu0 %v3377_v16  ;;  %2408 = vmatpush1.bf16.msra.mxu1 %v3380_v17  ;;  %v3475_v16 = vld [vmem:[%s4044_s7 + $0x204] ss:$80 sps:$4 sm:$0xff]   ;;  %v3478_v17 = vld [vmem:[%s4044_s7 + $0x20c] ss:$80 sps:$4 sm:$0xff]  }
  0xa8   : > { %2366 = vmatprep.subr.bf16.mxu0 %v3385_v18  ;;  %2409 = vmatprep.subr.bf16.mxu1 %v3388_v19  ;;  %v3473_v18 = vld [vmem:[%s4044_s7 + $0x200] ss:$80 sps:$4 sm:$0xff]   ;;  %v3476_v19 = vld [vmem:[%s4044_s7 + $0x208] ss:$80 sps:$4 sm:$0xff]  }
  0xab   : > { %2367 = vmatpush1.bf16.msra.mxu0 %v3383_v20  ;;  %2410 = vmatpush1.bf16.msra.mxu1 %v3386_v21  ;;  %v3484_v20 = vld [vmem:[%s4044_s7 + $0x2ac] ss:$80 sps:$4 sm:$0xff]   ;;  %v3479_v21 = vld [vmem:[%s4044_s7 + $0x2a0] ss:$80 sps:$4 sm:$0xff]  }
  0xac   : > { %2368 = vmatprep.subr.bf16.mxu0 %v3391_v22  ;;  %2411 = vmatprep.subr.bf16.mxu1 %v3394_v23  ;;  %v3482_v22 = vld [vmem:[%s4044_s7 + $0x2a8] ss:$80 sps:$4 sm:$0xff]   ;;  %v3487_v23 = vld [vmem:[%s4044_s7 + $0x344] ss:$80 sps:$4 sm:$0xff]  }
  0xaf   : > { %2369 = vmatpush1.bf16.msra.mxu0 %v3389_v24  ;;  %2412 = vmatpush1.bf16.msra.mxu1 %v3392_v25  ;;  %v3490_v24 = vld [vmem:[%s4044_s7 + $0x34c] ss:$80 sps:$4 sm:$0xff]   ;;  %v3485_v25 = vld [vmem:[%s4044_s7 + $0x340] ss:$80 sps:$4 sm:$0xff]  }
  0xb0   : > { %2370 = vmatprep.subr.bf16.mxu0 %v3397_v26  ;;  %2413 = vmatprep.subr.bf16.mxu1 %v3400_v27  ;;  %v3488_v26 = vld [vmem:[%s4044_s7 + $0x348] ss:$80 sps:$4 sm:$0xff]   ;;  %v3493_v27 = vld [vmem:[%s4044_s7 + $0x3e4] ss:$80 sps:$4 sm:$0xff]  }
  0xb3   : > { %2371 = vmatpush1.bf16.msra.mxu0 %v3395_v28  ;;  %2414 = vmatpush1.bf16.msra.mxu1 %v3398_v29  ;;  %v3496_v28 = vld [vmem:[%s4044_s7 + $0x3ec] ss:$80 sps:$4 sm:$0xff]   ;;  %v3491_v29 = vld [vmem:[%s4044_s7 + $0x3e0] ss:$80 sps:$4 sm:$0xff]  }
  0xb4   : > { %2372 = vmatprep.subr.bf16.mxu0 %v3403_v30  ;;  %2415 = vmatprep.subr.bf16.mxu1 %v3406_v31  ;;  %v3494_v30 = vld [vmem:[%s4044_s7 + $0x3e8] ss:$80 sps:$4 sm:$0xff]   ;;  %v3499_v31 = vld [vmem:[%s4044_s7 + $0x484] ss:$80 sps:$4 sm:$0xff]  }
  0xb7   : > { %2373 = vmatpush1.bf16.msra.mxu0 %v3401_v32  ;;  %2416 = vmatpush1.bf16.msra.mxu1 %v3404_v33  ;;  %v3502_v32 = vld [vmem:[%s4044_s7 + $0x48c] ss:$80 sps:$4 sm:$0xff]   ;;  %v3497_v33 = vld [vmem:[%s4044_s7 + $0x480] ss:$80 sps:$4 sm:$0xff]  }
  0xb8   : > { %2374 = vmatprep.subr.bf16.mxu0 %v3409_v34  ;;  %2417 = vmatprep.subr.bf16.mxu1 %v3412_v35  ;;  %v3500_v34 = vld [vmem:[%s4044_s7 + $0x488] ss:$80 sps:$4 sm:$0xff]   ;;  %v3505_v35 = vld [vmem:[%s4044_s7 + $0x524] ss:$80 sps:$4 sm:$0xff]  }
  0xbb   : > { %2375 = vmatpush1.bf16.msra.mxu0 %v3407_v36  ;;  %2418 = vmatpush1.bf16.msra.mxu1 %v3410_v37  ;;  %v3508_v36 = vld [vmem:[%s4044_s7 + $0x52c] ss:$80 sps:$4 sm:$0xff]   ;;  %v3503_v37 = vld [vmem:[%s4044_s7 + $0x520] ss:$80 sps:$4 sm:$0xff]  }
  0xbc   : > { %2376 = vmatprep.subr.bf16.mxu0 %v3415_v38  ;;  %2419 = vmatprep.subr.bf16.mxu1 %v3418_v39  ;;  %v3506_v38 = vld [vmem:[%s4044_s7 + $0x528] ss:$80 sps:$4 sm:$0xff]   ;;  %v3511_v39 = vld [vmem:[%s4044_s7 + $0x5c4] ss:$80 sps:$4 sm:$0xff]  }
  0xbf   : > { %2377 = vmatpush1.bf16.msra.mxu0 %v3413_v40  ;;  %2420 = vmatpush1.bf16.msra.mxu1 %v3416_v41  ;;  %v3514_v40 = vld [vmem:[%s4044_s7 + $0x5cc] ss:$80 sps:$4 sm:$0xff]   ;;  %v3509_v41 = vld [vmem:[%s4044_s7 + $0x5c0] ss:$80 sps:$4 sm:$0xff]  }
  0xc0   : > { %2378 = vmatprep.subr.bf16.mxu0 %v3421_v42  ;;  %2421 = vmatprep.subr.bf16.mxu1 %v3424_v43  ;;  %v3512_v42 = vld [vmem:[%s4044_s7 + $0x5c8] ss:$80 sps:$4 sm:$0xff]   ;;  %v3517_v43 = vld [vmem:[%s4044_s7 + $0x664] ss:$80 sps:$4 sm:$0xff]  }
  0xc3   : > { %2379 = vmatpush1.bf16.msra.mxu0 %v3419_v44  ;;  %2422 = vmatpush1.bf16.msra.mxu1 %v3422_v45  ;;  %v3520_v44 = vld [vmem:[%s4044_s7 + $0x66c] ss:$80 sps:$4 sm:$0xff]   ;;  %v3515_v45 = vld [vmem:[%s4044_s7 + $0x660] ss:$80 sps:$4 sm:$0xff]  }
  0xc4   : > { %2380 = vmatprep.subr.bf16.mxu0 %v3427_v46  ;;  %2423 = vmatprep.subr.bf16.mxu1 %v3430_v47  ;;  %v3518_v46 = vld [vmem:[%s4044_s7 + $0x668] ss:$80 sps:$4 sm:$0xff]   ;;  %v3523_v47 = vld [vmem:[%s4044_s7 + $0x704] ss:$80 sps:$4 sm:$0xff]  }
  0xc7   : > { %2381 = vmatpush1.bf16.msra.mxu0 %v3425_v49  ;;  %2424 = vmatpush1.bf16.msra.mxu1 %v3428_v50  ;;  %v3526_v49 = vld [vmem:[%s4044_s7 + $0x70c] ss:$80 sps:$4 sm:$0xff]   ;;  %v3521_v50 = vld [vmem:[%s4044_s7 + $0x700] ss:$80 sps:$4 sm:$0xff]  }
  0xc8   : > { %2382 = vmatprep.subr.bf16.mxu0 %v3433_v51  ;;  %2425 = vmatprep.subr.bf16.mxu1 %v3436_v52  ;;  %v3524_v51 = vld [vmem:[%s4044_s7 + $0x708] ss:$80 sps:$4 sm:$0xff]   ;;  %v3529_v52 = vld [vmem:[%s4044_s7 + $0x7a4] ss:$80 sps:$4 sm:$0xff]  }
  0xcb   : > { %2383 = vmatpush1.bf16.msra.mxu0 %v3431_v53  ;;  %2426 = vmatpush1.bf16.msra.mxu1 %v3434_v54  ;;  %v3532_v53 = vld [vmem:[%s4044_s7 + $0x7ac] ss:$80 sps:$4 sm:$0xff]   ;;  %v3527_v54 = vld [vmem:[%s4044_s7 + $0x7a0] ss:$80 sps:$4 sm:$0xff]  }
  0xcc   : > { %2384 = vmatprep.subr.bf16.mxu0 %v3439_v55  ;;  %2427 = vmatprep.subr.bf16.mxu1 %v3442_v56  ;;  %v3530_v55 = vld [vmem:[%s4044_s7 + $0x7a8] ss:$80 sps:$4 sm:$0xff]   ;;  %v3535_v56 = vld [vmem:[%s4044_s7 + $0x844] ss:$80 sps:$4 sm:$0xff]  }
  0xcf   : > { %2385 = vmatpush1.bf16.msra.mxu0 %v3437_v57  ;;  %2428 = vmatpush1.bf16.msra.mxu1 %v3440_v58  ;;  %v3538_v57 = vld [vmem:[%s4044_s7 + $0x84c] ss:$80 sps:$4 sm:$0xff]   ;;  %v3533_v58 = vld [vmem:[%s4044_s7 + $0x840] ss:$80 sps:$4 sm:$0xff]  }
  0xd0   : > { %2386 = vmatprep.subr.bf16.mxu0 %v3445_v59  ;;  %2429 = vmatprep.subr.bf16.mxu1 %v3448_v60  ;;  %v3536_v59 = vld [vmem:[%s4044_s7 + $0x848] ss:$80 sps:$4 sm:$0xff]   ;;  %v3541_v60 = vld [vmem:[%s4044_s7 + $0x8e4] ss:$80 sps:$4 sm:$0xff]  }
  0xd3   : > { %2387 = vmatpush1.bf16.msra.mxu0 %v3443_v61  ;;  %2430 = vmatpush1.bf16.msra.mxu1 %v3446_v62  ;;  %v3544_v61 = vld [vmem:[%s4044_s7 + $0x8ec] ss:$80 sps:$4 sm:$0xff]   ;;  %v3539_v62 = vld [vmem:[%s4044_s7 + $0x8e0] ss:$80 sps:$4 sm:$0xff]  }
  0xd4   : > { %2388 = vmatprep.subr.bf16.mxu0 %v3451_v63  ;;  %2431 = vmatprep.subr.bf16.mxu1 %v3454_v0  ;;  %v3542_v63 = vld [vmem:[%s4044_s7 + $0x8e8] ss:$80 sps:$4 sm:$0xff]   ;;  %v3547_v0 = vld [vmem:[%s4044_s7 + $0x984] ss:$80 sps:$4 sm:$0xff]  }
  0xd7   : > { %2389 = vmatpush1.bf16.msra.mxu0 %v3449_v1  ;;  %2432 = vmatpush1.bf16.msra.mxu1 %v3452_v2  ;;  %v3550_v1 = vld [vmem:[%s4044_s7 + $0x98c] ss:$80 sps:$4 sm:$0xff]   ;;  %v3545_v2 = vld [vmem:[%s4044_s7 + $0x980] ss:$80 sps:$4 sm:$0xff]  }
  0xd8   : > { %2444 = vmatprep.subr.bf16.mxu0 %v3457_v4  ;;  %2487 = vmatprep.subr.bf16.mxu1 %v3460_v5  ;;  %v3548_v4 = vld [vmem:[%s4044_s7 + $0x988] ss:$80 sps:$4 sm:$0xff]   ;;  %v3553_v5 = vld [vmem:[%s4044_s7 + $0x34] ss:$80 sps:$4 sm:$0xff]  }
  0xda   : > { %2391 = vmatmul.mubr.bf16.vlgmr.msra.gmra.mrb[4].mxu0 %v4134_v3  ;;  %2434 = vmatmul.mubr.bf16.vlgmr.msra.gmra.mrb[4].mxu1 %v4134_v3 }
  0xdb   : > { %2445 = vmatpush1.bf16.msra.mxu0 %v3455_v6  ;;  %2488 = vmatpush1.bf16.msra.mxu1 %v3458_v7  ;;  %v3556_v6 = vld [vmem:[%s4044_s7 + $0x3c] ss:$80 sps:$4 sm:$0xff]   ;;  %v3551_v7 = vld [vmem:[%s4044_s7 + $0x30] ss:$80 sps:$4 sm:$0xff]  }
  0xdc   : > { %2446 = vmatprep.subr.bf16.mxu0 %v3463_v8  ;;  %2489 = vmatprep.subr.bf16.mxu1 %v3466_v9  ;;  %v3554_v8 = vld [vmem:[%s4044_s7 + $0x38] ss:$80 sps:$4 sm:$0xff]   ;;  %v3559_v9 = vld [vmem:[%s4044_s7 + $0xd4] ss:$80 sps:$4 sm:$0xff]  }
  0xdd   : > { %2476 = vmatprep.mubr.bf16.mxu0 %v4109_v48  ;;  %2519 = vmatprep.mubr.bf16.mxu1 %v4109_v48  ;;  %v3481_v48 = vld [vmem:[%s4044_s7 + $0x2a4] ss:$80 sps:$4 sm:$0xff]  }
  0xdf   : > { %2447 = vmatpush1.bf16.msra.mxu0 %v3461_v10  ;;  %2490 = vmatpush1.bf16.msra.mxu1 %v3464_v11  ;;  %v3562_v10 = vld [vmem:[%s4044_s7 + $0xdc] ss:$80 sps:$4 sm:$0xff]   ;;  %v3557_v11 = vld [vmem:[%s4044_s7 + $0xd0] ss:$80 sps:$4 sm:$0xff]  }
  0xe0   : > { %2448 = vmatprep.subr.bf16.mxu0 %v3469_v12  ;;  %2491 = vmatprep.subr.bf16.mxu1 %v3472_v13  ;;  %v3560_v12 = vld [vmem:[%s4044_s7 + $0xd8] ss:$80 sps:$4 sm:$0xff]   ;;  %v3565_v13 = vld [vmem:[%s4044_s7 + $0x174] ss:$80 sps:$4 sm:$0xff]  }
  0xe3   : > { %2449 = vmatpush1.bf16.msra.mxu0 %v3467_v14  ;;  %2492 = vmatpush1.bf16.msra.mxu1 %v3470_v15  ;;  %v3568_v14 = vld [vmem:[%s4044_s7 + $0x17c] ss:$80 sps:$4 sm:$0xff]  }
  0xe4   : > { %2450 = vmatprep.subr.bf16.mxu0 %v3475_v16  ;;  %2493 = vmatprep.subr.bf16.mxu1 %v3478_v17  ;;  %v4285_v15 = vld [vmem:[%s4572_s0 + $0x4] ss:$8 sps:$4 sm:$0xff]   ;;  %v3566_v16 = vld [vmem:[%s4044_s7 + $0x178] ss:$80 sps:$4 sm:$0xff]  }
  0xe5   : > { %v3571_v17 = vld [vmem:[%s4044_s7 + $0x214] ss:$80 sps:$4 sm:$0xff]  }
  0xe7   : > { %2451 = vmatpush1.bf16.msra.mxu0 %v3473_v18  ;;  %2494 = vmatpush1.bf16.msra.mxu1 %v3476_v19  ;;  %v3574_v18 = vld [vmem:[%s4044_s7 + $0x21c] ss:$80 sps:$4 sm:$0xff]   ;;  %v3569_v19 = vld [vmem:[%s4044_s7 + $0x210] ss:$80 sps:$4 sm:$0xff]  }
  0xe8   : > { %2452 = vmatprep.subr.bf16.mxu0 %v3481_v48  ;;  %2495 = vmatprep.subr.bf16.mxu1 %v3484_v20  ;;  %v3572_v48 = vld [vmem:[%s4044_s7 + $0x218] ss:$80 sps:$4 sm:$0xff]   ;;  %v3577_v20 = vld [vmem:[%s4044_s7 + $0x2b4] ss:$80 sps:$4 sm:$0xff]  }
  0xeb   : > { %2453 = vmatpush1.bf16.msra.mxu0 %v3479_v21  ;;  %2496 = vmatpush1.bf16.msra.mxu1 %v3482_v22  ;;  %v3580_v21 = vld [vmem:[%s4044_s7 + $0x2bc] ss:$80 sps:$4 sm:$0xff]   ;;  %v3575_v22 = vld [vmem:[%s4044_s7 + $0x2b0] ss:$80 sps:$4 sm:$0xff]  }
  0xec   : > { %2454 = vmatprep.subr.bf16.mxu0 %v3487_v23  ;;  %2497 = vmatprep.subr.bf16.mxu1 %v3490_v24  ;;  %v3578_v23 = vld [vmem:[%s4044_s7 + $0x2b8] ss:$80 sps:$4 sm:$0xff]   ;;  %v3583_v24 = vld [vmem:[%s4044_s7 + $0x354] ss:$80 sps:$4 sm:$0xff]  }
  0xef   : > { %2455 = vmatpush1.bf16.msra.mxu0 %v3485_v25  ;;  %2498 = vmatpush1.bf16.msra.mxu1 %v3488_v26  ;;  %v3586_v25 = vld [vmem:[%s4044_s7 + $0x35c] ss:$80 sps:$4 sm:$0xff]   ;;  %v3581_v26 = vld [vmem:[%s4044_s7 + $0x350] ss:$80 sps:$4 sm:$0xff]  }
  0xf0   : > { %2456 = vmatprep.subr.bf16.mxu0 %v3493_v27  ;;  %2499 = vmatprep.subr.bf16.mxu1 %v3496_v28  ;;  %v3584_v27 = vld [vmem:[%s4044_s7 + $0x358] ss:$80 sps:$4 sm:$0xff]   ;;  %v3589_v28 = vld [vmem:[%s4044_s7 + $0x3f4] ss:$80 sps:$4 sm:$0xff]  }
  0xf3   : > { %2457 = vmatpush1.bf16.msra.mxu0 %v3491_v29  ;;  %2500 = vmatpush1.bf16.msra.mxu1 %v3494_v30  ;;  %v3592_v29 = vld [vmem:[%s4044_s7 + $0x3fc] ss:$80 sps:$4 sm:$0xff]   ;;  %v3587_v30 = vld [vmem:[%s4044_s7 + $0x3f0] ss:$80 sps:$4 sm:$0xff]  }
  0xf4   : > { %2458 = vmatprep.subr.bf16.mxu0 %v3499_v31  ;;  %2501 = vmatprep.subr.bf16.mxu1 %v3502_v32  ;;  %v3590_v31 = vld [vmem:[%s4044_s7 + $0x3f8] ss:$80 sps:$4 sm:$0xff]   ;;  %v3595_v32 = vld [vmem:[%s4044_s7 + $0x494] ss:$80 sps:$4 sm:$0xff]  }
  0xf7   : > { %2459 = vmatpush1.bf16.msra.mxu0 %v3497_v33  ;;  %2502 = vmatpush1.bf16.msra.mxu1 %v3500_v34  ;;  %v3598_v33 = vld [vmem:[%s4044_s7 + $0x49c] ss:$80 sps:$4 sm:$0xff]   ;;  %v3593_v34 = vld [vmem:[%s4044_s7 + $0x490] ss:$80 sps:$4 sm:$0xff]  }
  0xf8   : > { %2460 = vmatprep.subr.bf16.mxu0 %v3505_v35  ;;  %2503 = vmatprep.subr.bf16.mxu1 %v3508_v36  ;;  %v3596_v35 = vld [vmem:[%s4044_s7 + $0x498] ss:$80 sps:$4 sm:$0xff]   ;;  %v3601_v36 = vld [vmem:[%s4044_s7 + $0x534] ss:$80 sps:$4 sm:$0xff]  }
  0xfb   : > { %2461 = vmatpush1.bf16.msra.mxu0 %v3503_v37  ;;  %2504 = vmatpush1.bf16.msra.mxu1 %v3506_v38  ;;  %v3604_v37 = vld [vmem:[%s4044_s7 + $0x53c] ss:$80 sps:$4 sm:$0xff]   ;;  %v3599_v38 = vld [vmem:[%s4044_s7 + $0x530] ss:$80 sps:$4 sm:$0xff]  }
  0xfc   : > { %2462 = vmatprep.subr.bf16.mxu0 %v3511_v39  ;;  %2505 = vmatprep.subr.bf16.mxu1 %v3514_v40  ;;  %v3602_v39 = vld [vmem:[%s4044_s7 + $0x538] ss:$80 sps:$4 sm:$0xff]   ;;  %v3607_v40 = vld [vmem:[%s4044_s7 + $0x5d4] ss:$80 sps:$4 sm:$0xff]  }
  0xff   : > { %2463 = vmatpush1.bf16.msra.mxu0 %v3509_v41  ;;  %2506 = vmatpush1.bf16.msra.mxu1 %v3512_v42  ;;  %v3610_v41 = vld [vmem:[%s4044_s7 + $0x5dc] ss:$80 sps:$4 sm:$0xff]   ;;  %v3605_v42 = vld [vmem:[%s4044_s7 + $0x5d0] ss:$80 sps:$4 sm:$0xff]  }
 0x100   : > { %2464 = vmatprep.subr.bf16.mxu0 %v3517_v43  ;;  %2507 = vmatprep.subr.bf16.mxu1 %v3520_v44  ;;  %v3608_v43 = vld [vmem:[%s4044_s7 + $0x5d8] ss:$80 sps:$4 sm:$0xff]   ;;  %v3613_v44 = vld [vmem:[%s4044_s7 + $0x674] ss:$80 sps:$4 sm:$0xff]  }
 0x103   : > { %2465 = vmatpush1.bf16.msra.mxu0 %v3515_v45  ;;  %2508 = vmatpush1.bf16.msra.mxu1 %v3518_v46  ;;  %v3616_v45 = vld [vmem:[%s4044_s7 + $0x67c] ss:$80 sps:$4 sm:$0xff]   ;;  %v3611_v46 = vld [vmem:[%s4044_s7 + $0x670] ss:$80 sps:$4 sm:$0xff]  }
 0x104   : > { %2466 = vmatprep.subr.bf16.mxu0 %v3523_v47  ;;  %2509 = vmatprep.subr.bf16.mxu1 %v3526_v49  ;;  %v3614_v47 = vld [vmem:[%s4044_s7 + $0x678] ss:$80 sps:$4 sm:$0xff]   ;;  %v3619_v49 = vld [vmem:[%s4044_s7 + $0x714] ss:$80 sps:$4 sm:$0xff]  }
 0x107   : > { %2467 = vmatpush1.bf16.msra.mxu0 %v3521_v50  ;;  %2510 = vmatpush1.bf16.msra.mxu1 %v3524_v51  ;;  %v3622_v50 = vld [vmem:[%s4044_s7 + $0x71c] ss:$80 sps:$4 sm:$0xff]   ;;  %v3617_v51 = vld [vmem:[%s4044_s7 + $0x710] ss:$80 sps:$4 sm:$0xff]  }
 0x108   : > { %2468 = vmatprep.subr.bf16.mxu0 %v3529_v52  ;;  %2511 = vmatprep.subr.bf16.mxu1 %v3532_v53  ;;  %v3620_v52 = vld [vmem:[%s4044_s7 + $0x718] ss:$80 sps:$4 sm:$0xff]   ;;  %v3625_v53 = vld [vmem:[%s4044_s7 + $0x7b4] ss:$80 sps:$4 sm:$0xff]  }
 0x10b   : > { %2469 = vmatpush1.bf16.msra.mxu0 %v3527_v54  ;;  %2512 = vmatpush1.bf16.msra.mxu1 %v3530_v55  ;;  %v3628_v54 = vld [vmem:[%s4044_s7 + $0x7bc] ss:$80 sps:$4 sm:$0xff]   ;;  %v3623_v55 = vld [vmem:[%s4044_s7 + $0x7b0] ss:$80 sps:$4 sm:$0xff]  }
 0x10c   : > { %2470 = vmatprep.subr.bf16.mxu0 %v3535_v56  ;;  %2513 = vmatprep.subr.bf16.mxu1 %v3538_v57  ;;  %v3626_v56 = vld [vmem:[%s4044_s7 + $0x7b8] ss:$80 sps:$4 sm:$0xff]   ;;  %v3631_v57 = vld [vmem:[%s4044_s7 + $0x854] ss:$80 sps:$4 sm:$0xff]  }
 0x10f   : > { %2471 = vmatpush1.bf16.msra.mxu0 %v3533_v58  ;;  %2514 = vmatpush1.bf16.msra.mxu1 %v3536_v59  ;;  %v3634_v58 = vld [vmem:[%s4044_s7 + $0x85c] ss:$80 sps:$4 sm:$0xff]   ;;  %v3629_v59 = vld [vmem:[%s4044_s7 + $0x850] ss:$80 sps:$4 sm:$0xff]  }
 0x110   : > { %2472 = vmatprep.subr.bf16.mxu0 %v3541_v60  ;;  %2515 = vmatprep.subr.bf16.mxu1 %v3544_v61  ;;  %v3632_v60 = vld [vmem:[%s4044_s7 + $0x858] ss:$80 sps:$4 sm:$0xff]   ;;  %v3637_v61 = vld [vmem:[%s4044_s7 + $0x8f4] ss:$80 sps:$4 sm:$0xff]  }
 0x113   : > { %2473 = vmatpush1.bf16.msra.mxu0 %v3539_v62  ;;  %2516 = vmatpush1.bf16.msra.mxu1 %v3542_v63  ;;  %v3640_v62 = vld [vmem:[%s4044_s7 + $0x8fc] ss:$80 sps:$4 sm:$0xff]   ;;  %v3635_v63 = vld [vmem:[%s4044_s7 + $0x8f0] ss:$80 sps:$4 sm:$0xff]  }
 0x114   : > { %2474 = vmatprep.subr.bf16.mxu0 %v3547_v0  ;;  %2517 = vmatprep.subr.bf16.mxu1 %v3550_v1  ;;  %v3638_v0 = vld [vmem:[%s4044_s7 + $0x8f8] ss:$80 sps:$4 sm:$0xff]   ;;  %v3643_v1 = vld [vmem:[%s4044_s7 + $0x994] ss:$80 sps:$4 sm:$0xff]  }
 0x117   : > { %2475 = vmatpush1.bf16.msra.mxu0 %v3545_v2  ;;  %2518 = vmatpush1.bf16.msra.mxu1 %v3548_v4  ;;  %v3646_v2 = vld [vmem:[%s4044_s7 + $0x99c] ss:$80 sps:$4 sm:$0xff]   ;;  %v3641_v4 = vld [vmem:[%s4044_s7 + $0x990] ss:$80 sps:$4 sm:$0xff]  }
 0x118   : > { %2530 = vmatprep.subr.bf16.mxu0 %v3553_v5  ;;  %2573 = vmatprep.subr.bf16.mxu1 %v3556_v6  ;;  %v3644_v5 = vld [vmem:[%s4044_s7 + $0x998] ss:$80 sps:$4 sm:$0xff]   ;;  %v3649_v6 = vld [vmem:[%s4044_s7 + $0x44] ss:$80 sps:$4 sm:$0xff]  }
 0x11a   : > { %2477 = vmatmul.mubr.bf16.vlgmr.msra.gmra.mrb[8].mxu0 %v4134_v3  ;;  %2520 = vmatmul.mubr.bf16.vlgmr.msra.gmra.mrb[8].mxu1 %v4134_v3  ;;  %v3563_v3 = vld [vmem:[%s4044_s7 + $0x170] ss:$80 sps:$4 sm:$0xff]  }
 0x11b   : > { %2531 = vmatpush1.bf16.msra.mxu0 %v3551_v7  ;;  %2574 = vmatpush1.bf16.msra.mxu1 %v3554_v8  ;;  %v3652_v7 = vld [vmem:[%s4044_s7 + $0x4c] ss:$80 sps:$4 sm:$0xff]   ;;  %v3647_v8 = vld [vmem:[%s4044_s7 + $0x40] ss:$80 sps:$4 sm:$0xff]  }
 0x11c   : > { %2532 = vmatprep.subr.bf16.mxu0 %v3559_v9  ;;  %2575 = vmatprep.subr.bf16.mxu1 %v3562_v10  ;;  %v3650_v9 = vld [vmem:[%s4044_s7 + $0x48] ss:$80 sps:$4 sm:$0xff]   ;;  %v3655_v10 = vld [vmem:[%s4044_s7 + $0xe4] ss:$80 sps:$4 sm:$0xff]  }
 0x11d   : > { %2562 = vmatprep.mubr.bf16.mxu0 %v4285_v15  ;;  %2605 = vmatprep.mubr.bf16.mxu1 %v4285_v15 }
 0x11f   : > { %2533 = vmatpush1.bf16.msra.mxu0 %v3557_v11  ;;  %2576 = vmatpush1.bf16.msra.mxu1 %v3560_v12  ;;  %v3658_v11 = vld [vmem:[%s4044_s7 + $0xec] ss:$80 sps:$4 sm:$0xff]   ;;  %v4352_v12 = vld [vmem:[%s4572_s0] ss:$8 sps:$4 sm:$0xff]  }
 0x120   : > { %2534 = vmatprep.subr.bf16.mxu0 %v3565_v13  ;;  %2577 = vmatprep.subr.bf16.mxu1 %v3568_v14  ;;  %v3653_v13 = vld [vmem:[%s4044_s7 + $0xe0] ss:$80 sps:$4 sm:$0xff]   ;;  %v3656_v14 = vld [vmem:[%s4044_s7 + $0xe8] ss:$80 sps:$4 sm:$0xff]  }
 0x123   : > { %2535 = vmatpush1.bf16.msra.mxu0 %v3563_v3  ;;  %2578 = vmatpush1.bf16.msra.mxu1 %v3566_v16  ;;  %v3661_v3 = vld [vmem:[%s4044_s7 + $0x184] ss:$80 sps:$4 sm:$0xff]   ;;  %v3664_v16 = vld [vmem:[%s4044_s7 + $0x18c] ss:$80 sps:$4 sm:$0xff]  }
 0x124   : > { %2536 = vmatprep.subr.bf16.mxu0 %v3571_v17  ;;  %2579 = vmatprep.subr.bf16.mxu1 %v3574_v18  ;;  %v562_v17 = vlaneseq  ;;  %v3659_v18 = vld [vmem:[%s4044_s7 + $0x180] ss:$80 sps:$4 sm:$0xff]  }
 0x127   : > { %2537 = vmatpush1.bf16.msra.mxu0 %v3569_v19  ;;  %2580 = vmatpush1.bf16.msra.mxu1 %v3572_v48  ;;  %v3662_v19 = vld [vmem:[%s4044_s7 + $0x188] ss:$80 sps:$4 sm:$0xff]   ;;  %v3667_v48 = vld [vmem:[%s4044_s7 + $0x224] ss:$80 sps:$4 sm:$0xff]  }
 0x128   : > { %2538 = vmatprep.subr.bf16.mxu0 %v3577_v20  ;;  %2581 = vmatprep.subr.bf16.mxu1 %v3580_v21  ;;  %v3670_v20 = vld [vmem:[%s4044_s7 + $0x22c] ss:$80 sps:$4 sm:$0xff]   ;;  %v4366_v21 = vshrl.u32 %v562_v17, 7  ;;  %v3713_v17 = vld [vmem:[%s4044_s7 + $0x720] ss:$80 sps:$4 sm:$0xff]  }
 0x12b   : > { %2539 = vmatpush1.bf16.msra.mxu0 %v3575_v22  ;;  %2582 = vmatpush1.bf16.msra.mxu1 %v3578_v23  ;;  %v3665_v22 = vld [vmem:[%s4044_s7 + $0x220] ss:$80 sps:$4 sm:$0xff]   ;;  %v3673_v23 = vld [vmem:[%s4044_s7 + $0x2c4] ss:$80 sps:$4 sm:$0xff]  }
 0x12c   : > { %2540 = vmatprep.subr.bf16.mxu0 %v3583_v24  ;;  %2583 = vmatprep.subr.bf16.mxu1 %v3586_v25  ;;  %v3676_v24 = vld [vmem:[%s4044_s7 + $0x2cc] ss:$80 sps:$4 sm:$0xff]   ;;  %v4373_v25 = vsub.s32 0, %v4366_v21 }
 0x12f   : > { %2541 = vmatpush1.bf16.msra.mxu0 %v3581_v26  ;;  %2584 = vmatpush1.bf16.msra.mxu1 %v3584_v27  ;;  %v4376_v26 = vsub.s32 2, %v4366_v21  ;;  %v4379_v27 = vsub.s32 1, %v4366_v21 }
 0x130   : > { %2542 = vmatprep.subr.bf16.mxu0 %v3589_v28  ;;  %2585 = vmatprep.subr.bf16.mxu1 %v3592_v29  ;;  %v3671_v28 = vld [vmem:[%s4044_s7 + $0x2c0] ss:$80 sps:$4 sm:$0xff]   ;;  %v3674_v29 = vld [vmem:[%s4044_s7 + $0x2c8] ss:$80 sps:$4 sm:$0xff]  }
 0x133   : > { %2543 = vmatpush1.bf16.msra.mxu0 %v3587_v30  ;;  %2586 = vmatpush1.bf16.msra.mxu1 %v3590_v31  ;;  %v4384_v30 = vld [vmem:[%s4052_s20] sm:$0xff]  ;;  %v4387_v31 = vsub.s32 3, %v4366_v21 }
 0x134   : > { %2544 = vmatprep.subr.bf16.mxu0 %v3595_v32  ;;  %2587 = vmatprep.subr.bf16.mxu1 %v3598_v33  ;;  %v3679_v32 = vld [vmem:[%s4044_s7 + $0x364] ss:$80 sps:$4 sm:$0xff]   ;;  %v3682_v33 = vld [vmem:[%s4044_s7 + $0x36c] ss:$80 sps:$4 sm:$0xff]  }
 0x137   : > { %2545 = vmatpush1.bf16.msra.mxu0 %v3593_v34  ;;  %2588 = vmatpush1.bf16.msra.mxu1 %v3596_v35  ;;  %v565_v34 = vrot.slane %v4384_v30, %v4373_v25  ;;  %v573_v35 = vrot.slane %v4384_v30, %v4376_v26 }
 0x138   : > { %2546 = vmatprep.subr.bf16.mxu0 %v3601_v36  ;;  %2589 = vmatprep.subr.bf16.mxu1 %v3604_v37  ;;  %v569_v36 = vrot.slane %v4384_v30, %v4379_v27  ;;  %v577_v37 = vrot.slane %v4384_v30, %v4387_v31 }
 0x13b   : > { %2547 = vmatpush1.bf16.msra.mxu0 %v3599_v38  ;;  %2590 = vmatpush1.bf16.msra.mxu1 %v3602_v39  ;;  %v3677_v38 = vld [vmem:[%s4044_s7 + $0x360] ss:$80 sps:$4 sm:$0xff]   ;;  %v3680_v39 = vld [vmem:[%s4044_s7 + $0x368] ss:$80 sps:$4 sm:$0xff]  }
 0x13c   : > { %2548 = vmatprep.subr.bf16.mxu0 %v3607_v40  ;;  %2591 = vmatprep.subr.bf16.mxu1 %v3610_v41  ;;  %v3685_v40 = vld [vmem:[%s4044_s7 + $0x404] ss:$80 sps:$4 sm:$0xff]   ;;  %v3688_v41 = vld [vmem:[%s4044_s7 + $0x40c] ss:$80 sps:$4 sm:$0xff]  }
 0x13f   : > { %2549 = vmatpush1.bf16.msra.mxu0 %v3605_v42  ;;  %2592 = vmatpush1.bf16.msra.mxu1 %v3608_v43 }
 0x140   : > { %2550 = vmatprep.subr.bf16.mxu0 %v3613_v44  ;;  %2593 = vmatprep.subr.bf16.mxu1 %v3616_v45 }
 0x143   : > { %2551 = vmatpush1.bf16.msra.mxu0 %v3611_v46  ;;  %2594 = vmatpush1.bf16.msra.mxu1 %v3614_v47 }
 0x144   : > { %2552 = vmatprep.subr.bf16.mxu0 %v3619_v49  ;;  %2595 = vmatprep.subr.bf16.mxu1 %v3622_v50 }
 0x147   : > { %2553 = vmatpush1.bf16.msra.mxu0 %v3617_v51  ;;  %2596 = vmatpush1.bf16.msra.mxu1 %v3620_v52 }
 0x148   : > { %2554 = vmatprep.subr.bf16.mxu0 %v3625_v53  ;;  %2597 = vmatprep.subr.bf16.mxu1 %v3628_v54  ;;  %v3683_v53 = vld [vmem:[%s4044_s7 + $0x400] ss:$80 sps:$4 sm:$0xff]   ;;  %v3686_v54 = vld [vmem:[%s4044_s7 + $0x408] ss:$80 sps:$4 sm:$0xff]  }
 0x14b   : > { %2555 = vmatpush1.bf16.msra.mxu0 %v3623_v55  ;;  %2598 = vmatpush1.bf16.msra.mxu1 %v3626_v56 }
 0x14c   : > { %2556 = vmatprep.subr.bf16.mxu0 %v3631_v57  ;;  %2599 = vmatprep.subr.bf16.mxu1 %v3634_v58 }
 0x14f   : > { %2557 = vmatpush1.bf16.msra.mxu0 %v3629_v59  ;;  %2600 = vmatpush1.bf16.msra.mxu1 %v3632_v60  ;;  %v3691_v59 = vld [vmem:[%s4044_s7 + $0x4a4] ss:$80 sps:$4 sm:$0xff]   ;;  %v3694_v60 = vld [vmem:[%s4044_s7 + $0x4ac] ss:$80 sps:$4 sm:$0xff]  }
 0x150   : > { %2558 = vmatprep.subr.bf16.mxu0 %v3637_v61  ;;  %2601 = vmatprep.subr.bf16.mxu1 %v3640_v62 }
 0x153   : > { %2559 = vmatpush1.bf16.msra.mxu0 %v3635_v63  ;;  %2602 = vmatpush1.bf16.msra.mxu1 %v3638_v0  ;;  %v3689_v63 = vld [vmem:[%s4044_s7 + $0x4a0] ss:$80 sps:$4 sm:$0xff]   ;;  %v3692_v0 = vld [vmem:[%s4044_s7 + $0x4a8] ss:$80 sps:$4 sm:$0xff]  }
 0x154   : > { %2560 = vmatprep.subr.bf16.mxu0 %v3643_v1  ;;  %2603 = vmatprep.subr.bf16.mxu1 %v3646_v2  ;;  %v3697_v1 = vld [vmem:[%s4044_s7 + $0x544] ss:$80 sps:$4 sm:$0xff]   ;;  %v3700_v2 = vld [vmem:[%s4044_s7 + $0x54c] ss:$80 sps:$4 sm:$0xff]  }
 0x157   : > { %2561 = vmatpush1.bf16.msra.mxu0 %v3641_v4  ;;  %2604 = vmatpush1.bf16.msra.mxu1 %v3644_v5  ;;  %v3695_v4 = vld [vmem:[%s4044_s7 + $0x540] ss:$80 sps:$4 sm:$0xff]   ;;  %v3698_v5 = vld [vmem:[%s4044_s7 + $0x548] ss:$80 sps:$4 sm:$0xff]  }
 0x158   : > { %2616 = vmatprep.subr.bf16.mxu0 %v3649_v6  ;;  %2659 = vmatprep.subr.bf16.mxu1 %v3652_v7  ;;  %v3703_v6 = vld [vmem:[%s4044_s7 + $0x5e4] ss:$80 sps:$4 sm:$0xff]   ;;  %v3706_v7 = vld [vmem:[%s4044_s7 + $0x5ec] ss:$80 sps:$4 sm:$0xff]  }
 0x15a   : > { %2563 = vmatmul.mubr.bf16.vlgmr.msra.gmra.mrb[12].mxu0 %v4352_v12  ;;  %2606 = vmatmul.mubr.bf16.vlgmr.msra.gmra.mrb[12].mxu1 %v4352_v12 }
 0x15b   : > { %2617 = vmatpush1.bf16.msra.mxu0 %v3647_v8  ;;  %2660 = vmatpush1.bf16.msra.mxu1 %v3650_v9  ;;  %v3701_v8 = vld [vmem:[%s4044_s7 + $0x5e0] ss:$80 sps:$4 sm:$0xff]   ;;  %v3704_v9 = vld [vmem:[%s4044_s7 + $0x5e8] ss:$80 sps:$4 sm:$0xff]  }
 0x15c   : > { %2618 = vmatprep.subr.bf16.mxu0 %v3655_v10  ;;  %2661 = vmatprep.subr.bf16.mxu1 %v3658_v11  ;;  %v3709_v10 = vld [vmem:[%s4044_s7 + $0x684] ss:$80 sps:$4 sm:$0xff]   ;;  %v3712_v11 = vld [vmem:[%s4044_s7 + $0x68c] ss:$80 sps:$4 sm:$0xff]  }
 0x15d   : > { %2648 = vmatprep.mubr.bf16.mxu0 %v4285_v15  ;;  %2691 = vmatprep.mubr.bf16.mxu1 %v4285_v15  ;;  %v3668_v15 = vld [vmem:[%s4044_s7 + $0x228] ss:$80 sps:$4 sm:$0xff]  }
 0x15f   : > { %2619 = vmatpush1.bf16.msra.mxu0 %v3653_v13  ;;  %2662 = vmatpush1.bf16.msra.mxu1 %v3656_v14  ;;  %v3707_v13 = vld [vmem:[%s4044_s7 + $0x680] ss:$80 sps:$4 sm:$0xff]   ;;  %v3710_v14 = vld [vmem:[%s4044_s7 + $0x688] ss:$80 sps:$4 sm:$0xff]  }
 0x160   : > { %2620 = vmatprep.subr.bf16.mxu0 %v3661_v3  ;;  %2663 = vmatprep.subr.bf16.mxu1 %v3664_v16  ;;  %v3715_v3 = vld [vmem:[%s4044_s7 + $0x724] ss:$80 sps:$4 sm:$0xff]   ;;  %v3718_v16 = vld [vmem:[%s4044_s7 + $0x72c] ss:$80 sps:$4 sm:$0xff]  }
 0x163   : > { %2621 = vmatpush1.bf16.msra.mxu0 %v3659_v18  ;;  %2664 = vmatpush1.bf16.msra.mxu1 %v3662_v19  ;;  %v3716_v18 = vld [vmem:[%s4044_s7 + $0x728] ss:$80 sps:$4 sm:$0xff]   ;;  %v3721_v19 = vld [vmem:[%s4044_s7 + $0x7c4] ss:$80 sps:$4 sm:$0xff]  }
 0x164   : > { %2622 = vmatprep.subr.bf16.mxu0 %v3667_v48  ;;  %2665 = vmatprep.subr.bf16.mxu1 %v3670_v20  ;;  %v3724_v48 = vld [vmem:[%s4044_s7 + $0x7cc] ss:$80 sps:$4 sm:$0xff]   ;;  %v3719_v20 = vld [vmem:[%s4044_s7 + $0x7c0] ss:$80 sps:$4 sm:$0xff]  }
 0x167   : > { %2623 = vmatpush1.bf16.msra.mxu0 %v3665_v22  ;;  %2666 = vmatpush1.bf16.msra.mxu1 %v3668_v15  ;;  %v3722_v22 = vld [vmem:[%s4044_s7 + $0x7c8] ss:$80 sps:$4 sm:$0xff]   ;;  %v3727_v15 = vld [vmem:[%s4044_s7 + $0x864] ss:$80 sps:$4 sm:$0xff]  }
 0x168   : > { %2624 = vmatprep.subr.bf16.mxu0 %v3673_v23  ;;  %2667 = vmatprep.subr.bf16.mxu1 %v3676_v24  ;;  %v3730_v23 = vld [vmem:[%s4044_s7 + $0x86c] ss:$80 sps:$4 sm:$0xff]   ;;  %v3725_v24 = vld [vmem:[%s4044_s7 + $0x860] ss:$80 sps:$4 sm:$0xff]  }
 0x16b   : > { %2625 = vmatpush1.bf16.msra.mxu0 %v3671_v28  ;;  %2668 = vmatpush1.bf16.msra.mxu1 %v3674_v29  ;;  %v3728_v28 = vld [vmem:[%s4044_s7 + $0x868] ss:$80 sps:$4 sm:$0xff]   ;;  %v3733_v29 = vld [vmem:[%s4044_s7 + $0x904] ss:$80 sps:$4 sm:$0xff]  }
 0x16c   : > { %2626 = vmatprep.subr.bf16.mxu0 %v3679_v32  ;;  %2669 = vmatprep.subr.bf16.mxu1 %v3682_v33  ;;  %v3736_v32 = vld [vmem:[%s4044_s7 + $0x90c] ss:$80 sps:$4 sm:$0xff]   ;;  %v3731_v33 = vld [vmem:[%s4044_s7 + $0x900] ss:$80 sps:$4 sm:$0xff]  }
 0x16d   : > { %v2306_v42 = vpop.f32.mrb[0].mxu0  ;;  %v2349_v43 = vpop.f32.mrb[0].mxu1 }
 0x16e   : > { %v2307_v44 = vadd.f32 %v2306_v42, %v565_v34  ;;  %v2350_v45 = vadd.f32 %v2349_v43, %v573_v35  ;;  %v2308_v46 = vpop.f32.mrb[1].mxu0  ;;  %v2351_v47 = vpop.f32.mrb[1].mxu1  ;;  %v592_v42 = vsub.s32 7, %v4366_v21 }
 0x16f   : > { %v2309_v49 = vadd.f32 %v2308_v46, %v569_v36  ;;  %v2352_v50 = vadd.f32 %v2351_v47, %v577_v37  ;;  %v2310_v51 = vpop.f32.mrb[2].mxu0  ;;  %v2353_v52 = vpop.f32.mrb[2].mxu1  ;;  %2627 = vmatpush1.bf16.msra.mxu0 %v3677_v38  ;;  %2670 = vmatpush1.bf16.msra.mxu1 %v3680_v39  ;;  %v3740_v38 = vld [vmem:[%s4044_s7 + $0x9a8] ss:$80 sps:$4 sm:$0xff]   ;;  %v580_v39 = vsub.s32 4, %v4366_v21 }
 0x170   : > { %2702 = vst [vmem:[%s4406_s11] sm:$0xff] %v2307_v44  ;;  %2704 = vst [vmem:[%s4406_s11 + $0x10] sm:$0xff] %v2350_v45  ;;  %v2311_v55 = vadd.f32 %v2310_v51, %v565_v34  ;;  %v2354_v56 = vadd.f32 %v2353_v52, %v573_v35  ;;  %v2312_v57 = vpop.f32.mrb[3].mxu0  ;;  %v2355_v58 = vpop.f32.mrb[3].mxu1  ;;  %2628 = vmatprep.subr.bf16.mxu0 %v3685_v40  ;;  %2671 = vmatprep.subr.bf16.mxu1 %v3688_v41  ;;  %v3734_v34 = vld [vmem:[%s4044_s7 + $0x908] ss:$80 sps:$4 sm:$0xff]   ;;  %v588_v40 = vsub.s32 6, %v4366_v21 }
 0x171   : > { %2703 = vst [vmem:[%s4406_s11 + $0x8] sm:$0xff] %v2309_v49  ;;  %2705 = vst [vmem:[%s4406_s11 + $0x18] sm:$0xff] %v2352_v50  ;;  %v2313_v61 = vadd.f32 %v2312_v57, %v569_v36  ;;  %v2356_v62 = vadd.f32 %v2355_v58, %v577_v37  ;;  %v3739_v35 = vld [vmem:[%s4044_s7 + $0x9a4] ss:$80 sps:$4 sm:$0xff]   ;;  %v3742_v36 = vld [vmem:[%s4044_s7 + $0x9ac] ss:$80 sps:$4 sm:$0xff]   ;;  %v581_v43 = vrot.slane %v4384_v30, %v580_v39 }
 0x172   : > { %2722 = vst [vmem:[%s4406_s11 + $0xa0] sm:$0xff] %v2311_v55  ;;  %2724 = vst [vmem:[%s4406_s11 + $0xb0] sm:$0xff] %v2354_v56  ;;  %v3737_v37 = vld [vmem:[%s4044_s7 + $0x9a0] ss:$80 sps:$4 sm:$0xff]   ;;  %v584_v41 = vsub.s32 5, %v4366_v21  ;;  %v589_v44 = vrot.slane %v4384_v30, %v588_v40  ;;  %v593_v46 = vrot.slane %v4384_v30, %v592_v42 }
 0x173   : > { %2723 = vst [vmem:[%s4406_s11 + $0xa8] sm:$0xff] %v2313_v61  ;;  %2725 = vst [vmem:[%s4406_s11 + $0xb8] sm:$0xff] %v2356_v62  ;;  %2629 = vmatpush1.bf16.msra.mxu0 %v3683_v53  ;;  %2672 = vmatpush1.bf16.msra.mxu1 %v3686_v54  ;;  %v557_v61 = vld [vmem:[%s4052_s20 + $0x8] sm:$0xff] }
 0x174   : > { %2630 = vmatprep.subr.bf16.mxu0 %v3691_v59  ;;  %2673 = vmatprep.subr.bf16.mxu1 %v3694_v60  ;;  %v585_v45 = vrot.slane %v4384_v30, %v584_v41  ;;  %v597_v62 = vrot.slane %v557_v61, %v4373_v25 }
 0x177   : > { %2631 = vmatpush1.bf16.msra.mxu0 %v3689_v63  ;;  %2674 = vmatpush1.bf16.msra.mxu1 %v3692_v0  ;;  %v605_v63 = vrot.slane %v557_v61, %v4376_v26  ;;  %v601_v0 = vrot.slane %v557_v61, %v4379_v27 }
 0x178   : > { %2632 = vmatprep.subr.bf16.mxu0 %v3697_v1  ;;  %2675 = vmatprep.subr.bf16.mxu1 %v3700_v2  ;;  %v609_v1 = vrot.slane %v557_v61, %v4387_v31 }
 0x17b   : > { %2633 = vmatpush1.bf16.msra.mxu0 %v3695_v4  ;;  %2676 = vmatpush1.bf16.msra.mxu1 %v3698_v5 }
 0x17c   : > { %2634 = vmatprep.subr.bf16.mxu0 %v3703_v6  ;;  %2677 = vmatprep.subr.bf16.mxu1 %v3706_v7 }
 0x17f   : > { %2635 = vmatpush1.bf16.msra.mxu0 %v3701_v8  ;;  %2678 = vmatpush1.bf16.msra.mxu1 %v3704_v9 }
 0x180   : > { %2636 = vmatprep.subr.bf16.mxu0 %v3709_v10  ;;  %2679 = vmatprep.subr.bf16.mxu1 %v3712_v11 }
 0x183   : > { %2637 = vmatpush1.bf16.msra.mxu0 %v3707_v13  ;;  %2680 = vmatpush1.bf16.msra.mxu1 %v3710_v14 }
 0x184   : > { %2638 = vmatprep.subr.bf16.mxu0 %v3715_v3  ;;  %2681 = vmatprep.subr.bf16.mxu1 %v3718_v16 }
 0x187   : > { %2639 = vmatpush1.bf16.msra.mxu0 %v3713_v17  ;;  %2682 = vmatpush1.bf16.msra.mxu1 %v3716_v18 }
 0x188   : > { %2640 = vmatprep.subr.bf16.mxu0 %v3721_v19  ;;  %2683 = vmatprep.subr.bf16.mxu1 %v3724_v48  ;;  %v613_v48 = vrot.slane %v557_v61, %v580_v39 }
 0x18b   : > { %2641 = vmatpush1.bf16.msra.mxu0 %v3719_v20  ;;  %2684 = vmatpush1.bf16.msra.mxu1 %v3722_v22  ;;  %v621_v20 = vrot.slane %v557_v61, %v588_v40  ;;  %v617_v22 = vrot.slane %v557_v61, %v584_v41 }
 0x18c   : > { %2642 = vmatprep.subr.bf16.mxu0 %v3727_v15  ;;  %2685 = vmatprep.subr.bf16.mxu1 %v3730_v23  ;;  %v625_v15 = vrot.slane %v557_v61, %v592_v42 }
 0x18f   : > { %2643 = vmatpush1.bf16.msra.mxu0 %v3725_v24  ;;  %2686 = vmatpush1.bf16.msra.mxu1 %v3728_v28 }
 0x190   : > { %2644 = vmatprep.subr.bf16.mxu0 %v3733_v29  ;;  %2687 = vmatprep.subr.bf16.mxu1 %v3736_v32 }
 0x193   : > { %2645 = vmatpush1.bf16.msra.mxu0 %v3731_v33  ;;  %2688 = vmatpush1.bf16.msra.mxu1 %v3734_v34 }
 0x194   : > { %2646 = vmatprep.subr.bf16.mxu0 %v3739_v35  ;;  %2689 = vmatprep.subr.bf16.mxu1 %v3742_v36 }
 0x197   : > { %2647 = vmatpush1.bf16.msra.mxu0 %v3737_v37  ;;  %2690 = vmatpush1.bf16.msra.mxu1 %v3740_v38 }
 0x19a   : > { %2649 = vmatmul.mubr.bf16.vlgmr.msra.gmra.mrb[16].mxu0 %v4352_v12  ;;  %2692 = vmatmul.mubr.bf16.vlgmr.msra.gmra.mrb[16].mxu1 %v4352_v12 }
 0x1ad   : > { %v2392_v47 = vpop.f32.mrb[4].mxu0  ;;  %v2435_v12 = vpop.f32.mrb[4].mxu1 }
 0x1ae   : > { %v2393_v49 = vadd.f32 %v2392_v47, %v581_v43  ;;  %v2436_v50 = vadd.f32 %v2435_v12, %v589_v44  ;;  %v2394_v51 = vpop.f32.mrb[5].mxu0  ;;  %v2437_v52 = vpop.f32.mrb[5].mxu1 }
 0x1af   : > { %v2395_v21 = vadd.f32 %v2394_v51, %v585_v45  ;;  %v2438_v53 = vadd.f32 %v2437_v52, %v593_v46  ;;  %v2396_v54 = vpop.f32.mrb[6].mxu0  ;;  %v2439_v55 = vpop.f32.mrb[6].mxu1 }
 0x1b0   : > { %2706 = vst [vmem:[%s4406_s11 + $0x20] sm:$0xff] %v2393_v49  ;;  %2708 = vst [vmem:[%s4406_s11 + $0x30] sm:$0xff] %v2436_v50  ;;  %v2397_v30 = vadd.f32 %v2396_v54, %v581_v43  ;;  %v2440_v56 = vadd.f32 %v2439_v55, %v589_v44  ;;  %v2398_v57 = vpop.f32.mrb[7].mxu0  ;;  %v2441_v58 = vpop.f32.mrb[7].mxu1  ;;  %v558_v44 = vld [vmem:[%s4052_s20 + $0x10] sm:$0xf] }
 0x1b1   : > { %2707 = vst [vmem:[%s4406_s11 + $0x28] sm:$0xff] %v2395_v21  ;;  %2709 = vst [vmem:[%s4406_s11 + $0x38] sm:$0xff] %v2438_v53  ;;  %v2399_v59 = vadd.f32 %v2398_v57, %v585_v45  ;;  %v2442_v60 = vadd.f32 %v2441_v58, %v593_v46  ;;  %v629_v45 = vrot.slane %v558_v44, %v4373_v25 }
 0x1b2   : > { %2726 = vst [vmem:[%s4406_s11 + $0xc0] sm:$0xff] %v2397_v30  ;;  %2728 = vst [vmem:[%s4406_s11 + $0xd0] sm:$0xff] %v2440_v56  ;;  %v637_v46 = vrot.slane %v558_v44, %v4376_v26  ;;  %v633_v47 = vrot.slane %v558_v44, %v4379_v27  ;;  %v641_v12 = vrot.slane %v558_v44, %v4387_v31 }
 0x1b3   : > { %2727 = vst [vmem:[%s4406_s11 + $0xc8] sm:$0xff] %v2399_v59  ;;  %2729 = vst [vmem:[%s4406_s11 + $0xd8] sm:$0xff] %v2442_v60 }
 0x1ed   : > { %v2478_v2 = vpop.f32.mrb[8].mxu0  ;;  %v2521_v4 = vpop.f32.mrb[8].mxu1 }
 0x1ee   : > { %v2479_v5 = vadd.f32 %v2478_v2, %v597_v62  ;;  %v2522_v6 = vadd.f32 %v2521_v4, %v605_v63  ;;  %v2480_v7 = vpop.f32.mrb[9].mxu0  ;;  %v2523_v8 = vpop.f32.mrb[9].mxu1 }
 0x1ef   : > { %v2481_v9 = vadd.f32 %v2480_v7, %v601_v0  ;;  %v2524_v10 = vadd.f32 %v2523_v8, %v609_v1  ;;  %v2482_v11 = vpop.f32.mrb[10].mxu0  ;;  %v2525_v13 = vpop.f32.mrb[10].mxu1 }
 0x1f0   : > { %2710 = vst [vmem:[%s4406_s11 + $0x40] sm:$0xff] %v2479_v5  ;;  %2712 = vst [vmem:[%s4406_s11 + $0x50] sm:$0xff] %v2522_v6  ;;  %v2483_v14 = vadd.f32 %v2482_v11, %v597_v62  ;;  %v2526_v3 = vadd.f32 %v2525_v13, %v605_v63  ;;  %v2484_v16 = vpop.f32.mrb[11].mxu0  ;;  %v2527_v17 = vpop.f32.mrb[11].mxu1 }
 0x1f1   : > { %2711 = vst [vmem:[%s4406_s11 + $0x48] sm:$0xff] %v2481_v9  ;;  %2713 = vst [vmem:[%s4406_s11 + $0x58] sm:$0xff] %v2524_v10  ;;  %v2485_v18 = vadd.f32 %v2484_v16, %v601_v0  ;;  %v2528_v19 = vadd.f32 %v2527_v17, %v609_v1 }
 0x1f2   : > { %2730 = vst [vmem:[%s4406_s11 + $0xe0] sm:$0xff] %v2483_v14  ;;  %2732 = vst [vmem:[%s4406_s11 + $0xf0] sm:$0xff] %v2526_v3 }
 0x1f3   : > { %2731 = vst [vmem:[%s4406_s11 + $0xe8] sm:$0xff] %v2485_v18  ;;  %2733 = vst [vmem:[%s4406_s11 + $0xf8] sm:$0xff] %v2528_v19 }
 0x22d   : > { %v2564_v23 = vpop.f32.mrb[12].mxu0  ;;  %v2607_v24 = vpop.f32.mrb[12].mxu1 }
 0x22e   : > { %v2565_v28 = vadd.f32 %v2564_v23, %v613_v48  ;;  %v2608_v29 = vadd.f32 %v2607_v24, %v621_v20  ;;  %v2566_v32 = vpop.f32.mrb[13].mxu0  ;;  %v2609_v33 = vpop.f32.mrb[13].mxu1 }
 0x22f   : > { %v2567_v34 = vadd.f32 %v2566_v32, %v617_v22  ;;  %v2610_v35 = vadd.f32 %v2609_v33, %v625_v15  ;;  %v2568_v36 = vpop.f32.mrb[14].mxu0  ;;  %v2611_v37 = vpop.f32.mrb[14].mxu1 }
 0x230   : > { %2714 = vst [vmem:[%s4406_s11 + $0x60] sm:$0xff] %v2565_v28  ;;  %2716 = vst [vmem:[%s4406_s11 + $0x70] sm:$0xff] %v2608_v29  ;;  %v2569_v38 = vadd.f32 %v2568_v36, %v613_v48  ;;  %v2612_v39 = vadd.f32 %v2611_v37, %v621_v20  ;;  %v2570_v40 = vpop.f32.mrb[15].mxu0  ;;  %v2613_v41 = vpop.f32.mrb[15].mxu1 }
 0x231   : > { %2715 = vst [vmem:[%s4406_s11 + $0x68] sm:$0xff] %v2567_v34  ;;  %2717 = vst [vmem:[%s4406_s11 + $0x78] sm:$0xff] %v2610_v35  ;;  %v2571_v42 = vadd.f32 %v2570_v40, %v617_v22  ;;  %v2614_v43 = vadd.f32 %v2613_v41, %v625_v15 }
 0x232   : > { %2734 = vst [vmem:[%s4406_s11 + $0x100] sm:$0xff] %v2569_v38  ;;  %2736 = vst [vmem:[%s4406_s11 + $0x110] sm:$0xff] %v2612_v39 }
 0x233   : > { %2735 = vst [vmem:[%s4406_s11 + $0x108] sm:$0xff] %v2571_v42  ;;  %2737 = vst [vmem:[%s4406_s11 + $0x118] sm:$0xff] %v2614_v43 }
 0x26d   : > { %v2650_v49 = vpop.f32.mrb[16].mxu0  ;;  %v2693_v50 = vpop.f32.mrb[16].mxu1  ;;  %2749 = sbr.rel (!%p4585_p12) target bundleno = 657 (0x291), region = 44 }
 0x26e   : > { %v2651_v51 = vadd.f32 %v2650_v49, %v629_v45  ;;  %v2694_v52 = vadd.f32 %v2693_v50, %v637_v46  ;;  %v2652_v21 = vpop.f32.mrb[17].mxu0  ;;  %v2695_v53 = vpop.f32.mrb[17].mxu1 }
 0x26f   : > { %v2653_v54 = vadd.f32 %v2652_v21, %v633_v47  ;;  %v2696_v55 = vadd.f32 %v2695_v53, %v641_v12  ;;  %v2654_v25 = vpop.f32.mrb[18].mxu0  ;;  %v2697_v26 = vpop.f32.mrb[18].mxu1 }
 0x270   : > { %2718 = vst [vmem:[%s4406_s11 + $0x80] sm:$0xff] %v2651_v51  ;;  %2720 = vst [vmem:[%s4406_s11 + $0x90] sm:$0xff] %v2694_v52  ;;  %v2655_v27 = vadd.f32 %v2654_v25, %v629_v45  ;;  %v2698_v31 = vadd.f32 %v2697_v26, %v637_v46  ;;  %v2656_v30 = vpop.f32.mrb[19].mxu0  ;;  %v2699_v56 = vpop.f32.mrb[19].mxu1 }
 0x271   : > { %2719 = vst [vmem:[%s4406_s11 + $0x88] sm:$0xff] %v2653_v54  ;;  %2721 = vst [vmem:[%s4406_s11 + $0x98] sm:$0xff] %v2696_v55  ;;  %v2657_v57 = vadd.f32 %v2656_v30, %v633_v47  ;;  %v2700_v58 = vadd.f32 %v2699_v56, %v641_v12 }
 0x272   : > { %2738 = vst [vmem:[%s4406_s11 + $0x120] sm:$0xff] %v2655_v27  ;;  %2740 = vst [vmem:[%s4406_s11 + $0x130] sm:$0xff] %v2698_v31 }
 0x273   : > { %2739 = vst [vmem:[%s4406_s11 + $0x128] sm:$0xff] %v2657_v57  ;;  %2741 = vst [vmem:[%s4406_s11 + $0x138] sm:$0xff] %v2700_v58 }
 0x274   : > { %s4592_s6 = smov (!%p2752_p1, %s2751_s6), 20 }
 0x275   : > { %s4511_s7 = sshll.u32 %s4592_s6, 8 }
 0x276   : > { %s2756_s4 = ssub.s32 5120, %s4511_s7 }
 0x277   : > { %2757 = vsyncadd %s2743_s17, %s2756_s4  ;;  %p3188_p11 = scmp.ne.s32.totalorder %s4511_s7, 0  ;;  %s3197_s23 = smul.u32 2560, %s3926_s16 }
 0x278   : > { %s3190_s10 = sshll.u32 %s4592_s6, 3  ;;  %s2763_s20 = sshll.u32 %s4406_s11, 4  ;;  %s4525_s20 = int_to_ptr.vmem [resolvable:$true] %s2763_s20 }
 0x279   : > { %s4523_s30 = scalar_lea.hbm %s4575_s3, %s3197_s23  ;;  %s3805_s28 = scalar_lea.vmem %s4525_s20, %s4511_s7 }
 0x27a   : > { %p3806_p4 = scmp.ne.s32.totalorder %s4525_s20, %s3805_s28  ;;  %s3882_s29 = smov [#allocation7]  }
 0x27b   : > { %s3809_s5 = sshll.u32 %s3882_s29, 4  ;;  %s3810_s5 = int_to_ptr.vmem [resolvable:$false] %s3809_s5 }
 0x27c   : > { %p3807_p5 = pnand %p3806_p4, %p3188_p11  ;;  %s3811_s16 = scalar_lea.vmem %s3810_s5, 10240 }
 0x27d   : > { %p3812_p13 = scmp.lt.s32.totalorder %s4525_s20, %s3810_s5  ;;  %p3813_p10 = scmp.lt.s32.totalorder %s3811_s16, %s3805_s28 }
 0x27e   : > { %p3808_p7 = pneg %p3807_p5 }
 0x27f   : > { %p3814_p3 = por %p3813_p10, %p3812_p13 }
 0x281   : > { %p3815_p8 = pnand %p3814_p3, %p3808_p7 }
 0x283   : > { %3818 = shalt.err (!%p3815_p8)
}
 0x284   : > { %s3819_s8 = scalar_lea.hbm %s4523_s30, %s4511_s7  ;;  %s3823_s11 = scalar_lea.hbm %s4575_s3, 20224 }
 0x285   : > { %p3820_p0 = scmp.ne.s32.totalorder %s4523_s30, %s3819_s8  ;;  %p3824_p6 = scmp.lt.u32.totalorder %s4523_s30, %s4575_s3 }
 0x286   : > { %p3825_p12 = scmp.lt.u32.totalorder %s3823_s11, %s3819_s8  ;;  %p3827_p4 = scmp.lt.u32.totalorder %s3819_s8, %s4523_s30 }
 0x287   : > { %p3821_p2 = pnand %p3820_p0, %p3188_p11 }
 0x288   : > { %p3826_p1 = por %p3825_p12, %p3824_p6 }
 0x289   : > { %p3822_p9 = pneg %p3821_p2 }
 0x28a   : > { %p3828_p5 = por %p3827_p4, %p3826_p1 }
 0x28c   : > { %p3829_p7 = pnand %p3828_p5, %p3822_p9 }
 0x28e   : > { %3832 = shalt.err (!%p3829_p7)
}
 0x28f   : > { %s3883_s23 = smov 2560   ;;  %s3884_s22 = smov 10112  }
 0x290   : > { %2769 = dma.vmem_to_hbm [thread:$0]  (%p3188_p11), %s4525_s20, %s4511_s7, %s4523_s30, %s2743_s17, %s3883_s23, %s3884_s22, %s3190_s10  }
 0x291 PF: > { %p3222_p13 = scmp.ge.s32.totalorder %s3875_s15, 2  ;;  %s2778_s27 = sand.u32 1, %s3863_s12  }
 0x292   : > { %p4586_p10 = scmp.ne.s32.totalorder %s4579_s24, 0  ;;  %s2779_s28 = scalar_lea.sflag [#allocation4], %s2778_s27 }
 0x294   : > { %p3218_p3 = pnand %p3222_p13, %p4586_p10 }
 0x296   : > { %3858 = dma.done.wait (!%p3218_p3), %s2779_s28, 5120  }
 0x297   : > { %3860 = vsyncadd (!%p3218_p3), %s2779_s28, 4294962176  ;;  %p19_p8 = scmp.ge.s32.totalorder %s3930_s18, 6   ;;  %s4587_s12 = smov %s3867_s13 }
 0x298   : > { %s4588_s13 = smov %s3871_s14  ;;  %s4589_s14 = smov %s3942_s21 }
 0x299   : > { %s4590_s15 = smov %s3930_s18  ;;  %21 = sbr.rel (!%p19_p8) target bundleno = 7 (0x7), region = 90 }
 0x2a0   :  { %2784 = vsyncpa [#allocation3], 1 }
 0x2a1   :  { %2786 = vsyncpa [#allocation3 + $0x1], 1 }
 0x2a2   :  { %2787 = vsyncpa [#allocation6], 1 }
 0x2a3   :  { %2789 = vsyncpa [#allocation6 + $0x1], 1 }
 0x2a4   :  { %2790 = vsyncpa [#allocation4], 1 }
 0x2a5   :  { %2792 = vsyncpa [#allocation4 + $0x1], 1 }

// kernel: decoder_forward.2
= control target key start
LH: loop header
LB: loop body
LE: loop exit
PB: predicated region body
PF: predicated region fallthrough
CT: control target
= control target key end

     0   :  { %11 = vsyncpa [#allocation8], 0  ;;  %s5233_s0 = inlined_call_operand.vmem [shape: bf16[64,128], index: 0, kind: input, shape index: {}]   ;;  %s5234_s1 = inlined_call_operand.hbm [shape: bf16[128,1024], index: 1, kind: input, shape index: {}]   ;;  %s5235_s2 = inlined_call_operand.hbm [shape: f32[1,1024], index: 2, kind: input, shape index: {}]   ;;  %s5236_s3 = inlined_call_operand.hbm [shape: bf16[256,1024], index: 3, kind: input, shape index: {}]   ;;  %s5237_s4 = inlined_call_operand.hbm [shape: bf16[512,1024], index: 4, kind: input, shape index: {}]   ;;  %s5238_s5 = inlined_call_operand.hbm [shape: f32[1,1024], index: 5, kind: input, shape index: {}]   ;;  %s5239_s6 = inlined_call_operand.vmem [shape: f32[64,256], index: 6, kind: output, shape index: {}]  }
   0x1   :  { %12 = vsyncpa [#allocation10], 0 }
   0x2   :  { %13 = vsyncpa [#allocation13], 0  ;;  %s4783_s21 = smov [#allocation9]   ;;  %s4595_s25 = scalar_lea.hbm %s5235_s2, 128 }
   0x3   :  { %s34_s22 = sshll.u32 %s4783_s21, 4  ;;  %p4596_p0 = scmp.ne.s32.totalorder %s5235_s2, %s4595_s25  ;;  %s35_s22 = int_to_ptr.vmem [resolvable:$true] %s34_s22 }
   0x4   :  { %p4599_p1 = scmp.lt.u32.totalorder %s4595_s25, %s5235_s2 }
   0x6   :  { %p4601_p2 = pnand %p4599_p1, %p4596_p0 }
   0x8   :  { %4604 = shalt.err (!%p4601_p2)
}
   0x9   :  { %s4605_s30 = scalar_lea.vmem %s35_s22, 128  ;;  %p4610_p4 = scmp.lt.s32.totalorder %s35_s22, %s35_s22 }
   0xa   :  { %p4606_p3 = scmp.ne.s32.totalorder %s35_s22, %s4605_s30  ;;  %p4611_p5 = scmp.lt.s32.totalorder %s4605_s30, %s4605_s30 }
   0xc   :  { %p4612_p6 = por %p4611_p5, %p4610_p4 }
   0xe   :  { %p4613_p7 = pnand %p4612_p6, %p4606_p3 }
  0x10   :  { %4616 = shalt.err (!%p4613_p7)
}
  0x11   :  { %37 = dma.hbm_to_vmem [thread:$0]  %s5235_s2, 128, %s35_s22, [#allocation10]  }
  0x12   :  { %s4784_s9 = smov [#allocation12]   ;;  %s4785_s11 = smov [#allocation7]  }
  0x13   :  { %s55_s10 = sshll.u32 %s4784_s9, 4  ;;  %s21_s12 = sshll.u32 %s4785_s11, 4  ;;  %s56_s10 = int_to_ptr.vmem [resolvable:$true] %s55_s10  ;;  %s22_s12 = int_to_ptr.vmem [resolvable:$true] %s21_s12 }
  0x14   :  { %s4617_s15 = scalar_lea.hbm %s5237_s4, 32768 }
  0x15   :  { %p4618_p8 = scmp.ne.s32.totalorder %s5237_s4, %s4617_s15  ;;  %p4621_p9 = scmp.lt.u32.totalorder %s4617_s15, %s5237_s4 }
  0x17   :  { %p4623_p10 = pnand %p4621_p9, %p4618_p8 }
  0x19   :  { %4626 = shalt.err (!%p4623_p10)
}
  0x1a   :  { %s4627_s2 = scalar_lea.vmem %s56_s10, 32768  ;;  %p4632_p12 = scmp.lt.s32.totalorder %s56_s10, %s56_s10 }
  0x1b   :  { %p4628_p11 = scmp.ne.s32.totalorder %s56_s10, %s4627_s2  ;;  %p4633_p13 = scmp.lt.s32.totalorder %s4627_s2, %s4627_s2 }
  0x1d   :  { %p4634_p0 = por %p4633_p13, %p4632_p12 }
  0x1f   :  { %p4635_p1 = pnand %p4634_p0, %p4628_p11 }
  0x21   :  { %4638 = shalt.err (!%p4635_p1)
}
  0x22   :  { %s4786_s20 = smov 512   ;;  %s4787_s21 = smov 32  }
  0x23   :  { %61 = dma.hbm_to_vmem [thread:$0]  %s5237_s4, 32768, %s56_s10, [#allocation13], %s4786_s20, %s4786_s20, %s4787_s21  }
  0x24   :  { %s4639_s26 = scalar_lea.hbm %s5234_s1, 8192 }
  0x25   :  { %p4640_p2 = scmp.ne.s32.totalorder %s5234_s1, %s4639_s26  ;;  %p4643_p3 = scmp.lt.u32.totalorder %s4639_s26, %s5234_s1 }
  0x27   :  { %p4645_p4 = pnand %p4643_p3, %p4640_p2 }
  0x29   :  { %4648 = shalt.err (!%p4645_p4)
}
  0x2a   :  { %s4649_s7 = scalar_lea.vmem %s22_s12, 8192  ;;  %p4654_p6 = scmp.lt.s32.totalorder %s22_s12, %s22_s12 }
  0x2b   :  { %p4650_p5 = scmp.ne.s32.totalorder %s22_s12, %s4649_s7  ;;  %p4655_p7 = scmp.lt.s32.totalorder %s4649_s7, %s4649_s7 }
  0x2d   :  { %p4656_p8 = por %p4655_p7, %p4654_p6 }
  0x2f   :  { %p4657_p9 = pnand %p4656_p8, %p4650_p5 }
  0x31   :  { %4660 = shalt.err (!%p4657_p9)
}
  0x32   :  { %27 = dma.hbm_to_vmem [thread:$0]  %s5234_s1, 8192, %s22_s12, [#allocation8], %s4786_s20, %s4786_s20, %s4787_s21  }
  0x33   :  { %s4788_s9 = smov [#allocation11]   ;;  %s4789_s11 = smov [#allocation14]  }
  0x34   :  { %s43_s10 = sshll.u32 %s4788_s9, 4  ;;  %s68_s13 = sshll.u32 %s4789_s11, 4  ;;  %s44_s10 = int_to_ptr.vmem [resolvable:$true] %s43_s10  ;;  %s69_s13 = int_to_ptr.vmem [resolvable:$true] %s68_s13 }
  0x35   :  { %s4661_s16 = scalar_lea.hbm %s5236_s3, 16384 }
  0x36   :  { %p4662_p10 = scmp.ne.s32.totalorder %s5236_s3, %s4661_s16  ;;  %p4665_p11 = scmp.lt.u32.totalorder %s4661_s16, %s5236_s3 }
  0x38   :  { %p4667_p12 = pnand %p4665_p11, %p4662_p10 }
  0x3a   :  { %4670 = shalt.err (!%p4667_p12)
}
  0x3b   :  { %s4671_s1 = scalar_lea.vmem %s44_s10, 16384  ;;  %p4676_p0 = scmp.lt.s32.totalorder %s44_s10, %s44_s10 }
  0x3c   :  { %p4672_p13 = scmp.ne.s32.totalorder %s44_s10, %s4671_s1  ;;  %p4677_p1 = scmp.lt.s32.totalorder %s4671_s1, %s4671_s1 }
  0x3e   :  { %p4678_p2 = por %p4677_p1, %p4676_p0 }
  0x40   :  { %p4679_p3 = pnand %p4678_p2, %p4672_p13 }
  0x42   :  { %4682 = shalt.err (!%p4679_p3)
}
  0x43   :  { %49 = dma.hbm_to_vmem [thread:$0]  %s5236_s3, 16384, %s44_s10, [#allocation10], %s4786_s20, %s4786_s20, %s4787_s21  }
  0x44   :  { %s4683_s25 = scalar_lea.hbm %s5238_s5, 128 }
  0x45   :  { %p4684_p4 = scmp.ne.s32.totalorder %s5238_s5, %s4683_s25  ;;  %p4687_p5 = scmp.lt.u32.totalorder %s4683_s25, %s5238_s5 }
  0x47   :  { %p4689_p6 = pnand %p4687_p5, %p4684_p4 }
  0x49   :  { %4692 = shalt.err (!%p4689_p6)
}
  0x4a   :  { %s4693_s30 = scalar_lea.vmem %s69_s13, 128  ;;  %p4698_p8 = scmp.lt.s32.totalorder %s69_s13, %s69_s13 }
  0x4b   :  { %p4694_p7 = scmp.ne.s32.totalorder %s69_s13, %s4693_s30  ;;  %p4699_p9 = scmp.lt.s32.totalorder %s4693_s30, %s4693_s30 }
  0x4d   :  { %p4700_p10 = por %p4699_p9, %p4698_p8 }
  0x4f   :  { %p4701_p11 = pnand %p4700_p10, %p4694_p7 }
  0x51   :  { %4704 = shalt.err (!%p4701_p11)
}
  0x52   :  { %71 = dma.hbm_to_vmem [thread:$0]  %s5238_s5, 128, %s69_s13, [#allocation13]  }
  0x53   :  { %4741 = dma.done.wait [#allocation8], 8192  }
  0x54   :  { %4742 = vsyncadd [#allocation8], 4294959104 }
  0x55   :  { %4743 = dma.done.wait [#allocation10], 16512  }
  0x56   :  { %4744 = vsyncadd [#allocation10], 4294950784 }
  0x57   :  { %4745 = dma.done.wait [#allocation13], 32896  }
  0x58   :  { %4746 = vsyncadd [#allocation13], 4294934400  ;;  %v4790_v0 = vmov 0   ;;  %v108_v1 = vld [vmem:[#allocation7] sm:$0xff]  ;;  %v109_v3 = vld [vmem:[#allocation7 + $0x8] sm:$0xff] }
  0x59   :  { %590 = vmatprep.mubr.bf16.mxu0 %v4790_v0  ;;  %663 = vmatprep.mubr.bf16.mxu1 %v4790_v0  ;;  %v112_v2 = vld [vmem:[#allocation7 + $0x20] sm:$0xff]  ;;  %v113_v5 = vld [vmem:[#allocation7 + $0x28] sm:$0xff]  ;;  %v110_v63 = vld [vmem:[#allocation7 + $0x10] sm:$0xff] }
  0x5a   :  { %v3956_v4 = vcombine.high %v108_v1, %v112_v2  ;;  %v3955_v6 = vcombine.low %v108_v1, %v112_v2  ;;  %v116_v7 = vld [vmem:[#allocation7 + $0x40] sm:$0xff]  ;;  %v3958_v9 = vcombine.high %v109_v3, %v113_v5  ;;  %v3957_v10 = vcombine.low %v109_v3, %v113_v5  ;;  %v117_v12 = vld [vmem:[#allocation7 + $0x48] sm:$0xff]  ;;  %v114_v1 = vld [vmem:[#allocation7 + $0x30] sm:$0xff] }
  0x5b   :  { %v120_v8 = vld [vmem:[#allocation7 + $0x60] sm:$0xff]  ;;  %v121_v13 = vld [vmem:[#allocation7 + $0x68] sm:$0xff]  ;;  %v111_v2 = vld [vmem:[#allocation7 + $0x18] sm:$0xff] }
  0x5c   :  { %v3964_v11 = vcombine.high %v116_v7, %v120_v8  ;;  %v124_v14 = vld [vmem:[#allocation7 + $0x80] sm:$0xff]  ;;  %558 = vmatprep.subr.bf16.mxu0 %v3956_v4  ;;  %v3966_v15 = vcombine.high %v117_v12, %v121_v13  ;;  %v125_v17 = vld [vmem:[#allocation7 + $0x88] sm:$0xff]  ;;  %631 = vmatprep.subr.bf16.mxu1 %v3958_v9  ;;  %v3963_v19 = vcombine.low %v116_v7, %v120_v8  ;;  %v115_v3 = vld [vmem:[#allocation7 + $0x38] sm:$0xff] }
  0x5d   :  { %v128_v16 = vld [vmem:[#allocation7 + $0xa0] sm:$0xff]  ;;  %v129_v18 = vld [vmem:[#allocation7 + $0xa8] sm:$0xff]  ;;  %559 = vmatpush1.bf16.msra.mxu0 %v3955_v6  ;;  %632 = vmatpush1.bf16.msra.mxu1 %v3957_v10  ;;  %v3965_v20 = vcombine.low %v117_v12, %v121_v13  ;;  %v3960_v6 = vcombine.high %v110_v63, %v114_v1  ;;  %v3962_v7 = vcombine.high %v111_v2, %v115_v3  ;;  %v118_v8 = vld [vmem:[#allocation7 + $0x50] sm:$0xff] }
  0x5e   :  { %560 = vmatprep.subr.bf16.mxu0 %v3964_v11  ;;  %v3972_v21 = vcombine.high %v124_v14, %v128_v16  ;;  %633 = vmatprep.subr.bf16.mxu1 %v3966_v15  ;;  %v3974_v22 = vcombine.high %v125_v17, %v129_v18  ;;  %v132_v23 = vld [vmem:[#allocation7 + $0xc0] sm:$0xff]  ;;  %v133_v25 = vld [vmem:[#allocation7 + $0xc8] sm:$0xff]  ;;  %v3971_v27 = vcombine.low %v124_v14, %v128_v16  ;;  %v122_v9 = vld [vmem:[#allocation7 + $0x70] sm:$0xff] }
  0x5f   :  { %v136_v24 = vld [vmem:[#allocation7 + $0xe0] sm:$0xff]  ;;  %v137_v26 = vld [vmem:[#allocation7 + $0xe8] sm:$0xff]  ;;  %v3973_v28 = vcombine.low %v125_v17, %v129_v18  ;;  %v119_v11 = vld [vmem:[#allocation7 + $0x58] sm:$0xff]  ;;  %v3959_v13 = vcombine.low %v110_v63, %v114_v1  ;;  %v3961_v14 = vcombine.low %v111_v2, %v115_v3  ;;  %v3968_v15 = vcombine.high %v118_v8, %v122_v9 }
  0x60   :  { %v3980_v29 = vcombine.high %v132_v23, %v136_v24  ;;  %v3982_v30 = vcombine.high %v133_v25, %v137_v26  ;;  %v140_v31 = vld [vmem:[#allocation7 + $0x100] sm:$0xff]  ;;  %v141_v33 = vld [vmem:[#allocation7 + $0x108] sm:$0xff]  ;;  %v3979_v35 = vcombine.low %v132_v23, %v136_v24  ;;  %v3981_v36 = vcombine.low %v133_v25, %v137_v26  ;;  %v123_v12 = vld [vmem:[#allocation7 + $0x78] sm:$0xff] }
  0x61   :  { %561 = vmatpush1.bf16.msra.mxu0 %v3963_v19  ;;  %634 = vmatpush1.bf16.msra.mxu1 %v3965_v20  ;;  %v144_v32 = vld [vmem:[#allocation7 + $0x120] sm:$0xff]  ;;  %v145_v34 = vld [vmem:[#allocation7 + $0x128] sm:$0xff]  ;;  %v3970_v16 = vcombine.high %v119_v11, %v123_v12  ;;  %v126_v17 = vld [vmem:[#allocation7 + $0x90] sm:$0xff] }
  0x62   :  { %562 = vmatprep.subr.bf16.mxu0 %v3972_v21  ;;  %635 = vmatprep.subr.bf16.mxu1 %v3974_v22  ;;  %v3988_v37 = vcombine.high %v140_v31, %v144_v32  ;;  %v148_v38 = vld [vmem:[#allocation7 + $0x140] sm:$0xff]  ;;  %v3990_v39 = vcombine.high %v141_v33, %v145_v34  ;;  %v149_v41 = vld [vmem:[#allocation7 + $0x148] sm:$0xff]  ;;  %v3987_v43 = vcombine.low %v140_v31, %v144_v32  ;;  %v130_v18 = vld [vmem:[#allocation7 + $0xb0] sm:$0xff] }
  0x63   :  { %v152_v40 = vld [vmem:[#allocation7 + $0x160] sm:$0xff]  ;;  %v153_v42 = vld [vmem:[#allocation7 + $0x168] sm:$0xff]  ;;  %v3989_v44 = vcombine.low %v141_v33, %v145_v34  ;;  %v127_v19 = vld [vmem:[#allocation7 + $0x98] sm:$0xff]  ;;  %v3967_v21 = vcombine.low %v118_v8, %v122_v9  ;;  %v3969_v22 = vcombine.low %v119_v11, %v123_v12  ;;  %v3976_v23 = vcombine.high %v126_v17, %v130_v18 }
  0x64   :  { %v3996_v45 = vcombine.high %v148_v38, %v152_v40  ;;  %v156_v46 = vld [vmem:[#allocation7 + $0x180] sm:$0xff]  ;;  %v3998_v47 = vcombine.high %v149_v41, %v153_v42  ;;  %v157_v49 = vld [vmem:[#allocation7 + $0x188] sm:$0xff]  ;;  %v3995_v51 = vcombine.low %v148_v38, %v152_v40  ;;  %v3997_v52 = vcombine.low %v149_v41, %v153_v42  ;;  %v131_v20 = vld [vmem:[#allocation7 + $0xb8] sm:$0xff] }
  0x65   :  { %563 = vmatpush1.bf16.msra.mxu0 %v3971_v27  ;;  %636 = vmatpush1.bf16.msra.mxu1 %v3973_v28  ;;  %v160_v48 = vld [vmem:[#allocation7 + $0x1a0] sm:$0xff]  ;;  %v161_v50 = vld [vmem:[#allocation7 + $0x1a8] sm:$0xff]  ;;  %v3978_v24 = vcombine.high %v127_v19, %v131_v20  ;;  %v134_v25 = vld [vmem:[#allocation7 + $0xd0] sm:$0xff]  ;;  %v3977_v31 = vcombine.low %v127_v19, %v131_v20 }
  0x66   :  { %564 = vmatprep.subr.bf16.mxu0 %v3980_v29  ;;  %637 = vmatprep.subr.bf16.mxu1 %v3982_v30  ;;  %v4004_v53 = vcombine.high %v156_v46, %v160_v48  ;;  %v4006_v54 = vcombine.high %v157_v49, %v161_v50  ;;  %v164_v55 = vld [vmem:[#allocation7 + $0x1c0] sm:$0xff]  ;;  %v165_v57 = vld [vmem:[#allocation7 + $0x1c8] sm:$0xff]  ;;  %v4003_v59 = vcombine.low %v156_v46, %v160_v48  ;;  %v138_v26 = vld [vmem:[#allocation7 + $0xf0] sm:$0xff] }
  0x67   :  { %v168_v56 = vld [vmem:[#allocation7 + $0x1e0] sm:$0xff]  ;;  %v169_v58 = vld [vmem:[#allocation7 + $0x1e8] sm:$0xff]  ;;  %v4005_v60 = vcombine.low %v157_v49, %v161_v50  ;;  %v135_v28 = vld [vmem:[#allocation7 + $0xd8] sm:$0xff]  ;;  %v3975_v30 = vcombine.low %v126_v17, %v130_v18  ;;  %v3984_v32 = vcombine.high %v134_v25, %v138_v26  ;;  %v3983_v38 = vcombine.low %v134_v25, %v138_v26 }
  0x68   :  { %v4012_v61 = vcombine.high %v164_v55, %v168_v56  ;;  %v4014_v62 = vcombine.high %v165_v57, %v169_v58  ;;  %v4011_v4 = vcombine.low %v164_v55, %v168_v56  ;;  %v4013_v5 = vcombine.low %v165_v57, %v169_v58  ;;  %v4900_v10 = vld [vmem:[%s5233_s0] sm:$0xff]   ;;  %v4909_v27 = vld [vmem:[%s5233_s0 + $0x8] sm:$0xff]   ;;  %v139_v29 = vld [vmem:[#allocation7 + $0xf8] sm:$0xff] }
  0x69   :  { %565 = vmatpush1.bf16.msra.mxu0 %v3979_v35  ;;  %638 = vmatpush1.bf16.msra.mxu1 %v3981_v36  ;;  %v3986_v33 = vcombine.high %v135_v28, %v139_v29  ;;  %v142_v34 = vld [vmem:[#allocation7 + $0x110] sm:$0xff]  ;;  %v143_v36 = vld [vmem:[#allocation7 + $0x118] sm:$0xff] }
  0x6a   :  { %566 = vmatprep.subr.bf16.mxu0 %v3988_v37  ;;  %639 = vmatprep.subr.bf16.mxu1 %v3990_v39  ;;  %v146_v35 = vld [vmem:[#allocation7 + $0x130] sm:$0xff]  ;;  %v147_v37 = vld [vmem:[#allocation7 + $0x138] sm:$0xff]  ;;  %v3985_v39 = vcombine.low %v135_v28, %v139_v29 }
  0x6b   :  { %v3992_v40 = vcombine.high %v142_v34, %v146_v35  ;;  %v3994_v41 = vcombine.high %v143_v36, %v147_v37  ;;  %v150_v42 = vld [vmem:[#allocation7 + $0x150] sm:$0xff]  ;;  %v155_v46 = vld [vmem:[#allocation7 + $0x178] sm:$0xff]  ;;  %v3993_v48 = vcombine.low %v143_v36, %v147_v37 }
  0x6c   :  { %v171_v63 = vld [vmem:[#allocation7 + $0x1f8] sm:$0xff] }
  0x6d   :  { %567 = vmatpush1.bf16.msra.mxu0 %v3987_v43  ;;  %640 = vmatpush1.bf16.msra.mxu1 %v3989_v44  ;;  %v154_v43 = vld [vmem:[#allocation7 + $0x170] sm:$0xff] }
  0x6e   :  { %568 = vmatprep.subr.bf16.mxu0 %v3996_v45  ;;  %641 = vmatprep.subr.bf16.mxu1 %v3998_v47  ;;  %v4529_v44 = vld [vmem:[%s5233_s0 + $0x10] sm:$0xff]   ;;  %v151_v45 = vld [vmem:[#allocation7 + $0x158] sm:$0xff]  ;;  %v3991_v47 = vcombine.low %v142_v34, %v146_v35  ;;  %v4000_v49 = vcombine.high %v150_v42, %v154_v43  ;;  %v3999_v55 = vcombine.low %v150_v42, %v154_v43 }
  0x6f   :  { %v4002_v50 = vcombine.high %v151_v45, %v155_v46  ;;  %v4001_v56 = vcombine.low %v151_v45, %v155_v46 }
  0x71   :  { %569 = vmatpush1.bf16.msra.mxu0 %v3995_v51  ;;  %642 = vmatpush1.bf16.msra.mxu1 %v3997_v52  ;;  %v158_v51 = vld [vmem:[#allocation7 + $0x190] sm:$0xff] }
  0x72   :  { %570 = vmatprep.subr.bf16.mxu0 %v4004_v53  ;;  %643 = vmatprep.subr.bf16.mxu1 %v4006_v54  ;;  %v162_v52 = vld [vmem:[#allocation7 + $0x1b0] sm:$0xff]  ;;  %v159_v53 = vld [vmem:[#allocation7 + $0x198] sm:$0xff] }
  0x73   :  { %v163_v54 = vld [vmem:[#allocation7 + $0x1b8] sm:$0xff]  ;;  %v4008_v57 = vcombine.high %v158_v51, %v162_v52  ;;  %v4007_v1 = vcombine.low %v158_v51, %v162_v52 }
  0x74   :  { %v4010_v58 = vcombine.high %v159_v53, %v163_v54  ;;  %v4009_v2 = vcombine.low %v159_v53, %v163_v54 }
  0x75   :  { %571 = vmatpush1.bf16.msra.mxu0 %v4003_v59  ;;  %644 = vmatpush1.bf16.msra.mxu1 %v4005_v60  ;;  %v166_v59 = vld [vmem:[#allocation7 + $0x1d0] sm:$0xff] }
  0x76   :  { %572 = vmatprep.subr.bf16.mxu0 %v4012_v61  ;;  %645 = vmatprep.subr.bf16.mxu1 %v4014_v62  ;;  %v170_v60 = vld [vmem:[#allocation7 + $0x1f0] sm:$0xff]  ;;  %v4530_v61 = vld [vmem:[%s5233_s0 + $0x18] sm:$0xff]   ;;  %s5067_s0 = smov 0  }
  0x77   :  { %v167_v62 = vld [vmem:[#allocation7 + $0x1d8] sm:$0xff]  ;;  %v4016_v3 = vcombine.high %v166_v59, %v170_v60 }
  0x79   :  { %573 = vmatpush1.bf16.msra.mxu0 %v4011_v4  ;;  %646 = vmatpush1.bf16.msra.mxu1 %v4013_v5  ;;  %v4018_v4 = vcombine.high %v167_v62, %v171_v63  ;;  %v4015_v5 = vcombine.low %v166_v59, %v170_v60 }
  0x7a   :  { %704 = vmatprep.subr.bf16.mxu0 %v3960_v6  ;;  %777 = vmatprep.subr.bf16.mxu1 %v3962_v7  ;;  %v4017_v6 = vcombine.low %v167_v62, %v171_v63  ;;  %v174_v7 = vlaneseq }
  0x7c   :  { %591 = vmatmul.mubr.bf16.vlgmr.msra.gmra.mrb[0].mxu0 %v4900_v10  ;;  %664 = vmatmul.mubr.bf16.vlgmr.msra.gmra.mrb[0].mxu1 %v4900_v10  ;;  %v4935_v8 = vshrl.u32 %v174_v7, 7 }
  0x7d   :  { %705 = vmatpush1.bf16.msra.mxu0 %v3959_v13  ;;  %778 = vmatpush1.bf16.msra.mxu1 %v3961_v14 }
  0x7e   :  { %706 = vmatprep.subr.bf16.mxu0 %v3968_v15  ;;  %779 = vmatprep.subr.bf16.mxu1 %v3970_v16  ;;  %v176_v9 = vsub.s32 0, %v4935_v8  ;;  %v184_v11 = vsub.s32 2, %v4935_v8  ;;  %v180_v12 = vsub.s32 1, %v4935_v8  ;;  %v188_v13 = vsub.s32 3, %v4935_v8 }
  0x7f   :  { %600 = vmatprep.mubr.bf16.mxu0 %v4790_v0  ;;  %673 = vmatprep.mubr.bf16.mxu1 %v4790_v0 }
  0x81   :  { %707 = vmatpush1.bf16.msra.mxu0 %v3967_v21  ;;  %780 = vmatpush1.bf16.msra.mxu1 %v3969_v22 }
  0x82   :  { %708 = vmatprep.subr.bf16.mxu0 %v3976_v23  ;;  %781 = vmatprep.subr.bf16.mxu1 %v3978_v24 }
  0x84   :  { %601 = vmatmul.mubr.bf16.gmra.mrb[4].mxu0 %v4909_v27  ;;  %674 = vmatmul.mubr.bf16.gmra.mrb[4].mxu1 %v4909_v27 }
  0x85   :  { %709 = vmatpush1.bf16.msra.mxu0 %v3975_v30  ;;  %782 = vmatpush1.bf16.msra.mxu1 %v3977_v31 }
  0x86   :  { %710 = vmatprep.subr.bf16.mxu0 %v3984_v32  ;;  %783 = vmatprep.subr.bf16.mxu1 %v3986_v33 }
  0x87   :  { %610 = vmatprep.mubr.bf16.mxu0 %v4790_v0  ;;  %683 = vmatprep.mubr.bf16.mxu1 %v4790_v0 }
  0x89   :  { %711 = vmatpush1.bf16.msra.mxu0 %v3983_v38  ;;  %784 = vmatpush1.bf16.msra.mxu1 %v3985_v39 }
  0x8a   :  { %712 = vmatprep.subr.bf16.mxu0 %v3992_v40  ;;  %785 = vmatprep.subr.bf16.mxu1 %v3994_v41 }
  0x8c   :  { %611 = vmatmul.mubr.bf16.gmra.mrb[8].mxu0 %v4529_v44  ;;  %684 = vmatmul.mubr.bf16.gmra.mrb[8].mxu1 %v4529_v44 }
  0x8d   :  { %713 = vmatpush1.bf16.msra.mxu0 %v3991_v47  ;;  %786 = vmatpush1.bf16.msra.mxu1 %v3993_v48 }
  0x8e   :  { %714 = vmatprep.subr.bf16.mxu0 %v4000_v49  ;;  %787 = vmatprep.subr.bf16.mxu1 %v4002_v50 }
  0x8f   :  { %620 = vmatprep.mubr.bf16.mxu0 %v4790_v0  ;;  %693 = vmatprep.mubr.bf16.mxu1 %v4790_v0 }
  0x91   :  { %715 = vmatpush1.bf16.msra.mxu0 %v3999_v55  ;;  %788 = vmatpush1.bf16.msra.mxu1 %v4001_v56 }
  0x92   :  { %716 = vmatprep.subr.bf16.mxu0 %v4008_v57  ;;  %789 = vmatprep.subr.bf16.mxu1 %v4010_v58 }
  0x94   :  { %621 = vmatmul.mubr.bf16.gmra.mrb[12].mxu0 %v4530_v61  ;;  %694 = vmatmul.mubr.bf16.gmra.mrb[12].mxu1 %v4530_v61 }
  0x95   :  { %717 = vmatpush1.bf16.msra.mxu0 %v4007_v1  ;;  %790 = vmatpush1.bf16.msra.mxu1 %v4009_v2 }
  0x96   :  { %718 = vmatprep.subr.bf16.mxu0 %v4016_v3  ;;  %791 = vmatprep.subr.bf16.mxu1 %v4018_v4 }
  0x97   :  { %736 = vmatprep.mubr.bf16.mxu0 %v4790_v0  ;;  %809 = vmatprep.mubr.bf16.mxu1 %v4790_v0 }
  0x99   :  { %719 = vmatpush1.bf16.msra.mxu0 %v4015_v5  ;;  %792 = vmatpush1.bf16.msra.mxu1 %v4017_v6  ;;  %v192_v6 = vsub.s32 4, %v4935_v8 }
  0x9c   :  { %737 = vmatmul.mubr.bf16.vlgmr.msra.gmra.mrb[16].mxu0 %v4900_v10  ;;  %810 = vmatmul.mubr.bf16.vlgmr.msra.gmra.mrb[16].mxu1 %v4900_v10  ;;  %v4938_v10 = vld [vmem:[#allocation9] sm:$0xff] }
  0x9d   :  { %746 = vmatprep.mubr.bf16.mxu0 %v4790_v0  ;;  %819 = vmatprep.mubr.bf16.mxu1 %v4790_v0  ;;  %v4946_v14 = vrot.slane %v4938_v10, %v176_v9  ;;  %v4956_v15 = vrot.slane %v4938_v10, %v180_v12  ;;  %v4961_v16 = vrot.slane %v4938_v10, %v188_v13 }
  0xa4   :  { %747 = vmatmul.mubr.bf16.gmra.mrb[20].mxu0 %v4909_v27  ;;  %820 = vmatmul.mubr.bf16.gmra.mrb[20].mxu1 %v4909_v27 }
  0xa5   :  { %756 = vmatprep.mubr.bf16.mxu0 %v4790_v0  ;;  %829 = vmatprep.mubr.bf16.mxu1 %v4790_v0 }
  0xac   :  { %757 = vmatmul.mubr.bf16.gmra.mrb[24].mxu0 %v4529_v44  ;;  %830 = vmatmul.mubr.bf16.gmra.mrb[24].mxu1 %v4529_v44 }
  0xad   :  { %766 = vmatprep.mubr.bf16.mxu0 %v4790_v0  ;;  %839 = vmatprep.mubr.bf16.mxu1 %v4790_v0  ;;  %v4951_v0 = vrot.slane %v4938_v10, %v184_v11 }
  0xb4   :  { %767 = vmatmul.mubr.bf16.gmra.mrb[28].mxu0 %v4530_v61  ;;  %840 = vmatmul.mubr.bf16.gmra.mrb[28].mxu1 %v4530_v61 }
 0x14f   :  { %v592_v17 = vpop.f32.mrb[0].mxu0  ;;  %v665_v19 = vpop.f32.mrb[0].mxu1 }
 0x150   :  { %v593_v18 = vadd.f32 %v592_v17, %v4946_v14  ;;  %v594_v20 = vpop.f32.mrb[1].mxu0  ;;  %v666_v21 = vadd.f32 %v665_v19, %v4951_v0  ;;  %v667_v23 = vpop.f32.mrb[1].mxu1 }
 0x151   :  { %v595_v22 = vadd.f32 %v594_v20, %v4956_v15  ;;  %v596_v24 = vpop.f32.mrb[2].mxu0  ;;  %v668_v25 = vadd.f32 %v667_v23, %v4961_v16  ;;  %v669_v27 = vpop.f32.mrb[2].mxu1  ;;  %v200_v20 = vsub.s32 6, %v4935_v8 }
 0x152   :  { %850 = vst [vmem:[#allocation2] sm:$0xff] %v593_v18  ;;  %v597_v26 = vadd.f32 %v596_v24, %v4946_v14  ;;  %v598_v28 = vpop.f32.mrb[3].mxu0  ;;  %852 = vst [vmem:[#allocation2 + $0x10] sm:$0xff] %v666_v21  ;;  %v670_v29 = vadd.f32 %v669_v27, %v4951_v0  ;;  %v671_v31 = vpop.f32.mrb[3].mxu1  ;;  %v196_v21 = vsub.s32 5, %v4935_v8 }
 0x153   :  { %851 = vst [vmem:[#allocation2 + $0x8] sm:$0xff] %v595_v22  ;;  %v599_v30 = vadd.f32 %v598_v28, %v4956_v15  ;;  %853 = vst [vmem:[#allocation2 + $0x18] sm:$0xff] %v668_v25  ;;  %v672_v32 = vadd.f32 %v671_v31, %v4961_v16  ;;  %v5002_v31 = vrot.slane %v4938_v10, %v192_v6 }
 0x154   :  { %858 = vst [vmem:[#allocation2 + $0x40] sm:$0xff] %v597_v26  ;;  %860 = vst [vmem:[#allocation2 + $0x50] sm:$0xff] %v670_v29  ;;  %v204_v26 = vsub.s32 7, %v4935_v8 }
 0x155   :  { %859 = vst [vmem:[#allocation2 + $0x48] sm:$0xff] %v599_v30  ;;  %861 = vst [vmem:[#allocation2 + $0x58] sm:$0xff] %v672_v32 }
 0x157   :  { %v602_v33 = vpop.f32.mrb[4].mxu0  ;;  %v675_v35 = vpop.f32.mrb[4].mxu1 }
 0x158   :  { %v603_v34 = vadd.f32 %v602_v33, %v4946_v14  ;;  %v604_v36 = vpop.f32.mrb[5].mxu0  ;;  %v676_v37 = vadd.f32 %v675_v35, %v4951_v0  ;;  %v677_v39 = vpop.f32.mrb[5].mxu1 }
 0x159   :  { %v605_v38 = vadd.f32 %v604_v36, %v4956_v15  ;;  %v606_v40 = vpop.f32.mrb[6].mxu0  ;;  %v678_v41 = vadd.f32 %v677_v39, %v4961_v16  ;;  %v679_v43 = vpop.f32.mrb[6].mxu1 }
 0x15a   :  { %866 = vst [vmem:[#allocation2 + $0x80] sm:$0xff] %v603_v34  ;;  %v607_v42 = vadd.f32 %v606_v40, %v4946_v14  ;;  %v608_v44 = vpop.f32.mrb[7].mxu0  ;;  %868 = vst [vmem:[#allocation2 + $0x90] sm:$0xff] %v676_v37  ;;  %v680_v45 = vadd.f32 %v679_v43, %v4951_v0  ;;  %v681_v47 = vpop.f32.mrb[7].mxu1 }
 0x15b   :  { %867 = vst [vmem:[#allocation2 + $0x88] sm:$0xff] %v605_v38  ;;  %v609_v46 = vadd.f32 %v608_v44, %v4956_v15  ;;  %869 = vst [vmem:[#allocation2 + $0x98] sm:$0xff] %v678_v41  ;;  %v682_v48 = vadd.f32 %v681_v47, %v4961_v16 }
 0x15c   :  { %874 = vst [vmem:[#allocation2 + $0xc0] sm:$0xff] %v607_v42  ;;  %876 = vst [vmem:[#allocation2 + $0xd0] sm:$0xff] %v680_v45 }
 0x15d   :  { %875 = vst [vmem:[#allocation2 + $0xc8] sm:$0xff] %v609_v46  ;;  %877 = vst [vmem:[#allocation2 + $0xd8] sm:$0xff] %v682_v48 }
 0x15f   :  { %v612_v49 = vpop.f32.mrb[8].mxu0  ;;  %v685_v51 = vpop.f32.mrb[8].mxu1 }
 0x160   :  { %v613_v50 = vadd.f32 %v612_v49, %v4946_v14  ;;  %v614_v52 = vpop.f32.mrb[9].mxu0  ;;  %v686_v53 = vadd.f32 %v685_v51, %v4951_v0  ;;  %v687_v55 = vpop.f32.mrb[9].mxu1 }
 0x161   :  { %v615_v54 = vadd.f32 %v614_v52, %v4956_v15  ;;  %v616_v56 = vpop.f32.mrb[10].mxu0  ;;  %v688_v57 = vadd.f32 %v687_v55, %v4961_v16  ;;  %v689_v59 = vpop.f32.mrb[10].mxu1 }
 0x162   :  { %882 = vst [vmem:[#allocation2 + $0x100] sm:$0xff] %v613_v50  ;;  %v617_v58 = vadd.f32 %v616_v56, %v4946_v14  ;;  %v618_v60 = vpop.f32.mrb[11].mxu0  ;;  %884 = vst [vmem:[#allocation2 + $0x110] sm:$0xff] %v686_v53  ;;  %v690_v61 = vadd.f32 %v689_v59, %v4951_v0  ;;  %v691_v63 = vpop.f32.mrb[11].mxu1 }
 0x163   :  { %883 = vst [vmem:[#allocation2 + $0x108] sm:$0xff] %v615_v54  ;;  %v619_v62 = vadd.f32 %v618_v60, %v4956_v15  ;;  %885 = vst [vmem:[#allocation2 + $0x118] sm:$0xff] %v688_v57  ;;  %v692_v1 = vadd.f32 %v691_v63, %v4961_v16 }
 0x164   :  { %890 = vst [vmem:[#allocation2 + $0x140] sm:$0xff] %v617_v58  ;;  %892 = vst [vmem:[#allocation2 + $0x150] sm:$0xff] %v690_v61 }
 0x165   :  { %891 = vst [vmem:[#allocation2 + $0x148] sm:$0xff] %v619_v62  ;;  %893 = vst [vmem:[#allocation2 + $0x158] sm:$0xff] %v692_v1 }
 0x167   :  { %v622_v2 = vpop.f32.mrb[12].mxu0  ;;  %v695_v4 = vpop.f32.mrb[12].mxu1 }
 0x168   :  { %v623_v3 = vadd.f32 %v622_v2, %v4946_v14  ;;  %v624_v5 = vpop.f32.mrb[13].mxu0  ;;  %v696_v7 = vadd.f32 %v695_v4, %v4951_v0  ;;  %v697_v18 = vpop.f32.mrb[13].mxu1 }
 0x169   :  { %v625_v17 = vadd.f32 %v624_v5, %v4956_v15  ;;  %v626_v19 = vpop.f32.mrb[14].mxu0  ;;  %v698_v22 = vadd.f32 %v697_v18, %v4961_v16  ;;  %v699_v24 = vpop.f32.mrb[14].mxu1 }
 0x16a   :  { %898 = vst [vmem:[#allocation2 + $0x180] sm:$0xff] %v623_v3  ;;  %v627_v23 = vadd.f32 %v626_v19, %v4946_v14  ;;  %v628_v25 = vpop.f32.mrb[15].mxu0  ;;  %900 = vst [vmem:[#allocation2 + $0x190] sm:$0xff] %v696_v7  ;;  %v700_v27 = vadd.f32 %v699_v24, %v4951_v0  ;;  %v701_v29 = vpop.f32.mrb[15].mxu1  ;;  %v5007_v14 = vrot.slane %v4938_v10, %v200_v20 }
 0x16b   :  { %899 = vst [vmem:[#allocation2 + $0x188] sm:$0xff] %v625_v17  ;;  %v629_v28 = vadd.f32 %v628_v25, %v4956_v15  ;;  %901 = vst [vmem:[#allocation2 + $0x198] sm:$0xff] %v698_v22  ;;  %v702_v30 = vadd.f32 %v701_v29, %v4961_v16  ;;  %v5012_v0 = vrot.slane %v4938_v10, %v196_v21 }
 0x16c   :  { %906 = vst [vmem:[#allocation2 + $0x1c0] sm:$0xff] %v627_v23  ;;  %908 = vst [vmem:[#allocation2 + $0x1d0] sm:$0xff] %v700_v27  ;;  %v5017_v15 = vrot.slane %v4938_v10, %v204_v26 }
 0x16d   :  { %907 = vst [vmem:[#allocation2 + $0x1c8] sm:$0xff] %v629_v28  ;;  %909 = vst [vmem:[#allocation2 + $0x1d8] sm:$0xff] %v702_v30 }
 0x16f   :  { %v738_v16 = vpop.f32.mrb[16].mxu0  ;;  %v811_v33 = vpop.f32.mrb[16].mxu1 }
 0x170   :  { %v739_v32 = vadd.f32 %v738_v16, %v5002_v31  ;;  %v740_v34 = vpop.f32.mrb[17].mxu0  ;;  %v812_v35 = vadd.f32 %v811_v33, %v5007_v14  ;;  %v813_v37 = vpop.f32.mrb[17].mxu1 }
 0x171   :  { %v741_v36 = vadd.f32 %v740_v34, %v5012_v0  ;;  %v742_v38 = vpop.f32.mrb[18].mxu0  ;;  %v814_v39 = vadd.f32 %v813_v37, %v5017_v15  ;;  %v815_v41 = vpop.f32.mrb[18].mxu1 }
 0x172   :  { %854 = vst [vmem:[#allocation2 + $0x20] sm:$0xff] %v739_v32  ;;  %v743_v40 = vadd.f32 %v742_v38, %v5002_v31  ;;  %v744_v42 = vpop.f32.mrb[19].mxu0  ;;  %856 = vst [vmem:[#allocation2 + $0x30] sm:$0xff] %v812_v35  ;;  %v816_v10 = vadd.f32 %v815_v41, %v5007_v14  ;;  %v817_v44 = vpop.f32.mrb[19].mxu1 }
 0x173   :  { %855 = vst [vmem:[#allocation2 + $0x28] sm:$0xff] %v741_v36  ;;  %v745_v43 = vadd.f32 %v744_v42, %v5012_v0  ;;  %857 = vst [vmem:[#allocation2 + $0x38] sm:$0xff] %v814_v39  ;;  %v818_v45 = vadd.f32 %v817_v44, %v5017_v15  ;;  %v5053_v44 = vmov 0.0  }
 0x174   :  { %862 = vst [vmem:[#allocation2 + $0x60] sm:$0xff] %v743_v40  ;;  %864 = vst [vmem:[#allocation2 + $0x70] sm:$0xff] %v816_v10 }
 0x175   :  { %863 = vst [vmem:[#allocation2 + $0x68] sm:$0xff] %v745_v43  ;;  %865 = vst [vmem:[#allocation2 + $0x78] sm:$0xff] %v818_v45  ;;  %v5051_v43 = vmov 0.0   ;;  %v5057_v45 = vmov 0.0  }
 0x177   :  { %v748_v46 = vpop.f32.mrb[20].mxu0  ;;  %v821_v48 = vpop.f32.mrb[20].mxu1 }
 0x178   :  { %v749_v47 = vadd.f32 %v748_v46, %v5002_v31  ;;  %v750_v49 = vpop.f32.mrb[21].mxu0  ;;  %v822_v50 = vadd.f32 %v821_v48, %v5007_v14  ;;  %v823_v52 = vpop.f32.mrb[21].mxu1  ;;  %v5059_v46 = vmov 0.0  }
 0x179   :  { %v751_v51 = vadd.f32 %v750_v49, %v5012_v0  ;;  %v752_v53 = vpop.f32.mrb[22].mxu0  ;;  %v824_v54 = vadd.f32 %v823_v52, %v5017_v15  ;;  %v825_v56 = vpop.f32.mrb[22].mxu1 }
 0x17a   :  { %870 = vst [vmem:[#allocation2 + $0xa0] sm:$0xff] %v749_v47  ;;  %v753_v55 = vadd.f32 %v752_v53, %v5002_v31  ;;  %v754_v57 = vpop.f32.mrb[23].mxu0  ;;  %872 = vst [vmem:[#allocation2 + $0xb0] sm:$0xff] %v822_v50  ;;  %v826_v58 = vadd.f32 %v825_v56, %v5007_v14  ;;  %v827_v60 = vpop.f32.mrb[23].mxu1  ;;  %v5065_v47 = vmov 0.0  }
 0x17b   :  { %871 = vst [vmem:[#allocation2 + $0xa8] sm:$0xff] %v751_v51  ;;  %v755_v59 = vadd.f32 %v754_v57, %v5012_v0  ;;  %873 = vst [vmem:[#allocation2 + $0xb8] sm:$0xff] %v824_v54  ;;  %v828_v61 = vadd.f32 %v827_v60, %v5017_v15 }
 0x17c   :  { %878 = vst [vmem:[#allocation2 + $0xe0] sm:$0xff] %v753_v55  ;;  %880 = vst [vmem:[#allocation2 + $0xf0] sm:$0xff] %v826_v58 }
 0x17d   :  { %879 = vst [vmem:[#allocation2 + $0xe8] sm:$0xff] %v755_v59  ;;  %881 = vst [vmem:[#allocation2 + $0xf8] sm:$0xff] %v828_v61 }
 0x17f   :  { %v758_v62 = vpop.f32.mrb[24].mxu0  ;;  %v831_v1 = vpop.f32.mrb[24].mxu1 }
 0x180   :  { %v759_v63 = vadd.f32 %v758_v62, %v5002_v31  ;;  %v760_v2 = vpop.f32.mrb[25].mxu0  ;;  %v832_v3 = vadd.f32 %v831_v1, %v5007_v14  ;;  %v833_v5 = vpop.f32.mrb[25].mxu1 }
 0x181   :  { %v761_v4 = vadd.f32 %v760_v2, %v5012_v0  ;;  %v762_v7 = vpop.f32.mrb[26].mxu0  ;;  %v834_v17 = vadd.f32 %v833_v5, %v5017_v15  ;;  %v835_v19 = vpop.f32.mrb[26].mxu1 }
 0x182   :  { %886 = vst [vmem:[#allocation2 + $0x120] sm:$0xff] %v759_v63  ;;  %v763_v18 = vadd.f32 %v762_v7, %v5002_v31  ;;  %v764_v22 = vpop.f32.mrb[27].mxu0  ;;  %888 = vst [vmem:[#allocation2 + $0x130] sm:$0xff] %v832_v3  ;;  %v836_v23 = vadd.f32 %v835_v19, %v5007_v14  ;;  %v837_v25 = vpop.f32.mrb[27].mxu1 }
 0x183   :  { %887 = vst [vmem:[#allocation2 + $0x128] sm:$0xff] %v761_v4  ;;  %v765_v24 = vadd.f32 %v764_v22, %v5012_v0  ;;  %889 = vst [vmem:[#allocation2 + $0x138] sm:$0xff] %v834_v17  ;;  %v838_v27 = vadd.f32 %v837_v25, %v5017_v15 }
 0x184   :  { %894 = vst [vmem:[#allocation2 + $0x160] sm:$0xff] %v763_v18  ;;  %896 = vst [vmem:[#allocation2 + $0x170] sm:$0xff] %v836_v23 }
 0x185   :  { %895 = vst [vmem:[#allocation2 + $0x168] sm:$0xff] %v765_v24  ;;  %897 = vst [vmem:[#allocation2 + $0x178] sm:$0xff] %v838_v27 }
 0x187   :  { %v768_v28 = vpop.f32.mrb[28].mxu0  ;;  %v841_v30 = vpop.f32.mrb[28].mxu1 }
 0x188   :  { %v769_v29 = vadd.f32 %v768_v28, %v5002_v31  ;;  %v770_v16 = vpop.f32.mrb[29].mxu0  ;;  %v842_v32 = vadd.f32 %v841_v30, %v5007_v14  ;;  %v843_v34 = vpop.f32.mrb[29].mxu1 }
 0x189   :  { %v771_v33 = vadd.f32 %v770_v16, %v5012_v0  ;;  %v772_v35 = vpop.f32.mrb[30].mxu0  ;;  %v844_v36 = vadd.f32 %v843_v34, %v5017_v15  ;;  %v845_v38 = vpop.f32.mrb[30].mxu1 }
 0x18a   :  { %902 = vst [vmem:[#allocation2 + $0x1a0] sm:$0xff] %v769_v29  ;;  %v773_v37 = vadd.f32 %v772_v35, %v5002_v31  ;;  %v774_v39 = vpop.f32.mrb[31].mxu0  ;;  %904 = vst [vmem:[#allocation2 + $0x1b0] sm:$0xff] %v842_v32  ;;  %v846_v40 = vadd.f32 %v845_v38, %v5007_v14  ;;  %v847_v42 = vpop.f32.mrb[31].mxu1  ;;  %v5055_v31 = vmov 0.0   ;;  %v5061_v14 = vmov 0.0  }
 0x18b   :  { %903 = vst [vmem:[#allocation2 + $0x1a8] sm:$0xff] %v771_v33  ;;  %v775_v41 = vadd.f32 %v774_v39, %v5012_v0  ;;  %905 = vst [vmem:[#allocation2 + $0x1b8] sm:$0xff] %v844_v36  ;;  %v848_v10 = vadd.f32 %v847_v42, %v5017_v15  ;;  %v5063_v0 = vmov 0.0  }
 0x18c   :  { %910 = vst [vmem:[#allocation2 + $0x1e0] sm:$0xff] %v773_v37  ;;  %912 = vst [vmem:[#allocation2 + $0x1f0] sm:$0xff] %v846_v40 }
 0x18d   :  { %911 = vst [vmem:[#allocation2 + $0x1e8] sm:$0xff] %v775_v41  ;;  %913 = vst [vmem:[#allocation2 + $0x1f8] sm:$0xff] %v848_v10 }
 0x18e LB: > { %v952_v15 = vld [vmem:[#allocation11] sm:$0xff]  ;;  %v953_v49 = vld [vmem:[#allocation11 + $0x8] sm:$0xff]  ;;  %v5094_v2 = vpack.c.bf16 %v4773_v0, %v4773_v0  ;;  %s4019_s13 = sshll.u32 %s4781_s0, 3  ;;  %s927_s0 = sadd.s32 1, %s4781_s0   ;;  %s4781_s0 = sphi %s5067_s0, %s927_s0   ;;  %v4777_v47 = vphi %v5065_v47, %v5240_v47   ;;  %v4773_v0 = vphi %v5063_v0, %v5148_v0   ;;  %v4769_v14 = vphi %v5061_v14, %v5140_v14   ;;  %v4765_v46 = vphi %v5059_v46, %v5142_v46   ;;  %v4761_v45 = vphi %v5057_v45, %v3896_v45   ;;  %v4757_v31 = vphi %v5055_v31, %v3897_v31   ;;  %v4753_v44 = vphi %v5053_v44, %v3892_v44   ;;  %v4749_v43 = vphi %v5051_v43, %v3893_v43  }
 0x18f   : > { %v956_v48 = vld [vmem:[#allocation11 + $0x20] sm:$0xff]  ;;  %v957_v51 = vld [vmem:[#allocation11 + $0x28] sm:$0xff]  ;;  %s5125_s14 = sshra.s32 %s4019_s13, 3  ;;  %p924_p12 = scmp.ge.s32.totalorder %s927_s0, 8  }
 0x190   : > { %v4023_v50 = vcombine.high %v952_v15, %v956_v48  ;;  %v4022_v52 = vcombine.low %v952_v15, %v956_v48  ;;  %v960_v53 = vld [vmem:[#allocation11 + $0x40] sm:$0xff]  ;;  %v4025_v55 = vcombine.high %v953_v49, %v957_v51  ;;  %v4024_v56 = vcombine.low %v953_v49, %v957_v51  ;;  %v961_v58 = vld [vmem:[#allocation11 + $0x48] sm:$0xff]  ;;  %1752 = vmatprep.mubr.bf16.mxu0 %v5094_v2  ;;  %s4420_s15 = sshll.u32 %s5125_s14, 6  ;;  %s4421_s17 = sshll.u32 %s5125_s14, 4 }
 0x191   : > { %v964_v54 = vld [vmem:[#allocation11 + $0x60] sm:$0xff]  ;;  %v965_v59 = vld [vmem:[#allocation11 + $0x68] sm:$0xff]  ;;  %1793 = vmatprep.mubr.bf16.mxu1 %v5094_v2  ;;  %s5128_s16 = scalar_lea.vmem [#allocation2], %s4420_s15  ;;  %s3900_s2 = scalar_lea.vmem %s5239_s6, %s4421_s17 }
 0x192   : > { %v4031_v57 = vcombine.high %v960_v53, %v964_v54  ;;  %v968_v60 = vld [vmem:[#allocation11 + $0x80] sm:$0xff]  ;;  %1720 = vmatprep.subr.bf16.mxu0 %v4023_v50  ;;  %v4033_v61 = vcombine.high %v961_v58, %v965_v59  ;;  %v969_v63 = vld [vmem:[#allocation11 + $0x88] sm:$0xff]  ;;  %1761 = vmatprep.subr.bf16.mxu1 %v4025_v55  ;;  %v4030_v3 = vcombine.low %v960_v53, %v964_v54 }
 0x193   : > { %v972_v62 = vld [vmem:[#allocation11 + $0xa0] sm:$0xff]  ;;  %v973_v1 = vld [vmem:[#allocation11 + $0xa8] sm:$0xff]  ;;  %1721 = vmatpush1.bf16.msra.mxu0 %v4022_v52  ;;  %1762 = vmatpush1.bf16.msra.mxu1 %v4024_v56  ;;  %v4032_v4 = vcombine.low %v961_v58, %v965_v59 }
 0x194   : > { %1722 = vmatprep.subr.bf16.mxu0 %v4031_v57  ;;  %v4039_v5 = vcombine.high %v968_v60, %v972_v62  ;;  %1763 = vmatprep.subr.bf16.mxu1 %v4033_v61  ;;  %v4041_v7 = vcombine.high %v969_v63, %v973_v1  ;;  %v976_v17 = vld [vmem:[#allocation11 + $0xc0] sm:$0xff]  ;;  %v977_v19 = vld [vmem:[#allocation11 + $0xc8] sm:$0xff]  ;;  %v4038_v23 = vcombine.low %v968_v60, %v972_v62 }
 0x195   : > { %v980_v18 = vld [vmem:[#allocation11 + $0xe0] sm:$0xff]  ;;  %v981_v22 = vld [vmem:[#allocation11 + $0xe8] sm:$0xff]  ;;  %v4040_v24 = vcombine.low %v969_v63, %v973_v1 }
 0x196   : > { %v4047_v25 = vcombine.high %v976_v17, %v980_v18  ;;  %v4049_v27 = vcombine.high %v977_v19, %v981_v22  ;;  %v984_v28 = vld [vmem:[#allocation11 + $0x100] sm:$0xff]  ;;  %v985_v30 = vld [vmem:[#allocation11 + $0x108] sm:$0xff]  ;;  %v4046_v32 = vcombine.low %v976_v17, %v980_v18  ;;  %v4048_v33 = vcombine.low %v977_v19, %v981_v22 }
 0x197   : > { %1723 = vmatpush1.bf16.msra.mxu0 %v4030_v3  ;;  %1764 = vmatpush1.bf16.msra.mxu1 %v4032_v4  ;;  %v988_v29 = vld [vmem:[#allocation11 + $0x120] sm:$0xff]  ;;  %v989_v16 = vld [vmem:[#allocation11 + $0x128] sm:$0xff] }
 0x198   : > { %1724 = vmatprep.subr.bf16.mxu0 %v4039_v5  ;;  %1765 = vmatprep.subr.bf16.mxu1 %v4041_v7  ;;  %v4055_v34 = vcombine.high %v984_v28, %v988_v29  ;;  %v4057_v35 = vcombine.high %v985_v30, %v989_v16  ;;  %v992_v36 = vld [vmem:[#allocation11 + $0x140] sm:$0xff]  ;;  %v993_v38 = vld [vmem:[#allocation11 + $0x148] sm:$0xff]  ;;  %v4054_v40 = vcombine.low %v984_v28, %v988_v29 }
 0x199   : > { %v996_v37 = vld [vmem:[#allocation11 + $0x160] sm:$0xff]  ;;  %v997_v39 = vld [vmem:[#allocation11 + $0x168] sm:$0xff]  ;;  %v4056_v41 = vcombine.low %v985_v30, %v989_v16 }
 0x19a   : > { %v4063_v42 = vcombine.high %v992_v36, %v996_v37  ;;  %v4065_v10 = vcombine.high %v993_v38, %v997_v39  ;;  %v1000_v0 = vld [vmem:[#allocation11 + $0x180] sm:$0xff]  ;;  %v1001_v48 = vld [vmem:[#allocation11 + $0x188] sm:$0xff]  ;;  %v4062_v50 = vcombine.low %v992_v36, %v996_v37  ;;  %v4064_v51 = vcombine.low %v993_v38, %v997_v39 }
 0x19b   : > { %1725 = vmatpush1.bf16.msra.mxu0 %v4038_v23  ;;  %1766 = vmatpush1.bf16.msra.mxu1 %v4040_v24  ;;  %v1004_v15 = vld [vmem:[#allocation11 + $0x1a0] sm:$0xff]  ;;  %v1005_v49 = vld [vmem:[#allocation11 + $0x1a8] sm:$0xff] }
 0x19c   : > { %1726 = vmatprep.subr.bf16.mxu0 %v4047_v25  ;;  %1767 = vmatprep.subr.bf16.mxu1 %v4049_v27  ;;  %v4071_v52 = vcombine.high %v1000_v0, %v1004_v15  ;;  %v4073_v53 = vcombine.high %v1001_v48, %v1005_v49  ;;  %v1008_v54 = vld [vmem:[#allocation11 + $0x1c0] sm:$0xff]  ;;  %v1009_v56 = vld [vmem:[#allocation11 + $0x1c8] sm:$0xff]  ;;  %v4070_v58 = vcombine.low %v1000_v0, %v1004_v15 }
 0x19d   : > { %v1012_v55 = vld [vmem:[#allocation11 + $0x1e0] sm:$0xff]  ;;  %v1013_v57 = vld [vmem:[#allocation11 + $0x1e8] sm:$0xff]  ;;  %v4072_v59 = vcombine.low %v1001_v48, %v1005_v49 }
 0x19e   : > { %v4079_v60 = vcombine.high %v1008_v54, %v1012_v55  ;;  %v4081_v61 = vcombine.high %v1009_v56, %v1013_v57  ;;  %v1016_v62 = vld [vmem:[#allocation11 + $0x200] sm:$0xff]  ;;  %v1017_v1 = vld [vmem:[#allocation11 + $0x208] sm:$0xff]  ;;  %v4078_v4 = vcombine.low %v1008_v54, %v1012_v55  ;;  %v4080_v5 = vcombine.low %v1009_v56, %v1013_v57 }
 0x19f   : > { %1727 = vmatpush1.bf16.msra.mxu0 %v4046_v32  ;;  %1768 = vmatpush1.bf16.msra.mxu1 %v4048_v33  ;;  %v1020_v63 = vld [vmem:[#allocation11 + $0x220] sm:$0xff]  ;;  %v1021_v3 = vld [vmem:[#allocation11 + $0x228] sm:$0xff] }
 0x1a0   : > { %1728 = vmatprep.subr.bf16.mxu0 %v4055_v34  ;;  %1769 = vmatprep.subr.bf16.mxu1 %v4057_v35  ;;  %v4087_v7 = vcombine.high %v1016_v62, %v1020_v63  ;;  %v4089_v17 = vcombine.high %v1017_v1, %v1021_v3  ;;  %v1024_v18 = vld [vmem:[#allocation11 + $0x240] sm:$0xff]  ;;  %v1025_v22 = vld [vmem:[#allocation11 + $0x248] sm:$0xff]  ;;  %v4086_v24 = vcombine.low %v1016_v62, %v1020_v63 }
 0x1a1   : > { %v1028_v19 = vld [vmem:[#allocation11 + $0x260] sm:$0xff]  ;;  %v1029_v23 = vld [vmem:[#allocation11 + $0x268] sm:$0xff]  ;;  %v4088_v25 = vcombine.low %v1017_v1, %v1021_v3 }
 0x1a2   : > { %v4095_v27 = vcombine.high %v1024_v18, %v1028_v19  ;;  %v4097_v28 = vcombine.high %v1025_v22, %v1029_v23  ;;  %v1032_v29 = vld [vmem:[#allocation11 + $0x280] sm:$0xff]  ;;  %v1033_v16 = vld [vmem:[#allocation11 + $0x288] sm:$0xff]  ;;  %v4094_v33 = vcombine.low %v1024_v18, %v1028_v19  ;;  %v4096_v34 = vcombine.low %v1025_v22, %v1029_v23 }
 0x1a3   : > { %1729 = vmatpush1.bf16.msra.mxu0 %v4054_v40  ;;  %1770 = vmatpush1.bf16.msra.mxu1 %v4056_v41  ;;  %v1036_v30 = vld [vmem:[#allocation11 + $0x2a0] sm:$0xff]  ;;  %v1037_v32 = vld [vmem:[#allocation11 + $0x2a8] sm:$0xff] }
 0x1a4   : > { %1730 = vmatprep.subr.bf16.mxu0 %v4063_v42  ;;  %1771 = vmatprep.subr.bf16.mxu1 %v4065_v10  ;;  %v4103_v35 = vcombine.high %v1032_v29, %v1036_v30  ;;  %v4105_v36 = vcombine.high %v1033_v16, %v1037_v32  ;;  %v1040_v37 = vld [vmem:[#allocation11 + $0x2c0] sm:$0xff]  ;;  %v1041_v39 = vld [vmem:[#allocation11 + $0x2c8] sm:$0xff]  ;;  %v4102_v41 = vcombine.low %v1032_v29, %v1036_v30  ;;  %v954_v30 = vld [vmem:[#allocation11 + $0x10] sm:$0xff] }
 0x1a5   : > { %v1044_v38 = vld [vmem:[#allocation11 + $0x2e0] sm:$0xff]  ;;  %v1045_v40 = vld [vmem:[#allocation11 + $0x2e8] sm:$0xff]  ;;  %v4104_v42 = vcombine.low %v1033_v16, %v1037_v32  ;;  %v958_v16 = vld [vmem:[#allocation11 + $0x30] sm:$0xff] }
 0x1a6   : > { %v4111_v10 = vcombine.high %v1040_v37, %v1044_v38  ;;  %v4113_v0 = vcombine.high %v1041_v39, %v1045_v40  ;;  %v1048_v15 = vld [vmem:[#allocation11 + $0x300] sm:$0xff]  ;;  %v1049_v49 = vld [vmem:[#allocation11 + $0x308] sm:$0xff]  ;;  %v955_v32 = vld [vmem:[#allocation11 + $0x18] sm:$0xff] }
 0x1a7   : > { %1731 = vmatpush1.bf16.msra.mxu0 %v4062_v50  ;;  %1772 = vmatpush1.bf16.msra.mxu1 %v4064_v51  ;;  %v1052_v48 = vld [vmem:[#allocation11 + $0x320] sm:$0xff]  ;;  %v1053_v50 = vld [vmem:[#allocation11 + $0x328] sm:$0xff]  ;;  %v4110_v51 = vcombine.low %v1040_v37, %v1044_v38  ;;  %v962_v38 = vld [vmem:[#allocation11 + $0x50] sm:$0xff] }
 0x1a8   : > { %1732 = vmatprep.subr.bf16.mxu0 %v4071_v52  ;;  %1773 = vmatprep.subr.bf16.mxu1 %v4073_v53  ;;  %v4112_v52 = vcombine.low %v1041_v39, %v1045_v40  ;;  %v4119_v53 = vcombine.high %v1048_v15, %v1052_v48  ;;  %v4121_v54 = vcombine.high %v1049_v49, %v1053_v50  ;;  %v1056_v55 = vld [vmem:[#allocation11 + $0x340] sm:$0xff]  ;;  %v1057_v57 = vld [vmem:[#allocation11 + $0x348] sm:$0xff]  ;;  %v966_v39 = vld [vmem:[#allocation11 + $0x70] sm:$0xff] }
 0x1a9   : > { %v1060_v56 = vld [vmem:[#allocation11 + $0x360] sm:$0xff]  ;;  %v1065_v3 = vld [vmem:[#allocation11 + $0x388] sm:$0xff]  ;;  %v5100_v40 = vpack.c.bf16 %v4777_v47, %v4777_v47  ;;  %v4034_v47 = vcombine.low %v962_v38, %v966_v39 }
 0x1aa   : > { %v1064_v63 = vld [vmem:[#allocation11 + $0x380] sm:$0xff]  ;;  %v1073_v23 = vld [vmem:[#allocation11 + $0x3c8] sm:$0xff] }
 0x1ab   : > { %1733 = vmatpush1.bf16.msra.mxu0 %v4070_v58  ;;  %1774 = vmatpush1.bf16.msra.mxu1 %v4072_v59  ;;  %v1061_v58 = vld [vmem:[#allocation11 + $0x368] sm:$0xff]  ;;  %v4118_v59 = vcombine.low %v1048_v15, %v1052_v48  ;;  %v1068_v1 = vld [vmem:[#allocation11 + $0x3a0] sm:$0xff]  ;;  %v4035_v15 = vcombine.high %v962_v38, %v966_v39  ;;  %v1010_v38 = vld [vmem:[#allocation11 + $0x1d0] sm:$0xff] }
 0x1ac   : > { %1734 = vmatprep.subr.bf16.mxu0 %v4079_v60  ;;  %1775 = vmatprep.subr.bf16.mxu1 %v4081_v61  ;;  %v4120_v60 = vcombine.low %v1049_v49, %v1053_v50  ;;  %v4127_v61 = vcombine.high %v1056_v55, %v1060_v56  ;;  %v4129_v62 = vcombine.high %v1057_v57, %v1061_v58  ;;  %v1072_v19 = vld [vmem:[#allocation11 + $0x3c0] sm:$0xff]  ;;  %v970_v49 = vld [vmem:[#allocation11 + $0x90] sm:$0xff] }
 0x1ad   : > { %v1076_v22 = vld [vmem:[#allocation11 + $0x3e0] sm:$0xff]  ;;  %v974_v50 = vld [vmem:[#allocation11 + $0xb0] sm:$0xff] }
 0x1ae   : > { %v1014_v39 = vld [vmem:[#allocation11 + $0x1f0] sm:$0xff] }
 0x1af   : > { %1735 = vmatpush1.bf16.msra.mxu0 %v4078_v4  ;;  %1776 = vmatpush1.bf16.msra.mxu1 %v4080_v5  ;;  %v1069_v4 = vld [vmem:[#allocation11 + $0x3a8] sm:$0xff]  ;;  %v4126_v5 = vcombine.low %v1056_v55, %v1060_v56  ;;  %v978_v56 = vld [vmem:[#allocation11 + $0xd0] sm:$0xff] }
 0x1b0   : > { %1736 = vmatprep.subr.bf16.mxu0 %v4087_v7  ;;  %1777 = vmatprep.subr.bf16.mxu1 %v4089_v17  ;;  %v4128_v7 = vcombine.low %v1057_v57, %v1061_v58  ;;  %v4135_v17 = vcombine.high %v1064_v63, %v1068_v1  ;;  %v4137_v18 = vcombine.high %v1065_v3, %v1069_v4  ;;  %v982_v57 = vld [vmem:[#allocation11 + $0xf0] sm:$0xff]  ;;  %v979_v58 = vld [vmem:[#allocation11 + $0xd8] sm:$0xff] }
 0x1b3   : > { %1737 = vmatpush1.bf16.msra.mxu0 %v4086_v24  ;;  %1778 = vmatpush1.bf16.msra.mxu1 %v4088_v25  ;;  %v1077_v24 = vld [vmem:[#allocation11 + $0x3e8] sm:$0xff]  ;;  %v4134_v25 = vcombine.low %v1064_v63, %v1068_v1  ;;  %v986_v1 = vld [vmem:[#allocation11 + $0x110] sm:$0xff] }
 0x1b4   : > { %1738 = vmatprep.subr.bf16.mxu0 %v4095_v27  ;;  %1779 = vmatprep.subr.bf16.mxu1 %v4097_v28  ;;  %v4136_v27 = vcombine.low %v1065_v3, %v1069_v4  ;;  %v4143_v28 = vcombine.high %v1072_v19, %v1076_v22  ;;  %v4145_v29 = vcombine.high %v1073_v23, %v1077_v24  ;;  %v990_v3 = vld [vmem:[#allocation11 + $0x130] sm:$0xff]  ;;  %v987_v4 = vld [vmem:[#allocation11 + $0x118] sm:$0xff] }
 0x1b7   : > { %1739 = vmatpush1.bf16.msra.mxu0 %v4094_v33  ;;  %1780 = vmatpush1.bf16.msra.mxu1 %v4096_v34  ;;  %v959_v33 = vld [vmem:[#allocation11 + $0x38] sm:$0xff]  ;;  %v4142_v34 = vcombine.low %v1072_v19, %v1076_v22  ;;  %v994_v19 = vld [vmem:[#allocation11 + $0x150] sm:$0xff] }
 0x1b8   : > { %1740 = vmatprep.subr.bf16.mxu0 %v4103_v35  ;;  %1781 = vmatprep.subr.bf16.mxu1 %v4105_v36  ;;  %v4144_v35 = vcombine.low %v1073_v23, %v1077_v24  ;;  %v4027_v36 = vcombine.high %v954_v30, %v958_v16  ;;  %v4029_v37 = vcombine.high %v955_v32, %v959_v33  ;;  %v998_v22 = vld [vmem:[#allocation11 + $0x170] sm:$0xff]  ;;  %v995_v23 = vld [vmem:[#allocation11 + $0x158] sm:$0xff] }
 0x1b9   : > { %v999_v24 = vld [vmem:[#allocation11 + $0x178] sm:$0xff] }
 0x1bb   : > { %1741 = vmatpush1.bf16.msra.mxu0 %v4102_v41  ;;  %1782 = vmatpush1.bf16.msra.mxu1 %v4104_v42  ;;  %v963_v41 = vld [vmem:[#allocation11 + $0x58] sm:$0xff] }
 0x1bc   : > { %1742 = vmatprep.subr.bf16.mxu0 %v4111_v10  ;;  %1783 = vmatprep.subr.bf16.mxu1 %v4113_v0  ;;  %v967_v42 = vld [vmem:[#allocation11 + $0x78] sm:$0xff]  ;;  %v4026_v10 = vcombine.low %v954_v30, %v958_v16  ;;  %v4028_v0 = vcombine.low %v955_v32, %v959_v33  ;;  %v1002_v30 = vld [vmem:[#allocation11 + $0x190] sm:$0xff] }
 0x1bd   : > { %v4037_v48 = vcombine.high %v963_v41, %v967_v42  ;;  %v1006_v16 = vld [vmem:[#allocation11 + $0x1b0] sm:$0xff]  ;;  %v1003_v32 = vld [vmem:[#allocation11 + $0x198] sm:$0xff] }
 0x1be   : > { %v1007_v33 = vld [vmem:[#allocation11 + $0x1b8] sm:$0xff] }
 0x1bf   : > { %1743 = vmatpush1.bf16.msra.mxu0 %v4110_v51  ;;  %1784 = vmatpush1.bf16.msra.mxu1 %v4112_v52  ;;  %v971_v51 = vld [vmem:[#allocation11 + $0x98] sm:$0xff] }
 0x1c0   : > { %1744 = vmatprep.subr.bf16.mxu0 %v4119_v53  ;;  %1785 = vmatprep.subr.bf16.mxu1 %v4121_v54  ;;  %v975_v52 = vld [vmem:[#allocation11 + $0xb8] sm:$0xff]  ;;  %v4036_v53 = vcombine.low %v963_v41, %v967_v42  ;;  %v4043_v54 = vcombine.high %v970_v49, %v974_v50 }
 0x1c1   : > { %v4045_v55 = vcombine.high %v971_v51, %v975_v52  ;;  %v1011_v41 = vld [vmem:[#allocation11 + $0x1d8] sm:$0xff] }
 0x1c2   : > { %v1015_v42 = vld [vmem:[#allocation11 + $0x1f8] sm:$0xff] }
 0x1c3   : > { %1745 = vmatpush1.bf16.msra.mxu0 %v4118_v59  ;;  %1786 = vmatpush1.bf16.msra.mxu1 %v4120_v60  ;;  %v983_v59 = vld [vmem:[#allocation11 + $0xf8] sm:$0xff]  ;;  %v4042_v60 = vcombine.low %v970_v49, %v974_v50  ;;  %v1018_v49 = vld [vmem:[#allocation11 + $0x210] sm:$0xff] }
 0x1c4   : > { %1746 = vmatprep.subr.bf16.mxu0 %v4127_v61  ;;  %1787 = vmatprep.subr.bf16.mxu1 %v4129_v62  ;;  %v4044_v61 = vcombine.low %v971_v51, %v975_v52  ;;  %v4051_v62 = vcombine.high %v978_v56, %v982_v57  ;;  %v4053_v63 = vcombine.high %v979_v58, %v983_v59  ;;  %v1022_v50 = vld [vmem:[#allocation11 + $0x230] sm:$0xff]  ;;  %v1019_v51 = vld [vmem:[#allocation11 + $0x218] sm:$0xff] }
 0x1c5   : > { %v1023_v52 = vld [vmem:[#allocation11 + $0x238] sm:$0xff] }
 0x1c7   : > { %1747 = vmatpush1.bf16.msra.mxu0 %v4126_v5  ;;  %1788 = vmatpush1.bf16.msra.mxu1 %v4128_v7  ;;  %v991_v5 = vld [vmem:[#allocation11 + $0x138] sm:$0xff]  ;;  %v4050_v7 = vcombine.low %v978_v56, %v982_v57  ;;  %v1026_v56 = vld [vmem:[#allocation11 + $0x250] sm:$0xff] }
 0x1c8   : > { %1748 = vmatprep.subr.bf16.mxu0 %v4135_v17  ;;  %1789 = vmatprep.subr.bf16.mxu1 %v4137_v18  ;;  %v4052_v17 = vcombine.low %v979_v58, %v983_v59  ;;  %v4059_v18 = vcombine.high %v986_v1, %v990_v3  ;;  %v1030_v57 = vld [vmem:[#allocation11 + $0x270] sm:$0xff]  ;;  %v1027_v58 = vld [vmem:[#allocation11 + $0x258] sm:$0xff] }
 0x1c9   : > { %v1031_v59 = vld [vmem:[#allocation11 + $0x278] sm:$0xff] }
 0x1cb   : > { %1749 = vmatpush1.bf16.msra.mxu0 %v4134_v25  ;;  %1790 = vmatpush1.bf16.msra.mxu1 %v4136_v27  ;;  %v4058_v25 = vcombine.low %v986_v1, %v990_v3  ;;  %v4060_v27 = vcombine.low %v987_v4, %v991_v5  ;;  %v1034_v1 = vld [vmem:[#allocation11 + $0x290] sm:$0xff] }
 0x1cc   : > { %1750 = vmatprep.subr.bf16.mxu0 %v4143_v28  ;;  %1791 = vmatprep.subr.bf16.mxu1 %v4145_v29  ;;  %v4067_v28 = vcombine.high %v994_v19, %v998_v22  ;;  %v4069_v29 = vcombine.high %v995_v23, %v999_v24  ;;  %v1038_v3 = vld [vmem:[#allocation11 + $0x2b0] sm:$0xff] }
 0x1cf   : > { %1751 = vmatpush1.bf16.msra.mxu0 %v4142_v34  ;;  %1792 = vmatpush1.bf16.msra.mxu1 %v4144_v35  ;;  %v4066_v34 = vcombine.low %v994_v19, %v998_v22  ;;  %v4068_v35 = vcombine.low %v995_v23, %v999_v24  ;;  %v1042_v19 = vld [vmem:[#allocation11 + $0x2d0] sm:$0xff]  ;;  %v1043_v23 = vld [vmem:[#allocation11 + $0x2d8] sm:$0xff] }
 0x1d0   : > { %1802 = vmatprep.subr.bf16.mxu0 %v4027_v36  ;;  %1843 = vmatprep.subr.bf16.mxu1 %v4029_v37  ;;  %v4075_v36 = vcombine.high %v1002_v30, %v1006_v16  ;;  %v4077_v37 = vcombine.high %v1003_v32, %v1007_v33  ;;  %v1046_v22 = vld [vmem:[#allocation11 + $0x2f0] sm:$0xff]  ;;  %v1047_v24 = vld [vmem:[#allocation11 + $0x2f8] sm:$0xff] }
 0x1d2   : > { %1753 = vmatmul.mubr.bf16.vlgmr.msra.gmra.mrb[0].mxu0 %v5100_v40  ;;  %1794 = vmatmul.mubr.bf16.vlgmr.msra.gmra.mrb[0].mxu1 %v5100_v40 }
 0x1d3   : > { %1803 = vmatpush1.bf16.msra.mxu0 %v4026_v10  ;;  %1844 = vmatpush1.bf16.msra.mxu1 %v4028_v0  ;;  %v4074_v10 = vcombine.low %v1002_v30, %v1006_v16  ;;  %v4076_v0 = vcombine.low %v1003_v32, %v1007_v33  ;;  %v1050_v30 = vld [vmem:[#allocation11 + $0x310] sm:$0xff]  ;;  %v1051_v32 = vld [vmem:[#allocation11 + $0x318] sm:$0xff] }
 0x1d4   : > { %1804 = vmatprep.subr.bf16.mxu0 %v4035_v15  ;;  %1845 = vmatprep.subr.bf16.mxu1 %v4037_v48  ;;  %v4083_v15 = vcombine.high %v1010_v38, %v1014_v39  ;;  %v4085_v48 = vcombine.high %v1011_v41, %v1015_v42  ;;  %v1054_v16 = vld [vmem:[#allocation11 + $0x330] sm:$0xff]  ;;  %v1055_v33 = vld [vmem:[#allocation11 + $0x338] sm:$0xff] }
 0x1d5   : > { %1834 = vmatprep.mubr.bf16.mxu0 %v5094_v2  ;;  %1875 = vmatprep.mubr.bf16.mxu1 %v5094_v2  ;;  %v4061_v2 = vcombine.high %v987_v4, %v991_v5  ;;  %v1035_v4 = vld [vmem:[#allocation11 + $0x298] sm:$0xff] }
 0x1d6   : > { %v1039_v5 = vld [vmem:[#allocation11 + $0x2b8] sm:$0xff] }
 0x1d7   : > { %1805 = vmatpush1.bf16.msra.mxu0 %v4034_v47  ;;  %1846 = vmatpush1.bf16.msra.mxu1 %v4036_v53  ;;  %v4082_v47 = vcombine.low %v1010_v38, %v1014_v39  ;;  %v4084_v53 = vcombine.low %v1011_v41, %v1015_v42  ;;  %v1058_v38 = vld [vmem:[#allocation11 + $0x350] sm:$0xff]  ;;  %v1059_v41 = vld [vmem:[#allocation11 + $0x358] sm:$0xff] }
 0x1d8   : > { %1806 = vmatprep.subr.bf16.mxu0 %v4043_v54  ;;  %1847 = vmatprep.subr.bf16.mxu1 %v4045_v55  ;;  %v4091_v54 = vcombine.high %v1018_v49, %v1022_v50  ;;  %v4093_v55 = vcombine.high %v1019_v51, %v1023_v52  ;;  %v1062_v39 = vld [vmem:[#allocation11 + $0x370] sm:$0xff]  ;;  %v1063_v42 = vld [vmem:[#allocation11 + $0x378] sm:$0xff] }
 0x1db   : > { %1807 = vmatpush1.bf16.msra.mxu0 %v4042_v60  ;;  %1848 = vmatpush1.bf16.msra.mxu1 %v4044_v61  ;;  %v4090_v60 = vcombine.low %v1018_v49, %v1022_v50  ;;  %v4092_v61 = vcombine.low %v1019_v51, %v1023_v52  ;;  %v1066_v49 = vld [vmem:[#allocation11 + $0x390] sm:$0xff]  ;;  %v1067_v51 = vld [vmem:[#allocation11 + $0x398] sm:$0xff] }
 0x1dc   : > { %1808 = vmatprep.subr.bf16.mxu0 %v4051_v62  ;;  %1849 = vmatprep.subr.bf16.mxu1 %v4053_v63  ;;  %v4099_v62 = vcombine.high %v1026_v56, %v1030_v57  ;;  %v4101_v63 = vcombine.high %v1027_v58, %v1031_v59  ;;  %v1070_v50 = vld [vmem:[#allocation11 + $0x3b0] sm:$0xff]  ;;  %v1071_v52 = vld [vmem:[#allocation11 + $0x3b8] sm:$0xff] }
 0x1df   : > { %1809 = vmatpush1.bf16.msra.mxu0 %v4050_v7  ;;  %1850 = vmatpush1.bf16.msra.mxu1 %v4052_v17  ;;  %v4098_v7 = vcombine.low %v1026_v56, %v1030_v57  ;;  %v4100_v17 = vcombine.low %v1027_v58, %v1031_v59  ;;  %v1074_v56 = vld [vmem:[#allocation11 + $0x3d0] sm:$0xff]  ;;  %v1075_v58 = vld [vmem:[#allocation11 + $0x3d8] sm:$0xff] }
 0x1e0   : > { %1810 = vmatprep.subr.bf16.mxu0 %v4059_v18  ;;  %1851 = vmatprep.subr.bf16.mxu1 %v4061_v2  ;;  %v4107_v18 = vcombine.high %v1034_v1, %v1038_v3  ;;  %v4109_v2 = vcombine.high %v1035_v4, %v1039_v5  ;;  %v1078_v57 = vld [vmem:[#allocation11 + $0x3f0] sm:$0xff]  ;;  %v1079_v59 = vld [vmem:[#allocation11 + $0x3f8] sm:$0xff] }
 0x1e3   : > { %1811 = vmatpush1.bf16.msra.mxu0 %v4058_v25  ;;  %1852 = vmatpush1.bf16.msra.mxu1 %v4060_v27  ;;  %v4106_v25 = vcombine.low %v1034_v1, %v1038_v3  ;;  %v4108_v27 = vcombine.low %v1035_v4, %v1039_v5  ;;  %v4146_v1 = vcombine.low %v1074_v56, %v1078_v57  ;;  %v1944_v4 = vld [vmem:[#allocation12] sm:$0xff] }
 0x1e4   : > { %1812 = vmatprep.subr.bf16.mxu0 %v4067_v28  ;;  %1853 = vmatprep.subr.bf16.mxu1 %v4069_v29  ;;  %v4115_v28 = vcombine.high %v1042_v19, %v1046_v22  ;;  %v4117_v29 = vcombine.high %v1043_v23, %v1047_v24  ;;  %v4148_v3 = vcombine.low %v1075_v58, %v1079_v59  ;;  %v1948_v5 = vld [vmem:[#allocation12 + $0x20] sm:$0xff] }
 0x1e7   : > { %1813 = vmatpush1.bf16.msra.mxu0 %v4066_v34  ;;  %1854 = vmatpush1.bf16.msra.mxu1 %v4068_v35  ;;  %v4114_v34 = vcombine.low %v1042_v19, %v1046_v22  ;;  %v4116_v35 = vcombine.low %v1043_v23, %v1047_v24  ;;  %v1952_v19 = vld [vmem:[#allocation12 + $0x40] sm:$0xff] }
 0x1e8   : > { %1814 = vmatprep.subr.bf16.mxu0 %v4075_v36  ;;  %1855 = vmatprep.subr.bf16.mxu1 %v4077_v37  ;;  %v4123_v36 = vcombine.high %v1050_v30, %v1054_v16  ;;  %v4125_v37 = vcombine.high %v1051_v32, %v1055_v33  ;;  %v1956_v22 = vld [vmem:[#allocation12 + $0x60] sm:$0xff] }
 0x1eb   : > { %1815 = vmatpush1.bf16.msra.mxu0 %v4074_v10  ;;  %1856 = vmatpush1.bf16.msra.mxu1 %v4076_v0  ;;  %v4122_v10 = vcombine.low %v1050_v30, %v1054_v16  ;;  %v4124_v0 = vcombine.low %v1051_v32, %v1055_v33  ;;  %v1964_v16 = vld [vmem:[#allocation12 + $0xa0] sm:$0xff]  ;;  %v1961_v32 = vld [vmem:[#allocation12 + $0x88] sm:$0xff] }
 0x1ec   : > { %1816 = vmatprep.subr.bf16.mxu0 %v4083_v15  ;;  %1857 = vmatprep.subr.bf16.mxu1 %v4085_v48  ;;  %v4131_v15 = vcombine.high %v1058_v38, %v1062_v39  ;;  %v4133_v48 = vcombine.high %v1059_v41, %v1063_v42  ;;  %v1965_v33 = vld [vmem:[#allocation12 + $0xa8] sm:$0xff] }
 0x1ef   : > { %1817 = vmatpush1.bf16.msra.mxu0 %v4082_v47  ;;  %1858 = vmatpush1.bf16.msra.mxu1 %v4084_v53  ;;  %v4130_v47 = vcombine.low %v1058_v38, %v1062_v39  ;;  %v4132_v53 = vcombine.low %v1059_v41, %v1063_v42  ;;  %v1972_v38 = vld [vmem:[#allocation12 + $0xe0] sm:$0xff]  ;;  %v1969_v39 = vld [vmem:[#allocation12 + $0xc8] sm:$0xff] }
 0x1f0   : > { %1818 = vmatprep.subr.bf16.mxu0 %v4091_v54  ;;  %1859 = vmatprep.subr.bf16.mxu1 %v4093_v55  ;;  %v4139_v54 = vcombine.high %v1066_v49, %v1070_v50  ;;  %v4141_v55 = vcombine.high %v1067_v51, %v1071_v52  ;;  %v1973_v41 = vld [vmem:[#allocation12 + $0xe8] sm:$0xff] }
 0x1f3   : > { %1819 = vmatpush1.bf16.msra.mxu0 %v4090_v60  ;;  %1860 = vmatpush1.bf16.msra.mxu1 %v4092_v61  ;;  %v4138_v60 = vcombine.low %v1066_v49, %v1070_v50  ;;  %v4140_v61 = vcombine.low %v1067_v51, %v1071_v52  ;;  %v1980_v49 = vld [vmem:[#allocation12 + $0x120] sm:$0xff]  ;;  %v1977_v50 = vld [vmem:[#allocation12 + $0x108] sm:$0xff] }
 0x1f4   : > { %1820 = vmatprep.subr.bf16.mxu0 %v4099_v62  ;;  %1861 = vmatprep.subr.bf16.mxu1 %v4101_v63  ;;  %v4147_v62 = vcombine.high %v1074_v56, %v1078_v57  ;;  %v4149_v63 = vcombine.high %v1075_v58, %v1079_v59  ;;  %v1981_v51 = vld [vmem:[#allocation12 + $0x128] sm:$0xff]  ;;  %v1988_v56 = vld [vmem:[#allocation12 + $0x160] sm:$0xff] }
 0x1f5   : > { %v1985_v57 = vld [vmem:[#allocation12 + $0x148] sm:$0xff] }
 0x1f6   : > { %v1989_v58 = vld [vmem:[#allocation12 + $0x168] sm:$0xff] }
 0x1f7   : > { %1821 = vmatpush1.bf16.msra.mxu0 %v4098_v7  ;;  %1862 = vmatpush1.bf16.msra.mxu1 %v4100_v17  ;;  %v1945_v7 = vld [vmem:[#allocation12 + $0x8] sm:$0xff]  ;;  %v4156_v17 = vcombine.low %v1944_v4, %v1948_v5 }
 0x1f8   : > { %1822 = vmatprep.subr.bf16.mxu0 %v4107_v18  ;;  %1863 = vmatprep.subr.bf16.mxu1 %v4109_v2  ;;  %v4157_v18 = vcombine.high %v1944_v4, %v1948_v5  ;;  %v1949_v2 = vld [vmem:[#allocation12 + $0x28] sm:$0xff] }
 0x1f9   : > { %v4158_v23 = vcombine.low %v1945_v7, %v1949_v2  ;;  %v4159_v24 = vcombine.high %v1945_v7, %v1949_v2  ;;  %v1997_v4 = vld [vmem:[#allocation12 + $0x1a8] sm:$0xff]  ;;  %v4198_v7 = vcombine.low %v1985_v57, %v1989_v58  ;;  %v2000_v2 = vld [vmem:[#allocation12 + $0x1c0] sm:$0xff] }
 0x1fb   : > { %1823 = vmatpush1.bf16.msra.mxu0 %v4106_v25  ;;  %1864 = vmatpush1.bf16.msra.mxu1 %v4108_v27  ;;  %v4165_v25 = vcombine.high %v1952_v19, %v1956_v22  ;;  %v1953_v27 = vld [vmem:[#allocation12 + $0x48] sm:$0xff] }
 0x1fc   : > { %1824 = vmatprep.subr.bf16.mxu0 %v4115_v28  ;;  %1865 = vmatprep.subr.bf16.mxu1 %v4117_v29  ;;  %v1957_v28 = vld [vmem:[#allocation12 + $0x68] sm:$0xff]  ;;  %v1960_v29 = vld [vmem:[#allocation12 + $0x80] sm:$0xff] }
 0x1fd   : > { %v4167_v30 = vcombine.high %v1953_v27, %v1957_v28  ;;  %v4172_v42 = vcombine.low %v1960_v29, %v1964_v16 }
 0x1ff   : > { %1825 = vmatpush1.bf16.msra.mxu0 %v4114_v34  ;;  %1866 = vmatpush1.bf16.msra.mxu1 %v4116_v35  ;;  %v4166_v34 = vcombine.low %v1953_v27, %v1957_v28  ;;  %v4173_v35 = vcombine.high %v1960_v29, %v1964_v16  ;;  %v2008_v16 = vld [vmem:[#allocation12 + $0x200] sm:$0xff] }
 0x200   : > { %1826 = vmatprep.subr.bf16.mxu0 %v4123_v36  ;;  %1867 = vmatprep.subr.bf16.mxu1 %v4125_v37  ;;  %v4175_v36 = vcombine.high %v1961_v32, %v1965_v33  ;;  %v1968_v37 = vld [vmem:[#allocation12 + $0xc0] sm:$0xff] }
 0x201   : > { %v4180_v52 = vcombine.low %v1968_v37, %v1972_v38 }
 0x203   : > { %1827 = vmatpush1.bf16.msra.mxu0 %v4122_v10  ;;  %1868 = vmatpush1.bf16.msra.mxu1 %v4124_v0  ;;  %v4174_v10 = vcombine.low %v1961_v32, %v1965_v33  ;;  %v4181_v0 = vcombine.high %v1968_v37, %v1972_v38  ;;  %v2012_v32 = vld [vmem:[#allocation12 + $0x220] sm:$0xff]  ;;  %v2009_v33 = vld [vmem:[#allocation12 + $0x208] sm:$0xff] }
 0x204   : > { %1828 = vmatprep.subr.bf16.mxu0 %v4131_v15  ;;  %1869 = vmatprep.subr.bf16.mxu1 %v4133_v48  ;;  %v4183_v15 = vcombine.high %v1969_v39, %v1973_v41  ;;  %v1976_v48 = vld [vmem:[#allocation12 + $0x100] sm:$0xff] }
 0x205   : > { %v4188_v59 = vcombine.low %v1976_v48, %v1980_v49  ;;  %v2016_v38 = vld [vmem:[#allocation12 + $0x240] sm:$0xff] }
 0x207   : > { %1829 = vmatpush1.bf16.msra.mxu0 %v4130_v47  ;;  %1870 = vmatpush1.bf16.msra.mxu1 %v4132_v53  ;;  %v4182_v47 = vcombine.low %v1969_v39, %v1973_v41  ;;  %v4189_v53 = vcombine.high %v1976_v48, %v1980_v49  ;;  %v2020_v39 = vld [vmem:[#allocation12 + $0x260] sm:$0xff]  ;;  %v2017_v41 = vld [vmem:[#allocation12 + $0x248] sm:$0xff] }
 0x208   : > { %1830 = vmatprep.subr.bf16.mxu0 %v4139_v54  ;;  %1871 = vmatprep.subr.bf16.mxu1 %v4141_v55  ;;  %v4191_v54 = vcombine.high %v1977_v50, %v1981_v51  ;;  %v1984_v55 = vld [vmem:[#allocation12 + $0x140] sm:$0xff] }
 0x209   : > { %v4196_v5 = vcombine.low %v1984_v55, %v1988_v56  ;;  %v2024_v49 = vld [vmem:[#allocation12 + $0x280] sm:$0xff] }
 0x20b   : > { %1831 = vmatpush1.bf16.msra.mxu0 %v4138_v60  ;;  %1872 = vmatpush1.bf16.msra.mxu1 %v4140_v61  ;;  %v4190_v60 = vcombine.low %v1977_v50, %v1981_v51  ;;  %v4197_v61 = vcombine.high %v1984_v55, %v1988_v56  ;;  %v2028_v50 = vld [vmem:[#allocation12 + $0x2a0] sm:$0xff]  ;;  %v2025_v51 = vld [vmem:[#allocation12 + $0x288] sm:$0xff] }
 0x20c   : > { %1832 = vmatprep.subr.bf16.mxu0 %v4147_v62  ;;  %1873 = vmatprep.subr.bf16.mxu1 %v4149_v63  ;;  %v4199_v62 = vcombine.high %v1985_v57, %v1989_v58  ;;  %v1992_v63 = vld [vmem:[#allocation12 + $0x180] sm:$0xff]  ;;  %v2033_v58 = vld [vmem:[#allocation12 + $0x2c8] sm:$0xff] }
 0x20d   : > { %v2032_v56 = vld [vmem:[#allocation12 + $0x2c0] sm:$0xff] }
 0x20e   : > { %v2036_v57 = vld [vmem:[#allocation12 + $0x2e0] sm:$0xff] }
 0x20f   : > { %1833 = vmatpush1.bf16.msra.mxu0 %v4146_v1  ;;  %1874 = vmatpush1.bf16.msra.mxu1 %v4148_v3  ;;  %v1996_v1 = vld [vmem:[#allocation12 + $0x1a0] sm:$0xff]  ;;  %v1993_v3 = vld [vmem:[#allocation12 + $0x188] sm:$0xff] }
 0x210   : > { %3522 = vmatprep.subr.bf16.mxu0 %v4157_v18  ;;  %3604 = vmatprep.subr.bf16.mxu1 %v4159_v24  ;;  %v4207_v18 = vcombine.high %v1993_v3, %v1997_v4  ;;  %v4204_v24 = vcombine.low %v1992_v63, %v1996_v1 }
 0x212   : > { %1835 = vmatmul.mubr.bf16.vlgmr.msra.gmra.mrb[4].mxu0 %v5100_v40  ;;  %1876 = vmatmul.mubr.bf16.vlgmr.msra.gmra.mrb[4].mxu1 %v5100_v40  ;;  %v4164_v40 = vcombine.low %v1952_v19, %v1956_v22  ;;  %v2004_v19 = vld [vmem:[#allocation12 + $0x1e0] sm:$0xff]  ;;  %v2001_v22 = vld [vmem:[#allocation12 + $0x1c8] sm:$0xff] }
 0x213   : > { %3523 = vmatpush1.bf16.msra.mxu0 %v4156_v17  ;;  %3605 = vmatpush1.bf16.msra.mxu1 %v4158_v23  ;;  %v4205_v17 = vcombine.high %v1992_v63, %v1996_v1  ;;  %v2005_v23 = vld [vmem:[#allocation12 + $0x1e8] sm:$0xff]  ;;  %v4213_v27 = vcombine.high %v2000_v2, %v2004_v19  ;;  %v4212_v29 = vcombine.low %v2000_v2, %v2004_v19  ;;  %v2040_v1 = vld [vmem:[#allocation12 + $0x300] sm:$0xff] }
 0x214   : > { %3524 = vmatprep.subr.bf16.mxu0 %v4165_v25  ;;  %3606 = vmatprep.subr.bf16.mxu1 %v4167_v30  ;;  %v4206_v25 = vcombine.low %v1993_v3, %v1997_v4  ;;  %v4215_v28 = vcombine.high %v2001_v22, %v2005_v23  ;;  %v4214_v30 = vcombine.low %v2001_v22, %v2005_v23  ;;  %v2044_v3 = vld [vmem:[#allocation12 + $0x320] sm:$0xff]  ;;  %v2041_v4 = vld [vmem:[#allocation12 + $0x308] sm:$0xff] }
 0x215   : > { %v2048_v19 = vld [vmem:[#allocation12 + $0x340] sm:$0xff]  ;;  %v2049_v23 = vld [vmem:[#allocation12 + $0x348] sm:$0xff] }
 0x216   : > { %v2052_v22 = vld [vmem:[#allocation12 + $0x360] sm:$0xff] }
 0x217   : > { %3525 = vmatpush1.bf16.msra.mxu0 %v4164_v40  ;;  %3607 = vmatpush1.bf16.msra.mxu1 %v4166_v34  ;;  %v4221_v40 = vcombine.high %v2008_v16, %v2012_v32  ;;  %v2013_v34 = vld [vmem:[#allocation12 + $0x228] sm:$0xff] }
 0x218   : > { %3526 = vmatprep.subr.bf16.mxu0 %v4173_v35  ;;  %3608 = vmatprep.subr.bf16.mxu1 %v4175_v36  ;;  %v4220_v35 = vcombine.low %v2008_v16, %v2012_v32  ;;  %v4222_v36 = vcombine.low %v2009_v33, %v2013_v34  ;;  %v4223_v37 = vcombine.high %v2009_v33, %v2013_v34  ;;  %v2057_v33 = vld [vmem:[#allocation12 + $0x388] sm:$0xff]  ;;  %v2064_v34 = vld [vmem:[#allocation12 + $0x3c0] sm:$0xff] }
 0x21b   : > { %3527 = vmatpush1.bf16.msra.mxu0 %v4172_v42  ;;  %3609 = vmatpush1.bf16.msra.mxu1 %v4174_v10  ;;  %v4229_v42 = vcombine.high %v2016_v38, %v2020_v39  ;;  %v2021_v10 = vld [vmem:[#allocation12 + $0x268] sm:$0xff] }
 0x21c   : > { %3528 = vmatprep.subr.bf16.mxu0 %v4181_v0  ;;  %3610 = vmatprep.subr.bf16.mxu1 %v4183_v15  ;;  %v4228_v0 = vcombine.low %v2016_v38, %v2020_v39  ;;  %v4230_v15 = vcombine.low %v2017_v41, %v2021_v10  ;;  %v4231_v48 = vcombine.high %v2017_v41, %v2021_v10  ;;  %v2069_v38 = vld [vmem:[#allocation12 + $0x3e8] sm:$0xff] }
 0x21f   : > { %3529 = vmatpush1.bf16.msra.mxu0 %v4180_v52  ;;  %3611 = vmatpush1.bf16.msra.mxu1 %v4182_v47  ;;  %v4237_v52 = vcombine.high %v2024_v49, %v2028_v50  ;;  %v2029_v47 = vld [vmem:[#allocation12 + $0x2a8] sm:$0xff] }
 0x220   : > { %3530 = vmatprep.subr.bf16.mxu0 %v4189_v53  ;;  %3612 = vmatprep.subr.bf16.mxu1 %v4191_v54  ;;  %v4236_v53 = vcombine.low %v2024_v49, %v2028_v50  ;;  %v4238_v54 = vcombine.low %v2025_v51, %v2029_v47  ;;  %v4239_v55 = vcombine.high %v2025_v51, %v2029_v47  ;;  %v5110_v49 = vld [vmem:[#allocation12 + $0x420] sm:$0xff]  ;;  %v5112_v50 = vld [vmem:[#allocation12 + $0x408] sm:$0xff] }
 0x223   : > { %3531 = vmatpush1.bf16.msra.mxu0 %v4188_v59  ;;  %3613 = vmatpush1.bf16.msra.mxu1 %v4190_v60  ;;  %v4245_v59 = vcombine.high %v2032_v56, %v2036_v57  ;;  %v2037_v60 = vld [vmem:[#allocation12 + $0x2e8] sm:$0xff] }
 0x224   : > { %3532 = vmatprep.subr.bf16.mxu0 %v4197_v61  ;;  %3614 = vmatprep.subr.bf16.mxu1 %v4199_v62  ;;  %v4244_v61 = vcombine.low %v2032_v56, %v2036_v57  ;;  %v4246_v62 = vcombine.low %v2033_v58, %v2037_v60  ;;  %v4247_v63 = vcombine.high %v2033_v58, %v2037_v60 }
 0x227   : > { %3533 = vmatpush1.bf16.msra.mxu0 %v4196_v5  ;;  %3615 = vmatpush1.bf16.msra.mxu1 %v4198_v7  ;;  %v4253_v5 = vcombine.high %v2040_v1, %v2044_v3  ;;  %v2045_v7 = vld [vmem:[#allocation12 + $0x328] sm:$0xff] }
 0x228   : > { %3534 = vmatprep.subr.bf16.mxu0 %v4205_v17  ;;  %3616 = vmatprep.subr.bf16.mxu1 %v4207_v18  ;;  %v4252_v17 = vcombine.low %v2040_v1, %v2044_v3  ;;  %v4254_v18 = vcombine.low %v2041_v4, %v2045_v7  ;;  %v4255_v2 = vcombine.high %v2041_v4, %v2045_v7  ;;  %v944_v1 = vld [vmem:[%s5128_s16 + $0x10] sm:$0xff]  ;;  %v943_v3 = vld [vmem:[%s5128_s16 + $0x8] sm:$0xff] }
 0x22b   : > { %3535 = vmatpush1.bf16.msra.mxu0 %v4204_v24  ;;  %3617 = vmatpush1.bf16.msra.mxu1 %v4206_v25  ;;  %v4260_v24 = vcombine.low %v2048_v19, %v2052_v22  ;;  %v4261_v25 = vcombine.high %v2048_v19, %v2052_v22 }
 0x22c   : > { %3536 = vmatprep.subr.bf16.mxu0 %v4213_v27  ;;  %3618 = vmatprep.subr.bf16.mxu1 %v4215_v28  ;;  %v2053_v27 = vld [vmem:[#allocation12 + $0x368] sm:$0xff]  ;;  %v2056_v28 = vld [vmem:[#allocation12 + $0x380] sm:$0xff] }
 0x22d   : > { %v4263_v16 = vcombine.high %v2049_v23, %v2053_v27 }
 0x22f   : > { %3537 = vmatpush1.bf16.msra.mxu0 %v4212_v29  ;;  %3619 = vmatpush1.bf16.msra.mxu1 %v4214_v30  ;;  %v2060_v29 = vld [vmem:[#allocation12 + $0x3a0] sm:$0xff]  ;;  %v4262_v30 = vcombine.low %v2049_v23, %v2053_v27 }
 0x230   : > { %3538 = vmatprep.subr.bf16.mxu0 %v4221_v40  ;;  %3620 = vmatprep.subr.bf16.mxu1 %v4223_v37  ;;  %v4269_v32 = vcombine.high %v2056_v28, %v2060_v29  ;;  %v2061_v40 = vld [vmem:[#allocation12 + $0x3a8] sm:$0xff]  ;;  %v4268_v39 = vcombine.low %v2056_v28, %v2060_v29 }
 0x231   : > { %v2065_v37 = vld [vmem:[#allocation12 + $0x3c8] sm:$0xff]  ;;  %v4270_v41 = vcombine.low %v2057_v33, %v2061_v40 }
 0x232   : > { %v4279_v10 = vcombine.high %v2065_v37, %v2069_v38 }
 0x233   : > { %3539 = vmatpush1.bf16.msra.mxu0 %v4220_v35  ;;  %3621 = vmatpush1.bf16.msra.mxu1 %v4222_v36  ;;  %v4271_v35 = vcombine.high %v2057_v33, %v2061_v40  ;;  %v2068_v36 = vld [vmem:[#allocation12 + $0x3e0] sm:$0xff]  ;;  %v946_v33 = vld [vmem:[%s5128_s16 + $0x20] sm:$0xff]  ;;  %v948_v40 = vld [vmem:[%s5128_s16 + $0x30] sm:$0xff] }
 0x234   : > { %3540 = vmatprep.subr.bf16.mxu0 %v4229_v42  ;;  %3622 = vmatprep.subr.bf16.mxu1 %v4231_v48  ;;  %v4277_v42 = vcombine.high %v2064_v34, %v2068_v36  ;;  %v5108_v48 = vld [vmem:[#allocation12 + $0x400] sm:$0xff] }
 0x235   : > { %v4285_v51 = vcombine.high %v5108_v48, %v5110_v49  ;;  %v4284_v47 = vcombine.low %v5108_v48, %v5110_v49 }
 0x237   : > { %3541 = vmatpush1.bf16.msra.mxu0 %v4228_v0  ;;  %3623 = vmatpush1.bf16.msra.mxu1 %v4230_v15  ;;  %v4276_v0 = vcombine.low %v2064_v34, %v2068_v36  ;;  %v4278_v15 = vcombine.low %v2065_v37, %v2069_v38  ;;  %v947_v34 = vld [vmem:[%s5128_s16 + $0x28] sm:$0xff]  ;;  %v949_v36 = vld [vmem:[%s5128_s16 + $0x38] sm:$0xff] }
 0x238   : > { %3542 = vmatprep.subr.bf16.mxu0 %v4237_v52  ;;  %3624 = vmatprep.subr.bf16.mxu1 %v4239_v55  ;;  %v5116_v52 = vld [vmem:[#allocation12 + $0x428] sm:$0xff] }
 0x23b   : > { %3543 = vmatpush1.bf16.msra.mxu0 %v4236_v53  ;;  %3625 = vmatpush1.bf16.msra.mxu1 %v4238_v54  ;;  %v4286_v53 = vcombine.low %v5112_v50, %v5116_v52  ;;  %v4287_v54 = vcombine.high %v5112_v50, %v5116_v52 }
 0x23c   : > { %3544 = vmatprep.subr.bf16.mxu0 %v4245_v59  ;;  %3626 = vmatprep.subr.bf16.mxu1 %v4247_v63  ;;  %v942_v63 = vld [vmem:[%s5128_s16] sm:$0xff] }
 0x23f   : > { %3545 = vmatpush1.bf16.msra.mxu0 %v4244_v61  ;;  %3627 = vmatpush1.bf16.msra.mxu1 %v4246_v62 }
 0x240   : > { %3546 = vmatprep.subr.bf16.mxu0 %v4253_v5  ;;  %3628 = vmatprep.subr.bf16.mxu1 %v4255_v2  ;;  %v945_v5 = vld [vmem:[%s5128_s16 + $0x18] sm:$0xff] }
 0x243   : > { %3547 = vmatpush1.bf16.msra.mxu0 %v4252_v17  ;;  %3629 = vmatpush1.bf16.msra.mxu1 %v4254_v18 }
 0x244   : > { %3548 = vmatprep.subr.bf16.mxu0 %v4261_v25  ;;  %3630 = vmatprep.subr.bf16.mxu1 %v4263_v16 }
 0x247   : > { %3549 = vmatpush1.bf16.msra.mxu0 %v4260_v24  ;;  %3631 = vmatpush1.bf16.msra.mxu1 %v4262_v30 }
 0x248   : > { %3550 = vmatprep.subr.bf16.mxu0 %v4269_v32  ;;  %3632 = vmatprep.subr.bf16.mxu1 %v4271_v35 }
 0x24b   : > { %3551 = vmatpush1.bf16.msra.mxu0 %v4268_v39  ;;  %3633 = vmatpush1.bf16.msra.mxu1 %v4270_v41 }
 0x24c   : > { %3552 = vmatprep.subr.bf16.mxu0 %v4277_v42  ;;  %3634 = vmatprep.subr.bf16.mxu1 %v4279_v10 }
 0x24f   : > { %3553 = vmatpush1.bf16.msra.mxu0 %v4276_v0  ;;  %3635 = vmatpush1.bf16.msra.mxu1 %v4278_v15 }
 0x250   : > { %3563 = vmatprep.subr.bf16.mxu0 %v4285_v51  ;;  %3645 = vmatprep.subr.bf16.mxu1 %v4287_v54 }
 0x2a5   : > { %v1754_v55 = vpop.f32.mrb[0].mxu0  ;;  %v1795_v56 = vpop.f32.mrb[0].mxu1 }
 0x2a6   : > { %v1756_v57 = vpop.f32.mrb[1].mxu0  ;;  %v1797_v58 = vpop.f32.mrb[1].mxu1  ;;  %v1884_v4 = vadd.f32 %v1754_v55, %v942_v63  ;;  %v1886_v7 = vadd.f32 %v1795_v56, %v944_v1 }
 0x2a7   : > { %v1758_v59 = vpop.f32.mrb[2].mxu0  ;;  %v1799_v60 = vpop.f32.mrb[2].mxu1  ;;  %v1885_v17 = vadd.f32 %v1756_v57, %v943_v3  ;;  %v1887_v18 = vadd.f32 %v1797_v58, %v945_v5 }
 0x2a8   : > { %v1759_v61 = vpop.f32.mrb[3].mxu0  ;;  %v1800_v62 = vpop.f32.mrb[3].mxu1  ;;  %v4150_v2 = vmul.f32 -1.442695, %v1884_v4  ;;  %v4152_v19 = vmul.f32 -1.442695, %v1886_v7 }
 0x2a9   : > { %v4151_v22 = vmul.f32 -1.442695, %v1885_v17  ;;  %v4153_v23 = vmul.f32 -1.442695, %v1887_v18 }
 0x2aa   : > { %4531 = vpow2.f32 %v4150_v2 }
 0x2ab   : > { %4533 = vpow2.f32 %v4152_v19 }
 0x2ac   : > { %4535 = vpow2.f32 %v4151_v22 }
 0x2ad   : > { %4537 = vpow2.f32 %v4153_v23 }
 0x2b4   : > { %v4532_v24 = vpop.eup %4531 }
 0x2b5   : > { %v4534_v25 = vpop.eup %4533  ;;  %v1898_v29 = vadd.f32 1.0, %v4532_v24 }
 0x2b6   : > { %v4536_v27 = vpop.eup %4535  ;;  %v1910_v30 = vadd.f32 1.0, %v4534_v25 }
 0x2b7   : > { %v4538_v28 = vpop.eup %4537  ;;  %v1899_v16 = vadd.f32 1.0, %v4536_v27  ;;  %4539 = vrcp.f32 %v1898_v29  ;;  %v2080_v27 = vld [vmem:[#allocation12 + $0x440] sm:$0xff]  ;;  %v2081_v29 = vld [vmem:[#allocation12 + $0x448] sm:$0xff] }
 0x2b8   : > { %v1911_v32 = vadd.f32 1.0, %v4538_v28  ;;  %4541 = vrcp.f32 %v1910_v30  ;;  %v2084_v28 = vld [vmem:[#allocation12 + $0x460] sm:$0xff]  ;;  %v2085_v30 = vld [vmem:[#allocation12 + $0x468] sm:$0xff] }
 0x2b9   : > { %4543 = vrcp.f32 %v1899_v16 }
 0x2ba   : > { %4545 = vrcp.f32 %v1911_v32 }
 0x2c1   : > { %v4540_v58 = vpop.eup %4539 }
 0x2c2   : > { %v4542_v59 = vpop.eup %4541 }
 0x2c3   : > { %v4544_v60 = vpop.eup %4543  ;;  %v1930_v1 = vmul.f32 %v4769_v14, %v4542_v59 }
 0x2c4   : > { %v4546_v61 = vpop.eup %4545 }
 0x2c5   : > { %v1931_v4 = vmul.f32 %v4765_v46, %v4546_v61  ;;  %v2112_v61 = vld [vmem:[#allocation12 + $0x540] sm:$0xff] }
 0x2e5   : > { %v1836_v35 = vpop.f32.mrb[4].mxu0  ;;  %v1877_v38 = vpop.f32.mrb[4].mxu1 }
 0x2e6   : > { %v1888_v37 = vadd.f32 %v1836_v35, %v946_v33  ;;  %v1838_v39 = vpop.f32.mrb[5].mxu0  ;;  %v1890_v41 = vadd.f32 %v1877_v38, %v948_v40  ;;  %v1879_v10 = vpop.f32.mrb[5].mxu1  ;;  %v4293_v33 = vcombine.high %v2080_v27, %v2084_v28  ;;  %v4295_v40 = vcombine.high %v2081_v29, %v2085_v30  ;;  %v2092_v35 = vld [vmem:[#allocation12 + $0x4a0] sm:$0xff] }
 0x2e7   : > { %v1889_v42 = vadd.f32 %v1838_v39, %v947_v34  ;;  %v1840_v0 = vpop.f32.mrb[6].mxu0  ;;  %v1891_v15 = vadd.f32 %v1879_v10, %v949_v36  ;;  %v1881_v51 = vpop.f32.mrb[6].mxu1  ;;  %v2088_v34 = vld [vmem:[#allocation12 + $0x480] sm:$0xff]  ;;  %v2089_v36 = vld [vmem:[#allocation12 + $0x488] sm:$0xff]  ;;  %v5162_v38 = vpack.c.bf16 %v4757_v31, %v4757_v31  ;;  %v4292_v39 = vcombine.low %v2080_v27, %v2084_v28 }
 0x2e8   : > { %4547 = vtanh.f32 %v1888_v37  ;;  %v1841_v54 = vpop.f32.mrb[7].mxu0  ;;  %v4154_v55 = vmul.f32 -1.442695, %v1890_v41  ;;  %v1882_v56 = vpop.f32.mrb[7].mxu1  ;;  %v2093_v37 = vld [vmem:[#allocation12 + $0x4a8] sm:$0xff]  ;;  %v4294_v41 = vcombine.low %v2081_v29, %v2085_v30  ;;  %v2096_v31 = vld [vmem:[#allocation12 + $0x4c0] sm:$0xff]  ;;  %v4300_v48 = vcombine.low %v2088_v34, %v2092_v35 }
 0x2e9   : > { %4549 = vtanh.f32 %v1889_v42  ;;  %v4155_v57 = vmul.f32 -1.442695, %v1891_v15  ;;  %v4301_v42 = vcombine.high %v2088_v34, %v2092_v35  ;;  %v4303_v10 = vcombine.high %v2089_v36, %v2093_v37  ;;  %v2100_v15 = vld [vmem:[#allocation12 + $0x4e0] sm:$0xff]  ;;  %v2097_v51 = vld [vmem:[#allocation12 + $0x4c8] sm:$0xff] }
 0x2ea   : > { %4551 = vpow2.f32 %v4154_v55  ;;  %v2101_v54 = vld [vmem:[#allocation12 + $0x4e8] sm:$0xff]  ;;  %v4302_v49 = vcombine.low %v2089_v36, %v2093_v37  ;;  %v4309_v50 = vcombine.high %v2096_v31, %v2100_v15  ;;  %v2128_v28 = vld [vmem:[#allocation12 + $0x5c0] sm:$0xff] }
 0x2eb   : > { %4553 = vpow2.f32 %v4155_v57  ;;  %v4311_v52 = vcombine.high %v2097_v51, %v2101_v54  ;;  %v2105_v55 = vld [vmem:[#allocation12 + $0x508] sm:$0xff]  ;;  %v4308_v57 = vcombine.low %v2096_v31, %v2100_v15  ;;  %v2132_v29 = vld [vmem:[#allocation12 + $0x5e0] sm:$0xff] }
 0x2ec   : > { %v2109_v56 = vld [vmem:[#allocation12 + $0x528] sm:$0xff]  ;;  %v4341_v35 = vcombine.high %v2128_v28, %v2132_v29  ;;  %v2136_v37 = vld [vmem:[#allocation12 + $0x600] sm:$0xff] }
 0x2ed   : > { %v2129_v30 = vld [vmem:[#allocation12 + $0x5c8] sm:$0xff] }
 0x2f2   : > { %v4548_v62 = vpop.eup %4547 }
 0x2f3   : > { %v4550_v63 = vpop.eup %4549  ;;  %v1932_v3 = vmul.f32 %v4548_v62, %v4540_v58  ;;  %v4310_v58 = vcombine.low %v2097_v51, %v2101_v54  ;;  %v2116_v62 = vld [vmem:[#allocation12 + $0x560] sm:$0xff] }
 0x2f4   : > { %v1933_v5 = vmul.f32 %v4550_v63, %v4544_v60  ;;  %v4552_v7 = vpop.eup %4551  ;;  %v4319_v60 = vcombine.high %v2105_v55, %v2109_v56  ;;  %v2113_v63 = vld [vmem:[#allocation12 + $0x548] sm:$0xff]  ;;  %v2144_v54 = vld [vmem:[#allocation12 + $0x640] sm:$0xff] }
 0x2f5   : > { %v5140_v14 = vadd.f32 %v1932_v3, %v1930_v1   ;;  %v4554_v17 = vpop.eup %4553  ;;  %v1924_v18 = vadd.f32 1.0, %v4552_v7  ;;  %v2117_v1 = vld [vmem:[#allocation12 + $0x568] sm:$0xff] }
 0x2f6   : > { %v5142_v46 = vadd.f32 %v1933_v5, %v1931_v4   ;;  %v1925_v2 = vadd.f32 1.0, %v4554_v17  ;;  %v4318_v4 = vcombine.low %v2105_v55, %v2109_v56  ;;  %v4325_v5 = vcombine.high %v2112_v61, %v2116_v62  ;;  %v2120_v17 = vld [vmem:[#allocation12 + $0x580] sm:$0xff] }
 0x2f7   : > { %4555 = vtanh.f32 %v5140_v14  ;;  %v4327_v7 = vcombine.high %v2113_v63, %v2117_v1  ;;  %v2152_v56 = vld [vmem:[#allocation12 + $0x680] sm:$0xff] }
 0x2f8   : > { %4557 = vrcp.f32 %v1924_v18  ;;  %v2124_v18 = vld [vmem:[#allocation12 + $0x5a0] sm:$0xff] }
 0x2f9   : > { %4559 = vtanh.f32 %v5142_v46 }
 0x2fa   : > { %4561 = vrcp.f32 %v1925_v2  ;;  %v2121_v2 = vld [vmem:[#allocation12 + $0x588] sm:$0xff] }
 0x301   : > { %v4556_v19 = vpop.eup %4555 }
 0x302   : > { %v4558_v22 = vpop.eup %4557 }
 0x303   : > { %v4560_v23 = vpop.eup %4559  ;;  %v5146_v24 = vmul.f32 %v4558_v22, %v4556_v19   ;;  %v2125_v19 = vld [vmem:[#allocation12 + $0x5a8] sm:$0xff]  ;;  %v4324_v22 = vcombine.low %v2112_v61, %v2116_v62 }
 0x304   : > { %v4562_v25 = vpop.eup %4561  ;;  %v4335_v27 = vcombine.high %v2121_v2, %v2125_v19  ;;  %v4334_v34 = vcombine.low %v2121_v2, %v2125_v19  ;;  %v2168_v19 = vld [vmem:[#allocation12 + $0x700] sm:$0xff] }
 0x305   : > { %v5148_v0 = vmul.f32 %v4562_v25, %v4560_v23   ;;  %v5156_v32 = vpack.c.bf16 %v5146_v24, %v5146_v24  ;;  %v4326_v23 = vcombine.low %v2113_v63, %v2117_v1  ;;  %v4333_v25 = vcombine.high %v2120_v17, %v2124_v18  ;;  %v2160_v1 = vld [vmem:[#allocation12 + $0x6c0] sm:$0xff] }
 0x307   : > { %v5152_v16 = vpack.c.bf16 %v5148_v0, %v5148_v0 }
 0x309   : > { %3554 = vmatprep.mubr.bf16.mxu0 %v5152_v16  ;;  %3636 = vmatprep.mubr.bf16.mxu1 %v5152_v16 }
 0x30a   : > { %3555 = vmatmul.mubr.bf16.vlgmr.msra.gmra.mrb[8].mxu0 %v5156_v32  ;;  %3637 = vmatmul.mubr.bf16.vlgmr.msra.gmra.mrb[8].mxu1 %v5156_v32 }
 0x30b   : > { %3564 = vmatpush1.bf16.msra.mxu0 %v4284_v47  ;;  %3646 = vmatpush1.bf16.msra.mxu1 %v4286_v53  ;;  %v2104_v47 = vld [vmem:[#allocation12 + $0x500] sm:$0xff] }
 0x30c   : > { %3565 = vmatprep.subr.bf16.mxu0 %v4293_v33  ;;  %3647 = vmatprep.subr.bf16.mxu1 %v4295_v40  ;;  %v2108_v53 = vld [vmem:[#allocation12 + $0x520] sm:$0xff]  ;;  %v2133_v33 = vld [vmem:[#allocation12 + $0x5e8] sm:$0xff]  ;;  %v4332_v40 = vcombine.low %v2120_v17, %v2124_v18 }
 0x30d   : > { %3595 = vmatprep.mubr.bf16.mxu0 %v5162_v38  ;;  %3677 = vmatprep.mubr.bf16.mxu1 %v5162_v38  ;;  %v4317_v59 = vcombine.high %v2104_v47, %v2108_v53  ;;  %v4316_v3 = vcombine.low %v2104_v47, %v2108_v53  ;;  %v4343_v36 = vcombine.high %v2129_v30, %v2133_v33 }
 0x30e   : > { %v4342_v31 = vcombine.low %v2129_v30, %v2133_v33  ;;  %v2176_v33 = vld [vmem:[#allocation12 + $0x740] sm:$0xff] }
 0x30f   : > { %3566 = vmatpush1.bf16.msra.mxu0 %v4292_v39  ;;  %3648 = vmatpush1.bf16.msra.mxu1 %v4294_v41  ;;  %v2140_v39 = vld [vmem:[#allocation12 + $0x620] sm:$0xff]  ;;  %v2137_v41 = vld [vmem:[#allocation12 + $0x608] sm:$0xff] }
 0x310   : > { %3567 = vmatprep.subr.bf16.mxu0 %v4301_v42  ;;  %3649 = vmatprep.subr.bf16.mxu1 %v4303_v10  ;;  %v2141_v42 = vld [vmem:[#allocation12 + $0x628] sm:$0xff]  ;;  %v4340_v10 = vcombine.low %v2128_v28, %v2132_v29  ;;  %v4349_v15 = vcombine.high %v2136_v37, %v2140_v39 }
 0x311   : > { %v4351_v51 = vcombine.high %v2137_v41, %v2141_v42  ;;  %v4350_v47 = vcombine.low %v2137_v41, %v2141_v42  ;;  %v2184_v42 = vld [vmem:[#allocation12 + $0x780] sm:$0xff] }
 0x313   : > { %3568 = vmatpush1.bf16.msra.mxu0 %v4300_v48  ;;  %3650 = vmatpush1.bf16.msra.mxu1 %v4302_v49  ;;  %v2148_v48 = vld [vmem:[#allocation12 + $0x660] sm:$0xff]  ;;  %v2145_v49 = vld [vmem:[#allocation12 + $0x648] sm:$0xff] }
 0x314   : > { %3569 = vmatprep.subr.bf16.mxu0 %v4309_v50  ;;  %3651 = vmatprep.subr.bf16.mxu1 %v4311_v52  ;;  %v2149_v50 = vld [vmem:[#allocation12 + $0x668] sm:$0xff]  ;;  %v4348_v52 = vcombine.low %v2136_v37, %v2140_v39  ;;  %v4357_v53 = vcombine.high %v2144_v54, %v2148_v48 }
 0x315   : > { %v4359_v55 = vcombine.high %v2145_v49, %v2149_v50  ;;  %v4358_v61 = vcombine.low %v2145_v49, %v2149_v50  ;;  %v2192_v50 = vld [vmem:[#allocation12 + $0x7c0] sm:$0xff] }
 0x317   : > { %3570 = vmatpush1.bf16.msra.mxu0 %v4308_v57  ;;  %3652 = vmatpush1.bf16.msra.mxu1 %v4310_v58  ;;  %v2156_v57 = vld [vmem:[#allocation12 + $0x6a0] sm:$0xff]  ;;  %v2153_v58 = vld [vmem:[#allocation12 + $0x688] sm:$0xff] }
 0x318   : > { %3571 = vmatprep.subr.bf16.mxu0 %v4317_v59  ;;  %3653 = vmatprep.subr.bf16.mxu1 %v4319_v60  ;;  %v2157_v59 = vld [vmem:[#allocation12 + $0x6a8] sm:$0xff]  ;;  %v4356_v60 = vcombine.low %v2144_v54, %v2148_v48  ;;  %v4365_v62 = vcombine.high %v2152_v56, %v2156_v57 }
 0x319   : > { %v4367_v63 = vcombine.high %v2153_v58, %v2157_v59  ;;  %v4366_v17 = vcombine.low %v2153_v58, %v2157_v59  ;;  %v1946_v59 = vld [vmem:[#allocation12 + $0x10] sm:$0xff] }
 0x31b   : > { %3572 = vmatpush1.bf16.msra.mxu0 %v4316_v3  ;;  %3654 = vmatpush1.bf16.msra.mxu1 %v4318_v4  ;;  %v2164_v3 = vld [vmem:[#allocation12 + $0x6e0] sm:$0xff]  ;;  %v2161_v4 = vld [vmem:[#allocation12 + $0x6c8] sm:$0xff] }
 0x31c   : > { %3573 = vmatprep.subr.bf16.mxu0 %v4325_v5  ;;  %3655 = vmatprep.subr.bf16.mxu1 %v4327_v7  ;;  %v2165_v5 = vld [vmem:[#allocation12 + $0x6e8] sm:$0xff]  ;;  %v4364_v7 = vcombine.low %v2152_v56, %v2156_v57  ;;  %v4373_v18 = vcombine.high %v2160_v1, %v2164_v3 }
 0x31d   : > { %v4375_v2 = vcombine.high %v2161_v4, %v2165_v5  ;;  %v4374_v28 = vcombine.low %v2161_v4, %v2165_v5  ;;  %v1954_v5 = vld [vmem:[#allocation12 + $0x50] sm:$0xff] }
 0x31f   : > { %3574 = vmatpush1.bf16.msra.mxu0 %v4324_v22  ;;  %3656 = vmatpush1.bf16.msra.mxu1 %v4326_v23  ;;  %v2172_v22 = vld [vmem:[#allocation12 + $0x720] sm:$0xff]  ;;  %v2169_v23 = vld [vmem:[#allocation12 + $0x708] sm:$0xff] }
 0x320   : > { %3575 = vmatprep.subr.bf16.mxu0 %v4333_v25  ;;  %3657 = vmatprep.subr.bf16.mxu1 %v4335_v27  ;;  %v2173_v25 = vld [vmem:[#allocation12 + $0x728] sm:$0xff]  ;;  %v4372_v27 = vcombine.low %v2160_v1, %v2164_v3  ;;  %v4381_v29 = vcombine.high %v2168_v19, %v2172_v22 }
 0x321   : > { %v4383_v30 = vcombine.high %v2169_v23, %v2173_v25  ;;  %v4382_v37 = vcombine.low %v2169_v23, %v2173_v25 }
 0x323   : > { %3576 = vmatpush1.bf16.msra.mxu0 %v4332_v40  ;;  %3658 = vmatpush1.bf16.msra.mxu1 %v4334_v34  ;;  %v2180_v40 = vld [vmem:[#allocation12 + $0x760] sm:$0xff]  ;;  %v2177_v34 = vld [vmem:[#allocation12 + $0x748] sm:$0xff] }
 0x324   : > { %3577 = vmatprep.subr.bf16.mxu0 %v4341_v35  ;;  %3659 = vmatprep.subr.bf16.mxu1 %v4343_v36  ;;  %v2181_v35 = vld [vmem:[#allocation12 + $0x768] sm:$0xff]  ;;  %v4380_v36 = vcombine.low %v2168_v19, %v2172_v22  ;;  %v4389_v39 = vcombine.high %v2176_v33, %v2180_v40 }
 0x325   : > { %v4391_v41 = vcombine.high %v2177_v34, %v2181_v35  ;;  %v4390_v54 = vcombine.low %v2177_v34, %v2181_v35  ;;  %v1970_v35 = vld [vmem:[#allocation12 + $0xd0] sm:$0xff] }
 0x327   : > { %3578 = vmatpush1.bf16.msra.mxu0 %v4340_v10  ;;  %3660 = vmatpush1.bf16.msra.mxu1 %v4342_v31  ;;  %v2188_v10 = vld [vmem:[#allocation12 + $0x7a0] sm:$0xff]  ;;  %v2185_v31 = vld [vmem:[#allocation12 + $0x788] sm:$0xff] }
 0x328   : > { %3579 = vmatprep.subr.bf16.mxu0 %v4349_v15  ;;  %3661 = vmatprep.subr.bf16.mxu1 %v4351_v51  ;;  %v2189_v15 = vld [vmem:[#allocation12 + $0x7a8] sm:$0xff]  ;;  %v4388_v51 = vcombine.low %v2176_v33, %v2180_v40  ;;  %v4397_v48 = vcombine.high %v2184_v42, %v2188_v10 }
 0x329   : > { %v4399_v49 = vcombine.high %v2185_v31, %v2189_v15  ;;  %v4398_v56 = vcombine.low %v2185_v31, %v2189_v15  ;;  %v1978_v15 = vld [vmem:[#allocation12 + $0x110] sm:$0xff] }
 0x32b   : > { %3580 = vmatpush1.bf16.msra.mxu0 %v4348_v52  ;;  %3662 = vmatpush1.bf16.msra.mxu1 %v4350_v47  ;;  %v2196_v52 = vld [vmem:[#allocation12 + $0x7e0] sm:$0xff]  ;;  %v2193_v47 = vld [vmem:[#allocation12 + $0x7c8] sm:$0xff] }
 0x32c   : > { %3581 = vmatprep.subr.bf16.mxu0 %v4357_v53  ;;  %3663 = vmatprep.subr.bf16.mxu1 %v4359_v55  ;;  %v2197_v53 = vld [vmem:[#allocation12 + $0x7e8] sm:$0xff]  ;;  %v4396_v55 = vcombine.low %v2184_v42, %v2188_v10  ;;  %v4405_v57 = vcombine.high %v2192_v50, %v2196_v52 }
 0x32d   : > { %v4407_v58 = vcombine.high %v2193_v47, %v2197_v53  ;;  %v4406_v1 = vcombine.low %v2193_v47, %v2197_v53  ;;  %v1986_v47 = vld [vmem:[#allocation12 + $0x150] sm:$0xff] }
 0x32e   : > { %v1990_v53 = vld [vmem:[#allocation12 + $0x170] sm:$0xff] }
 0x32f   : > { %3582 = vmatpush1.bf16.msra.mxu0 %v4356_v60  ;;  %3664 = vmatpush1.bf16.msra.mxu1 %v4358_v61  ;;  %v1950_v60 = vld [vmem:[#allocation12 + $0x30] sm:$0xff]  ;;  %v1947_v61 = vld [vmem:[#allocation12 + $0x18] sm:$0xff] }
 0x330   : > { %3583 = vmatprep.subr.bf16.mxu0 %v4365_v62  ;;  %3665 = vmatprep.subr.bf16.mxu1 %v4367_v63  ;;  %v1951_v62 = vld [vmem:[#allocation12 + $0x38] sm:$0xff]  ;;  %v4404_v63 = vcombine.low %v2192_v50, %v2196_v52  ;;  %v4161_v3 = vcombine.high %v1946_v59, %v1950_v60  ;;  %v4160_v19 = vcombine.low %v1946_v59, %v1950_v60 }
 0x331   : > { %v4163_v4 = vcombine.high %v1947_v61, %v1951_v62  ;;  %v4162_v22 = vcombine.low %v1947_v61, %v1951_v62  ;;  %v4201_v59 = vcombine.high %v1986_v47, %v1990_v53  ;;  %v1994_v61 = vld [vmem:[#allocation12 + $0x190] sm:$0xff] }
 0x332   : > { %v1998_v62 = vld [vmem:[#allocation12 + $0x1b0] sm:$0xff] }
 0x333   : > { %3584 = vmatpush1.bf16.msra.mxu0 %v4364_v7  ;;  %3666 = vmatpush1.bf16.msra.mxu1 %v4366_v17  ;;  %v5176_v7 = vpack.c.bf16 %v4761_v45, %v4761_v45  ;;  %v1958_v17 = vld [vmem:[#allocation12 + $0x70] sm:$0xff]  ;;  %v1967_v45 = vld [vmem:[#allocation12 + $0xb8] sm:$0xff] }
 0x334   : > { %3585 = vmatprep.subr.bf16.mxu0 %v4373_v18  ;;  %3667 = vmatprep.subr.bf16.mxu1 %v4375_v2  ;;  %v1955_v18 = vld [vmem:[#allocation12 + $0x58] sm:$0xff]  ;;  %v4169_v23 = vcombine.high %v1954_v5, %v1958_v17 }
 0x335   : > { %v1959_v2 = vld [vmem:[#allocation12 + $0x78] sm:$0xff] }
 0x336   : > { %v4171_v25 = vcombine.high %v1955_v18, %v1959_v2  ;;  %v4170_v33 = vcombine.low %v1955_v18, %v1959_v2  ;;  %v2002_v18 = vld [vmem:[#allocation12 + $0x1d0] sm:$0xff] }
 0x337   : > { %3586 = vmatpush1.bf16.msra.mxu0 %v4372_v27  ;;  %3668 = vmatpush1.bf16.msra.mxu1 %v4374_v28  ;;  %v1962_v27 = vld [vmem:[#allocation12 + $0x90] sm:$0xff] }
 0x338   : > { %3587 = vmatprep.subr.bf16.mxu0 %v4381_v29  ;;  %3669 = vmatprep.subr.bf16.mxu1 %v4383_v30  ;;  %v1966_v28 = vld [vmem:[#allocation12 + $0xb0] sm:$0xff]  ;;  %v1963_v29 = vld [vmem:[#allocation12 + $0x98] sm:$0xff]  ;;  %v4168_v30 = vcombine.low %v1954_v5, %v1958_v17  ;;  %v4209_v5 = vcombine.high %v1994_v61, %v1998_v62 }
 0x339   : > { %v4177_v40 = vcombine.high %v1962_v27, %v1966_v28  ;;  %v4179_v34 = vcombine.high %v1963_v29, %v1967_v45  ;;  %v4178_v42 = vcombine.low %v1963_v29, %v1967_v45  ;;  %v2006_v2 = vld [vmem:[#allocation12 + $0x1f0] sm:$0xff] }
 0x33a   : > { %v2010_v29 = vld [vmem:[#allocation12 + $0x210] sm:$0xff] }
 0x33b   : > { %3588 = vmatpush1.bf16.msra.mxu0 %v4380_v36  ;;  %3670 = vmatpush1.bf16.msra.mxu1 %v4382_v37  ;;  %v1974_v36 = vld [vmem:[#allocation12 + $0xf0] sm:$0xff]  ;;  %v1971_v37 = vld [vmem:[#allocation12 + $0xd8] sm:$0xff] }
 0x33c   : > { %3589 = vmatprep.subr.bf16.mxu0 %v4389_v39  ;;  %3671 = vmatprep.subr.bf16.mxu1 %v4391_v41  ;;  %v1975_v39 = vld [vmem:[#allocation12 + $0xf8] sm:$0xff]  ;;  %v4176_v41 = vcombine.low %v1962_v27, %v1966_v28  ;;  %v4185_v10 = vcombine.high %v1970_v35, %v1974_v36  ;;  %v4217_v27 = vcombine.high %v2002_v18, %v2006_v2  ;;  %v2014_v45 = vld [vmem:[#allocation12 + $0x230] sm:$0xff] }
 0x33d   : > { %v4187_v31 = vcombine.high %v1971_v37, %v1975_v39 }
 0x33f   : > { %3590 = vmatpush1.bf16.msra.mxu0 %v4388_v51  ;;  %3672 = vmatpush1.bf16.msra.mxu1 %v4390_v54  ;;  %v1982_v51 = vld [vmem:[#allocation12 + $0x130] sm:$0xff]  ;;  %v1983_v54 = vld [vmem:[#allocation12 + $0x138] sm:$0xff] }
 0x340   : > { %3591 = vmatprep.subr.bf16.mxu0 %v4397_v48  ;;  %3673 = vmatprep.subr.bf16.mxu1 %v4399_v49  ;;  %v4184_v48 = vcombine.low %v1970_v35, %v1974_v36  ;;  %v4186_v49 = vcombine.low %v1971_v37, %v1975_v39  ;;  %v4193_v50 = vcombine.high %v1978_v15, %v1982_v51  ;;  %v2018_v37 = vld [vmem:[#allocation12 + $0x250] sm:$0xff] }
 0x341   : > { %v4225_v35 = vcombine.high %v2010_v29, %v2014_v45  ;;  %v2022_v39 = vld [vmem:[#allocation12 + $0x270] sm:$0xff] }
 0x343   : > { %3592 = vmatpush1.bf16.msra.mxu0 %v4396_v55  ;;  %3674 = vmatpush1.bf16.msra.mxu1 %v4398_v56  ;;  %v1987_v55 = vld [vmem:[#allocation12 + $0x158] sm:$0xff] }
 0x344   : > { %3593 = vmatprep.subr.bf16.mxu0 %v4405_v57  ;;  %3675 = vmatprep.subr.bf16.mxu1 %v4407_v58  ;;  %v1991_v56 = vld [vmem:[#allocation12 + $0x178] sm:$0xff]  ;;  %v4192_v57 = vcombine.low %v1978_v15, %v1982_v51  ;;  %v4233_v15 = vcombine.high %v2018_v37, %v2022_v39 }
 0x345   : > { %v4203_v60 = vcombine.high %v1987_v55, %v1991_v56 }
 0x347   : > { %3594 = vmatpush1.bf16.msra.mxu0 %v4404_v63  ;;  %3676 = vmatpush1.bf16.msra.mxu1 %v4406_v1  ;;  %v1995_v63 = vld [vmem:[#allocation12 + $0x198] sm:$0xff] }
 0x348   : > { %3686 = vmatprep.subr.bf16.mxu0 %v4161_v3  ;;  %3768 = vmatprep.subr.bf16.mxu1 %v4163_v4  ;;  %v1999_v1 = vld [vmem:[#allocation12 + $0x1b8] sm:$0xff]  ;;  %v4200_v3 = vcombine.low %v1986_v47, %v1990_v53  ;;  %v4202_v4 = vcombine.low %v1987_v55, %v1991_v56  ;;  %v2034_v55 = vld [vmem:[#allocation12 + $0x2d0] sm:$0xff] }
 0x349   : > { %v4211_v17 = vcombine.high %v1995_v63, %v1999_v1  ;;  %v2038_v56 = vld [vmem:[#allocation12 + $0x2f0] sm:$0xff] }
 0x34a   : > { %3596 = vmatmul.mubr.bf16.vlgmr.msra.gmra.mrb[8].mxu0 %v5176_v7  ;;  %3678 = vmatmul.mubr.bf16.vlgmr.msra.gmra.mrb[8].mxu1 %v5176_v7 }
 0x34b   : > { %3687 = vmatpush1.bf16.msra.mxu0 %v4160_v19  ;;  %3718 = vmatprep.mubr.bf16.mxu0 %v5152_v16  ;;  %v2003_v19 = vld [vmem:[#allocation12 + $0x1d8] sm:$0xff] }
 0x34c   : > { %3769 = vmatpush1.bf16.msra.mxu1 %v4162_v22  ;;  %3800 = vmatprep.mubr.bf16.mxu1 %v5152_v16  ;;  %v1979_v16 = vld [vmem:[#allocation12 + $0x118] sm:$0xff] }
 0x34d   : > { %3688 = vmatprep.subr.bf16.mxu0 %v4169_v23  ;;  %3770 = vmatprep.subr.bf16.mxu1 %v4171_v25  ;;  %v4195_v52 = vcombine.high %v1979_v16, %v1983_v54  ;;  %v4194_v58 = vcombine.low %v1979_v16, %v1983_v54  ;;  %v2007_v22 = vld [vmem:[#allocation12 + $0x1f8] sm:$0xff]  ;;  %v4208_v23 = vcombine.low %v1994_v61, %v1998_v62  ;;  %v2026_v16 = vld [vmem:[#allocation12 + $0x290] sm:$0xff] }
 0x34e   : > { %v4210_v25 = vcombine.low %v1995_v63, %v1999_v1  ;;  %v4219_v28 = vcombine.high %v2003_v19, %v2007_v22  ;;  %v2030_v54 = vld [vmem:[#allocation12 + $0x2b0] sm:$0xff]  ;;  %v4249_v61 = vcombine.high %v2034_v55, %v2038_v56 }
 0x34f   : > { %3689 = vmatpush1.bf16.msra.mxu0 %v4168_v30  ;;  %v2011_v30 = vld [vmem:[#allocation12 + $0x218] sm:$0xff]  ;;  %v4241_v47 = vcombine.high %v2026_v16, %v2030_v54  ;;  %v2042_v63 = vld [vmem:[#allocation12 + $0x310] sm:$0xff] }
 0x350   : > { %3771 = vmatpush1.bf16.msra.mxu1 %v4170_v33  ;;  %3690 = vmatprep.subr.bf16.mxu0 %v4177_v40  ;;  %v2015_v33 = vld [vmem:[#allocation12 + $0x238] sm:$0xff]  ;;  %v4216_v40 = vcombine.low %v2002_v18, %v2006_v2  ;;  %v2046_v1 = vld [vmem:[#allocation12 + $0x330] sm:$0xff] }
 0x351   : > { %3772 = vmatprep.subr.bf16.mxu1 %v4179_v34  ;;  %v4218_v34 = vcombine.low %v2003_v19, %v2007_v22  ;;  %v4227_v36 = vcombine.high %v2011_v30, %v2015_v33  ;;  %v4257_v18 = vcombine.high %v2042_v63, %v2046_v1  ;;  %v2050_v19 = vld [vmem:[#allocation12 + $0x350] sm:$0xff] }
 0x352   : > { %v2054_v22 = vld [vmem:[#allocation12 + $0x370] sm:$0xff] }
 0x353   : > { %3691 = vmatpush1.bf16.msra.mxu0 %v4176_v41  ;;  %v2019_v41 = vld [vmem:[#allocation12 + $0x258] sm:$0xff] }
 0x354   : > { %3773 = vmatpush1.bf16.msra.mxu1 %v4178_v42  ;;  %3692 = vmatprep.subr.bf16.mxu0 %v4185_v10  ;;  %v2023_v42 = vld [vmem:[#allocation12 + $0x278] sm:$0xff]  ;;  %v4224_v10 = vcombine.low %v2010_v29, %v2014_v45  ;;  %v4265_v29 = vcombine.high %v2050_v19, %v2054_v22 }
 0x355   : > { %3774 = vmatprep.subr.bf16.mxu1 %v4187_v31  ;;  %v4226_v31 = vcombine.low %v2011_v30, %v2015_v33  ;;  %v4235_v51 = vcombine.high %v2019_v41, %v2023_v42  ;;  %v2058_v30 = vld [vmem:[#allocation12 + $0x390] sm:$0xff] }
 0x356   : > { %v2062_v33 = vld [vmem:[#allocation12 + $0x3b0] sm:$0xff] }
 0x357   : > { %3693 = vmatpush1.bf16.msra.mxu0 %v4184_v48  ;;  %v2027_v48 = vld [vmem:[#allocation12 + $0x298] sm:$0xff] }
 0x358   : > { %3775 = vmatpush1.bf16.msra.mxu1 %v4186_v49  ;;  %3694 = vmatprep.subr.bf16.mxu0 %v4193_v50  ;;  %v2031_v49 = vld [vmem:[#allocation12 + $0x2b8] sm:$0xff]  ;;  %v4232_v50 = vcombine.low %v2018_v37, %v2022_v39  ;;  %v4273_v37 = vcombine.high %v2058_v30, %v2062_v33 }
 0x359   : > { %3776 = vmatprep.subr.bf16.mxu1 %v4195_v52  ;;  %v4234_v52 = vcombine.low %v2019_v41, %v2023_v42  ;;  %v4243_v53 = vcombine.high %v2027_v48, %v2031_v49  ;;  %v2066_v41 = vld [vmem:[#allocation12 + $0x3d0] sm:$0xff] }
 0x35a   : > { %v2070_v42 = vld [vmem:[#allocation12 + $0x3f0] sm:$0xff] }
 0x35b   : > { %3695 = vmatpush1.bf16.msra.mxu0 %v4192_v57  ;;  %v2035_v57 = vld [vmem:[#allocation12 + $0x2d8] sm:$0xff] }
 0x35c   : > { %3777 = vmatpush1.bf16.msra.mxu1 %v4194_v58  ;;  %3696 = vmatprep.subr.bf16.mxu0 %v4201_v59  ;;  %v2039_v58 = vld [vmem:[#allocation12 + $0x2f8] sm:$0xff]  ;;  %v4240_v59 = vcombine.low %v2026_v16, %v2030_v54  ;;  %v4281_v16 = vcombine.high %v2066_v41, %v2070_v42 }
 0x35d   : > { %3778 = vmatprep.subr.bf16.mxu1 %v4203_v60  ;;  %v4242_v60 = vcombine.low %v2027_v48, %v2031_v49  ;;  %v4251_v62 = vcombine.high %v2035_v57, %v2039_v58  ;;  %v2074_v48 = vld [vmem:[#allocation12 + $0x410] sm:$0xff] }
 0x35e   : > { %v2078_v49 = vld [vmem:[#allocation12 + $0x430] sm:$0xff] }
 0x35f   : > { %3697 = vmatpush1.bf16.msra.mxu0 %v4200_v3  ;;  %v2043_v3 = vld [vmem:[#allocation12 + $0x318] sm:$0xff] }
 0x360   : > { %3779 = vmatpush1.bf16.msra.mxu1 %v4202_v4  ;;  %3698 = vmatprep.subr.bf16.mxu0 %v4209_v5  ;;  %v2047_v4 = vld [vmem:[#allocation12 + $0x338] sm:$0xff]  ;;  %v4248_v5 = vcombine.low %v2034_v55, %v2038_v56  ;;  %v4289_v55 = vcombine.high %v2074_v48, %v2078_v49 }
 0x361   : > { %3780 = vmatprep.subr.bf16.mxu1 %v4211_v17  ;;  %v4250_v17 = vcombine.low %v2035_v57, %v2039_v58  ;;  %v4259_v2 = vcombine.high %v2043_v3, %v2047_v4  ;;  %v2082_v57 = vld [vmem:[#allocation12 + $0x450] sm:$0xff] }
 0x362   : > { %v2086_v58 = vld [vmem:[#allocation12 + $0x470] sm:$0xff] }
 0x363   : > { %3699 = vmatpush1.bf16.msra.mxu0 %v4208_v23  ;;  %v2051_v23 = vld [vmem:[#allocation12 + $0x358] sm:$0xff] }
 0x364   : > { %3781 = vmatpush1.bf16.msra.mxu1 %v4210_v25  ;;  %3700 = vmatprep.subr.bf16.mxu0 %v4217_v27  ;;  %v2055_v25 = vld [vmem:[#allocation12 + $0x378] sm:$0xff]  ;;  %v4256_v27 = vcombine.low %v2042_v63, %v2046_v1  ;;  %v4297_v63 = vcombine.high %v2082_v57, %v2086_v58 }
 0x365   : > { %3782 = vmatprep.subr.bf16.mxu1 %v4219_v28  ;;  %v4258_v28 = vcombine.low %v2043_v3, %v2047_v4  ;;  %v4267_v45 = vcombine.high %v2051_v23, %v2055_v25  ;;  %v2090_v3 = vld [vmem:[#allocation12 + $0x490] sm:$0xff] }
 0x366   : > { %v2094_v4 = vld [vmem:[#allocation12 + $0x4b0] sm:$0xff] }
 0x367   : > { %3701 = vmatpush1.bf16.msra.mxu0 %v4216_v40  ;;  %v2059_v40 = vld [vmem:[#allocation12 + $0x398] sm:$0xff] }
 0x368   : > { %3783 = vmatpush1.bf16.msra.mxu1 %v4218_v34  ;;  %3702 = vmatprep.subr.bf16.mxu0 %v4225_v35  ;;  %v2063_v34 = vld [vmem:[#allocation12 + $0x3b8] sm:$0xff]  ;;  %v4264_v35 = vcombine.low %v2050_v19, %v2054_v22  ;;  %v4305_v19 = vcombine.high %v2090_v3, %v2094_v4 }
 0x369   : > { %3784 = vmatprep.subr.bf16.mxu1 %v4227_v36  ;;  %v4266_v36 = vcombine.low %v2051_v23, %v2055_v25  ;;  %v4275_v39 = vcombine.high %v2059_v40, %v2063_v34  ;;  %v2098_v23 = vld [vmem:[#allocation12 + $0x4d0] sm:$0xff] }
 0x36a   : > { %v2102_v25 = vld [vmem:[#allocation12 + $0x4f0] sm:$0xff] }
 0x36b   : > { %3703 = vmatpush1.bf16.msra.mxu0 %v4224_v10  ;;  %v2067_v10 = vld [vmem:[#allocation12 + $0x3d8] sm:$0xff] }
 0x36c   : > { %3785 = vmatpush1.bf16.msra.mxu1 %v4226_v31  ;;  %3704 = vmatprep.subr.bf16.mxu0 %v4233_v15  ;;  %v2071_v31 = vld [vmem:[#allocation12 + $0x3f8] sm:$0xff]  ;;  %v4272_v15 = vcombine.low %v2058_v30, %v2062_v33  ;;  %v2106_v33 = vld [vmem:[#allocation12 + $0x510] sm:$0xff] }
 0x36d   : > { %3786 = vmatprep.subr.bf16.mxu1 %v4235_v51  ;;  %v4274_v51 = vcombine.low %v2059_v40, %v2063_v34  ;;  %v4283_v54 = vcombine.high %v2067_v10, %v2071_v31  ;;  %v2110_v40 = vld [vmem:[#allocation12 + $0x530] sm:$0xff]  ;;  %v2107_v34 = vld [vmem:[#allocation12 + $0x518] sm:$0xff] }
 0x36f   : > { %3705 = vmatpush1.bf16.msra.mxu0 %v4232_v50  ;;  %v2075_v50 = vld [vmem:[#allocation12 + $0x418] sm:$0xff] }
 0x370   : > { %3787 = vmatpush1.bf16.msra.mxu1 %v4234_v52  ;;  %3706 = vmatprep.subr.bf16.mxu0 %v4241_v47  ;;  %v2079_v52 = vld [vmem:[#allocation12 + $0x438] sm:$0xff]  ;;  %v4280_v47 = vcombine.low %v2066_v41, %v2070_v42  ;;  %v2114_v41 = vld [vmem:[#allocation12 + $0x550] sm:$0xff] }
 0x371   : > { %3788 = vmatprep.subr.bf16.mxu1 %v4243_v53  ;;  %v4282_v53 = vcombine.low %v2067_v10, %v2071_v31  ;;  %v4291_v56 = vcombine.high %v2075_v50, %v2079_v52  ;;  %v2118_v42 = vld [vmem:[#allocation12 + $0x570] sm:$0xff]  ;;  %v2115_v10 = vld [vmem:[#allocation12 + $0x558] sm:$0xff] }
 0x372   : > { %v2119_v31 = vld [vmem:[#allocation12 + $0x578] sm:$0xff] }
 0x373   : > { %3707 = vmatpush1.bf16.msra.mxu0 %v4240_v59  ;;  %v2083_v59 = vld [vmem:[#allocation12 + $0x458] sm:$0xff] }
 0x374   : > { %3789 = vmatpush1.bf16.msra.mxu1 %v4242_v60  ;;  %3708 = vmatprep.subr.bf16.mxu0 %v4249_v61  ;;  %v2087_v60 = vld [vmem:[#allocation12 + $0x478] sm:$0xff]  ;;  %v4288_v61 = vcombine.low %v2074_v48, %v2078_v49  ;;  %v2122_v48 = vld [vmem:[#allocation12 + $0x590] sm:$0xff] }
 0x375   : > { %3790 = vmatprep.subr.bf16.mxu1 %v4251_v62  ;;  %v4290_v62 = vcombine.low %v2075_v50, %v2079_v52  ;;  %v4299_v1 = vcombine.high %v2083_v59, %v2087_v60  ;;  %v2126_v49 = vld [vmem:[#allocation12 + $0x5b0] sm:$0xff]  ;;  %v2123_v50 = vld [vmem:[#allocation12 + $0x598] sm:$0xff] }
 0x376   : > { %v2127_v52 = vld [vmem:[#allocation12 + $0x5b8] sm:$0xff] }
 0x377   : > { %3709 = vmatpush1.bf16.msra.mxu0 %v4248_v5  ;;  %v2091_v5 = vld [vmem:[#allocation12 + $0x498] sm:$0xff] }
 0x378   : > { %3791 = vmatpush1.bf16.msra.mxu1 %v4250_v17  ;;  %3710 = vmatprep.subr.bf16.mxu0 %v4257_v18  ;;  %v2095_v17 = vld [vmem:[#allocation12 + $0x4b8] sm:$0xff]  ;;  %v4296_v18 = vcombine.low %v2082_v57, %v2086_v58  ;;  %v2130_v57 = vld [vmem:[#allocation12 + $0x5d0] sm:$0xff] }
 0x379   : > { %3792 = vmatprep.subr.bf16.mxu1 %v4259_v2  ;;  %v4298_v2 = vcombine.low %v2083_v59, %v2087_v60  ;;  %v4307_v22 = vcombine.high %v2091_v5, %v2095_v17  ;;  %v2134_v58 = vld [vmem:[#allocation12 + $0x5f0] sm:$0xff]  ;;  %v2131_v59 = vld [vmem:[#allocation12 + $0x5d8] sm:$0xff] }
 0x37a   : > { %v2135_v60 = vld [vmem:[#allocation12 + $0x5f8] sm:$0xff] }
 0x37b   : > { %3711 = vmatpush1.bf16.msra.mxu0 %v4256_v27  ;;  %v2099_v27 = vld [vmem:[#allocation12 + $0x4d8] sm:$0xff] }
 0x37c   : > { %3793 = vmatpush1.bf16.msra.mxu1 %v4258_v28  ;;  %3712 = vmatprep.subr.bf16.mxu0 %v4265_v29  ;;  %v2103_v28 = vld [vmem:[#allocation12 + $0x4f8] sm:$0xff]  ;;  %v4304_v29 = vcombine.low %v2090_v3, %v2094_v4  ;;  %v2138_v3 = vld [vmem:[#allocation12 + $0x610] sm:$0xff] }
 0x37d   : > { %3794 = vmatprep.subr.bf16.mxu1 %v4267_v45  ;;  %v4313_v45 = vcombine.high %v2098_v23, %v2102_v25  ;;  %v4315_v30 = vcombine.high %v2099_v27, %v2103_v28  ;;  %v2142_v4 = vld [vmem:[#allocation12 + $0x630] sm:$0xff] }
 0x37f   : > { %3713 = vmatpush1.bf16.msra.mxu0 %v4264_v35  ;;  %v2111_v35 = vld [vmem:[#allocation12 + $0x538] sm:$0xff] }
 0x380   : > { %3795 = vmatpush1.bf16.msra.mxu1 %v4266_v36  ;;  %3714 = vmatprep.subr.bf16.mxu0 %v4273_v37  ;;  %v4312_v36 = vcombine.low %v2098_v23, %v2102_v25  ;;  %v4314_v37 = vcombine.low %v2099_v27, %v2103_v28  ;;  %v2146_v23 = vld [vmem:[#allocation12 + $0x650] sm:$0xff]  ;;  %v2147_v27 = vld [vmem:[#allocation12 + $0x658] sm:$0xff] }
 0x381   : > { %3796 = vmatprep.subr.bf16.mxu1 %v4275_v39  ;;  %v4321_v39 = vcombine.high %v2106_v33, %v2110_v40  ;;  %v2150_v25 = vld [vmem:[#allocation12 + $0x670] sm:$0xff]  ;;  %v2151_v28 = vld [vmem:[#allocation12 + $0x678] sm:$0xff] }
 0x383   : > { %3715 = vmatpush1.bf16.msra.mxu0 %v4272_v15  ;;  %v4320_v15 = vcombine.low %v2106_v33, %v2110_v40  ;;  %v2154_v33 = vld [vmem:[#allocation12 + $0x690] sm:$0xff] }
 0x384   : > { %3797 = vmatpush1.bf16.msra.mxu1 %v4274_v51  ;;  %3716 = vmatprep.subr.bf16.mxu0 %v4281_v16  ;;  %v4322_v51 = vcombine.low %v2107_v34, %v2111_v35  ;;  %v4329_v16 = vcombine.high %v2114_v41, %v2118_v42  ;;  %v2158_v40 = vld [vmem:[#allocation12 + $0x6b0] sm:$0xff] }
 0x385   : > { %3798 = vmatprep.subr.bf16.mxu1 %v4283_v54  ;;  %v4331_v54 = vcombine.high %v2115_v10, %v2119_v31 }
 0x387   : > { %3717 = vmatpush1.bf16.msra.mxu0 %v4280_v47  ;;  %v4328_v47 = vcombine.low %v2114_v41, %v2118_v42  ;;  %v2162_v41 = vld [vmem:[#allocation12 + $0x6d0] sm:$0xff] }
 0x388   : > { %3799 = vmatpush1.bf16.msra.mxu1 %v4282_v53  ;;  %3727 = vmatprep.subr.bf16.mxu0 %v4289_v55  ;;  %v4330_v53 = vcombine.low %v2115_v10, %v2119_v31  ;;  %v4337_v55 = vcombine.high %v2122_v48, %v2126_v49  ;;  %v2166_v42 = vld [vmem:[#allocation12 + $0x6f0] sm:$0xff]  ;;  %v2163_v10 = vld [vmem:[#allocation12 + $0x6d8] sm:$0xff] }
 0x389   : > { %3809 = vmatprep.subr.bf16.mxu1 %v4291_v56  ;;  %v4339_v56 = vcombine.high %v2123_v50, %v2127_v52  ;;  %v2167_v31 = vld [vmem:[#allocation12 + $0x6f8] sm:$0xff] }
 0x38a   : > { %3719 = vmatmul.mubr.bf16.vlgmr.msra.gmra.mrb[12].mxu0 %v5156_v32 }
 0x38b   : > { %3801 = vmatmul.mubr.bf16.vlgmr.msra.gmra.mrb[12].mxu1 %v5156_v32  ;;  %3728 = vmatpush1.bf16.msra.mxu0 %v4288_v61  ;;  %v4306_v32 = vcombine.low %v2091_v5, %v2095_v17  ;;  %v4336_v61 = vcombine.low %v2122_v48, %v2126_v49  ;;  %v2139_v5 = vld [vmem:[#allocation12 + $0x618] sm:$0xff]  ;;  %v2170_v48 = vld [vmem:[#allocation12 + $0x710] sm:$0xff] }
 0x38c   : > { %3810 = vmatpush1.bf16.msra.mxu1 %v4290_v62  ;;  %3729 = vmatprep.subr.bf16.mxu0 %v4297_v63  ;;  %v4338_v62 = vcombine.low %v2123_v50, %v2127_v52  ;;  %v4345_v63 = vcombine.high %v2130_v57, %v2134_v58  ;;  %v2143_v17 = vld [vmem:[#allocation12 + $0x638] sm:$0xff]  ;;  %v2174_v49 = vld [vmem:[#allocation12 + $0x730] sm:$0xff] }
 0x38d   : > { %3811 = vmatprep.subr.bf16.mxu1 %v4299_v1  ;;  %3759 = vmatprep.mubr.bf16.mxu0 %v5162_v38  ;;  %v4347_v1 = vcombine.high %v2131_v59, %v2135_v60  ;;  %v2171_v50 = vld [vmem:[#allocation12 + $0x718] sm:$0xff] }
 0x38e   : > { %3841 = vmatprep.mubr.bf16.mxu1 %v5162_v38  ;;  %v4323_v38 = vcombine.high %v2107_v34, %v2111_v35  ;;  %v2155_v34 = vld [vmem:[#allocation12 + $0x698] sm:$0xff] }
 0x38f   : > { %3730 = vmatpush1.bf16.msra.mxu0 %v4296_v18  ;;  %v4344_v18 = vcombine.low %v2130_v57, %v2134_v58  ;;  %v2159_v35 = vld [vmem:[#allocation12 + $0x6b8] sm:$0xff]  ;;  %v2178_v57 = vld [vmem:[#allocation12 + $0x750] sm:$0xff] }
 0x390   : > { %3812 = vmatpush1.bf16.msra.mxu1 %v4298_v2  ;;  %3731 = vmatprep.subr.bf16.mxu0 %v4305_v19  ;;  %v4346_v2 = vcombine.low %v2131_v59, %v2135_v60  ;;  %v4353_v19 = vcombine.high %v2138_v3, %v2142_v4  ;;  %v2175_v52 = vld [vmem:[#allocation12 + $0x738] sm:$0xff]  ;;  %v2182_v58 = vld [vmem:[#allocation12 + $0x770] sm:$0xff] }
 0x391   : > { %3813 = vmatprep.subr.bf16.mxu1 %v4307_v22  ;;  %v4355_v22 = vcombine.high %v2139_v5, %v2143_v17  ;;  %v2179_v59 = vld [vmem:[#allocation12 + $0x758] sm:$0xff] }
 0x392   : > { %v2183_v60 = vld [vmem:[#allocation12 + $0x778] sm:$0xff] }
 0x393   : > { %3732 = vmatpush1.bf16.msra.mxu0 %v4304_v29  ;;  %v4352_v29 = vcombine.low %v2138_v3, %v2142_v4  ;;  %v2186_v3 = vld [vmem:[#allocation12 + $0x790] sm:$0xff] }
 0x394   : > { %3814 = vmatpush1.bf16.msra.mxu1 %v4306_v32  ;;  %3733 = vmatprep.subr.bf16.mxu0 %v4313_v45  ;;  %v4354_v32 = vcombine.low %v2139_v5, %v2143_v17  ;;  %v4361_v45 = vcombine.high %v2146_v23, %v2150_v25  ;;  %v2190_v4 = vld [vmem:[#allocation12 + $0x7b0] sm:$0xff]  ;;  %v2187_v5 = vld [vmem:[#allocation12 + $0x798] sm:$0xff] }
 0x395   : > { %3815 = vmatprep.subr.bf16.mxu1 %v4315_v30  ;;  %v4363_v30 = vcombine.high %v2147_v27, %v2151_v28  ;;  %v2191_v17 = vld [vmem:[#allocation12 + $0x7b8] sm:$0xff] }
 0x397   : > { %3734 = vmatpush1.bf16.msra.mxu0 %v4312_v36  ;;  %v4360_v36 = vcombine.low %v2146_v23, %v2150_v25  ;;  %v2194_v23 = vld [vmem:[#allocation12 + $0x7d0] sm:$0xff] }
 0x398   : > { %3816 = vmatpush1.bf16.msra.mxu1 %v4314_v37  ;;  %3735 = vmatprep.subr.bf16.mxu0 %v4321_v39  ;;  %v4362_v37 = vcombine.low %v2147_v27, %v2151_v28  ;;  %v4369_v39 = vcombine.high %v2154_v33, %v2158_v40  ;;  %v2198_v25 = vld [vmem:[#allocation12 + $0x7f0] sm:$0xff]  ;;  %v2195_v27 = vld [vmem:[#allocation12 + $0x7d8] sm:$0xff] }
 0x399   : > { %3817 = vmatprep.subr.bf16.mxu1 %v4323_v38  ;;  %v4371_v38 = vcombine.high %v2155_v34, %v2159_v35  ;;  %v2199_v28 = vld [vmem:[#allocation12 + $0x7f8] sm:$0xff] }
 0x39b   : > { %3736 = vmatpush1.bf16.msra.mxu0 %v4320_v15  ;;  %v4368_v15 = vcombine.low %v2154_v33, %v2158_v40  ;;  %v4408_v33 = vcombine.low %v2194_v23, %v2198_v25  ;;  %v4410_v40 = vcombine.low %v2195_v27, %v2199_v28 }
 0x39c   : > { %3818 = vmatpush1.bf16.msra.mxu1 %v4322_v51  ;;  %3737 = vmatprep.subr.bf16.mxu0 %v4329_v16  ;;  %v4370_v51 = vcombine.low %v2155_v34, %v2159_v35  ;;  %v4377_v16 = vcombine.high %v2162_v41, %v2166_v42 }
 0x39d   : > { %3819 = vmatprep.subr.bf16.mxu1 %v4331_v54  ;;  %v4379_v54 = vcombine.high %v2163_v10, %v2167_v31 }
 0x39f   : > { %3738 = vmatpush1.bf16.msra.mxu0 %v4328_v47  ;;  %v4376_v47 = vcombine.low %v2162_v41, %v2166_v42 }
 0x3a0   : > { %3820 = vmatpush1.bf16.msra.mxu1 %v4330_v53  ;;  %3739 = vmatprep.subr.bf16.mxu0 %v4337_v55  ;;  %v4378_v53 = vcombine.low %v2163_v10, %v2167_v31  ;;  %v4385_v55 = vcombine.high %v2170_v48, %v2174_v49  ;;  %v2200_v10 = vld [vmem:[#allocation14] sm:$0xff] }
 0x3a1   : > { %3821 = vmatprep.subr.bf16.mxu1 %v4339_v56  ;;  %v4387_v56 = vcombine.high %v2171_v50, %v2175_v52  ;;  %v2205_v31 = vrot.slane %v2200_v10, %v176_v9 }
 0x3a3   : > { %3740 = vmatpush1.bf16.msra.mxu0 %v4336_v61  ;;  %v4384_v61 = vcombine.low %v2170_v48, %v2174_v49 }
 0x3a4   : > { %3822 = vmatpush1.bf16.msra.mxu1 %v4338_v62  ;;  %3741 = vmatprep.subr.bf16.mxu0 %v4345_v63  ;;  %v4386_v62 = vcombine.low %v2171_v50, %v2175_v52  ;;  %v4393_v63 = vcombine.high %v2178_v57, %v2182_v58 }
 0x3a5   : > { %3823 = vmatprep.subr.bf16.mxu1 %v4347_v1  ;;  %v4395_v1 = vcombine.high %v2179_v59, %v2183_v60 }
 0x3a7   : > { %3742 = vmatpush1.bf16.msra.mxu0 %v4344_v18  ;;  %v4392_v18 = vcombine.low %v2178_v57, %v2182_v58 }
 0x3a8   : > { %3824 = vmatpush1.bf16.msra.mxu1 %v4346_v2  ;;  %3743 = vmatprep.subr.bf16.mxu0 %v4353_v19  ;;  %v4394_v2 = vcombine.low %v2179_v59, %v2183_v60  ;;  %v4401_v19 = vcombine.high %v2186_v3, %v2190_v4 }
 0x3a9   : > { %3825 = vmatprep.subr.bf16.mxu1 %v4355_v22  ;;  %v4403_v22 = vcombine.high %v2187_v5, %v2191_v17 }
 0x3ab   : > { %3744 = vmatpush1.bf16.msra.mxu0 %v4352_v29  ;;  %v4400_v29 = vcombine.low %v2186_v3, %v2190_v4  ;;  %v2225_v3 = vrot.slane %v2200_v10, %v196_v21  ;;  %v2233_v4 = vrot.slane %v2200_v10, %v204_v26 }
 0x3ac   : > { %3826 = vmatpush1.bf16.msra.mxu1 %v4354_v32  ;;  %3745 = vmatprep.subr.bf16.mxu0 %v4361_v45  ;;  %v4402_v32 = vcombine.low %v2187_v5, %v2191_v17  ;;  %v4409_v45 = vcombine.high %v2194_v23, %v2198_v25 }
 0x3ad   : > { %3827 = vmatprep.subr.bf16.mxu1 %v4363_v30  ;;  %v4411_v30 = vcombine.high %v2195_v27, %v2199_v28 }
 0x3af   : > { %3746 = vmatpush1.bf16.msra.mxu0 %v4360_v36 }
 0x3b0   : > { %3828 = vmatpush1.bf16.msra.mxu1 %v4362_v37  ;;  %3747 = vmatprep.subr.bf16.mxu0 %v4369_v39 }
 0x3b1   : > { %3829 = vmatprep.subr.bf16.mxu1 %v4371_v38 }
 0x3b3   : > { %3748 = vmatpush1.bf16.msra.mxu0 %v4368_v15  ;;  %v2213_v15 = vrot.slane %v2200_v10, %v184_v11 }
 0x3b4   : > { %3830 = vmatpush1.bf16.msra.mxu1 %v4370_v51  ;;  %3749 = vmatprep.subr.bf16.mxu0 %v4377_v16  ;;  %v2209_v51 = vrot.slane %v2200_v10, %v180_v12 }
 0x3b5   : > { %3831 = vmatprep.subr.bf16.mxu1 %v4379_v54 }
 0x3b7   : > { %3750 = vmatpush1.bf16.msra.mxu0 %v4376_v47 }
 0x3b8   : > { %3832 = vmatpush1.bf16.msra.mxu1 %v4378_v53  ;;  %3751 = vmatprep.subr.bf16.mxu0 %v4385_v55 }
 0x3b9   : > { %3833 = vmatprep.subr.bf16.mxu1 %v4387_v56 }
 0x3bb   : > { %3752 = vmatpush1.bf16.msra.mxu0 %v4384_v61 }
 0x3bc   : > { %3834 = vmatpush1.bf16.msra.mxu1 %v4386_v62  ;;  %3753 = vmatprep.subr.bf16.mxu0 %v4393_v63  ;;  %v2221_v62 = vrot.slane %v2200_v10, %v192_v6 }
 0x3bd   : > { %3835 = vmatprep.subr.bf16.mxu1 %v4395_v1  ;;  %v2229_v1 = vrot.slane %v2200_v10, %v200_v20 }
 0x3bf   : > { %3754 = vmatpush1.bf16.msra.mxu0 %v4392_v18 }
 0x3c0   : > { %3836 = vmatpush1.bf16.msra.mxu1 %v4394_v2  ;;  %3755 = vmatprep.subr.bf16.mxu0 %v4401_v19 }
 0x3c1   : > { %3837 = vmatprep.subr.bf16.mxu1 %v4403_v22 }
 0x3c3   : > { %3756 = vmatpush1.bf16.msra.mxu0 %v4400_v29 }
 0x3c4   : > { %3838 = vmatpush1.bf16.msra.mxu1 %v4402_v32  ;;  %3757 = vmatprep.subr.bf16.mxu0 %v4409_v45 }
 0x3c5   : > { %3839 = vmatprep.subr.bf16.mxu1 %v4411_v30 }
 0x3c7   : > { %3758 = vmatpush1.bf16.msra.mxu0 %v4408_v33 }
 0x3c8   : > { %3840 = vmatpush1.bf16.msra.mxu1 %v4410_v40 }
 0x3ca   : > { %3760 = vmatmul.mubr.bf16.vlgmr.msra.gmra.mrb[12].mxu0 %v5176_v7 }
 0x3cb   : > { %3842 = vmatmul.mubr.bf16.vlgmr.msra.gmra.mrb[12].mxu1 %v5176_v7  ;;  %v2217_v7 = vrot.slane %v2200_v10, %v188_v13 }
 0x41d   : > { %v3597_v34 = vpop.f32.mrb[8].mxu0  ;;  %v3679_v35 = vpop.f32.mrb[8].mxu1 }
 0x41e   : > { %v3599_v36 = vpop.f32.mrb[9].mxu0  ;;  %v3681_v37 = vpop.f32.mrb[9].mxu1  ;;  %v4422_v16 = vadd.f32 %v3597_v34, %v2205_v31  ;;  %v4424_v54 = vadd.f32 %v3679_v35, %v2213_v15 }
 0x41f   : > { %v3601_v39 = vpop.f32.mrb[10].mxu0  ;;  %v3683_v38 = vpop.f32.mrb[10].mxu1  ;;  %v4423_v48 = vadd.f32 %v3599_v36, %v2209_v51  ;;  %v4425_v49 = vadd.f32 %v3681_v37, %v2217_v7 }
 0x420   : > { %v3602_v41 = vpop.f32.mrb[11].mxu0  ;;  %v3684_v42 = vpop.f32.mrb[11].mxu1  ;;  %v4412_v50 = vmul.f32 -1.442695, %v4422_v16  ;;  %v4414_v52 = vmul.f32 -1.442695, %v4424_v54 }
 0x421   : > { %v4413_v47 = vmul.f32 -1.442695, %v4423_v48  ;;  %v4415_v53 = vmul.f32 -1.442695, %v4425_v49 }
 0x422   : > { %4563 = vpow2.f32 %v4412_v50 }
 0x423   : > { %4565 = vpow2.f32 %v4414_v52 }
 0x424   : > { %4567 = vpow2.f32 %v4413_v47  ;;  %v5240_v47 = vmov %v5146_v24 }
 0x425   : > { %4569 = vpow2.f32 %v4415_v53 }
 0x42c   : > { %v4564_v55 = vpop.eup %4563 }
 0x42d   : > { %v4566_v56 = vpop.eup %4565  ;;  %v3856_v59 = vadd.f32 1.0, %v4564_v55 }
 0x42e   : > { %v4568_v57 = vpop.eup %4567  ;;  %v3868_v60 = vadd.f32 1.0, %v4566_v56 }
 0x42f   : > { %v4570_v58 = vpop.eup %4569  ;;  %v3857_v61 = vadd.f32 1.0, %v4568_v57  ;;  %4571 = vrcp.f32 %v3856_v59 }
 0x430   : > { %v3869_v63 = vadd.f32 1.0, %v4570_v58  ;;  %4573 = vrcp.f32 %v3868_v60 }
 0x431   : > { %4575 = vrcp.f32 %v3857_v61 }
 0x432   : > { %4577 = vrcp.f32 %v3869_v63 }
 0x439   : > { %v4572_v33 = vpop.eup %4571 }
 0x43a   : > { %v4574_v40 = vpop.eup %4573 }
 0x43b   : > { %v4576_v34 = vpop.eup %4575  ;;  %v3888_v39 = vmul.f32 %v4753_v44, %v4574_v40 }
 0x43c   : > { %v4578_v35 = vpop.eup %4577 }
 0x43d   : > { %v3889_v41 = vmul.f32 %v4749_v43, %v4578_v35 }
 0x49d   : > { %v3761_v5 = vpop.f32.mrb[12].mxu0 }
 0x49e   : > { %v4426_v17 = vadd.f32 %v3761_v5, %v2221_v62  ;;  %v3843_v18 = vpop.f32.mrb[12].mxu1  ;;  %v3763_v2 = vpop.f32.mrb[13].mxu0 }
 0x49f   : > { %v4428_v19 = vadd.f32 %v3843_v18, %v2229_v1  ;;  %v4427_v22 = vadd.f32 %v3763_v2, %v2225_v3  ;;  %v3845_v23 = vpop.f32.mrb[13].mxu1  ;;  %v3765_v25 = vpop.f32.mrb[14].mxu0 }
 0x4a0   : > { %4579 = vtanh.f32 %v4426_v17  ;;  %v4429_v27 = vadd.f32 %v3845_v23, %v2233_v4  ;;  %v3847_v28 = vpop.f32.mrb[14].mxu1  ;;  %v3766_v29 = vpop.f32.mrb[15].mxu0 }
 0x4a1   : > { %v4416_v32 = vmul.f32 -1.442695, %v4428_v19  ;;  %4581 = vtanh.f32 %v4427_v22  ;;  %v3848_v45 = vpop.f32.mrb[15].mxu1 }
 0x4a2   : > { %v4417_v30 = vmul.f32 -1.442695, %v4429_v27 }
 0x4a3   : > { %4583 = vpow2.f32 %v4416_v32 }
 0x4a4   : > { %4585 = vpow2.f32 %v4417_v30 }
 0x4aa   : > { %v4580_v36 = vpop.eup %4579 }
 0x4ab   : > { %v4582_v37 = vpop.eup %4581  ;;  %v3890_v38 = vmul.f32 %v4580_v36, %v4572_v33 }
 0x4ac   : > { %v3891_v42 = vmul.f32 %v4582_v37, %v4576_v34 }
 0x4ad   : > { %v4584_v10 = vpop.eup %4583  ;;  %v3892_v44 = vadd.f32 %v3890_v38, %v3888_v39  }
 0x4ae   : > { %v4586_v31 = vpop.eup %4585  ;;  %v3882_v15 = vadd.f32 1.0, %v4584_v10  ;;  %v3893_v43 = vadd.f32 %v3891_v42, %v3889_v41  }
 0x4af   : > { %4587 = vtanh.f32 %v3892_v44  ;;  %v3883_v51 = vadd.f32 1.0, %v4586_v31 }
 0x4b0   : > { %4589 = vrcp.f32 %v3882_v15 }
 0x4b1   : > { %4591 = vtanh.f32 %v3893_v43 }
 0x4b2   : > { %4593 = vrcp.f32 %v3883_v51 }
 0x4b9   : > { %v4588_v7 = vpop.eup %4587  ;;  %926 = sbr.rel (!%p924_p12) target bundleno = 398 (0x18e), region = 77 }
 0x4ba   : > { %v4590_v16 = vpop.eup %4589 }
 0x4bb   : > { %v4592_v54 = vpop.eup %4591  ;;  %v3896_v45 = vmul.f32 %v4590_v16, %v4588_v7  }
 0x4bc   : > { %v4594_v48 = vpop.eup %4593 }
 0x4bd   : > { %3901 = vst [vmem:[%s3900_s2] sm:$0xff] %v3896_v45  ;;  %v3897_v31 = vmul.f32 %v4594_v48, %v4592_v54  }
 0x4bf   : > { %3902 = vst [vmem:[%s3900_s2 + $0x8] sm:$0xff] %v3897_v31 }
 0x4c0   :  { %3915 = vsyncpa [#allocation8], 1 }
 0x4c1   :  { %3916 = vsyncpa [#allocation10], 1 }
 0x4c2   :  { %3917 = vsyncpa [#allocation13], 1 }

</bundles_post_ra>
